<compile_context>
chip_gen: v5e
topology: v5e:2x2
jax: 0.10.0
libtpu: 0.0.40
codegen_flags: <defaults>
</compile_context>

<pallas_src>
from types import SimpleNamespace

import numpy as np
import jax
import jax.numpy as jnp
from jax import lax
from jax.experimental import pallas as pl
from jax.experimental.pallas import tpu as pltpu

# ----------------------------- config ---------------------------------------
cfg = SimpleNamespace(
    vocab_num=64,
    embed_dim=32,
    pos_num=16,
    head_num=4,
    block_num=2,
    multi=4,
    linenum=2,
    lstmnum=2,
)
BATCH = 2
SEQ = 8
D = cfg.embed_dim
H = cfg.head_num
DH = D // H                              # 8
BT = BATCH * SEQ                         # 16
ATTN_SCALE = 1.0 / (DH ** 0.5)           # 1/sqrt(dk), folded into Wq at init
OUT_PAD = 128                            # lane-dense pad for the final [D,2] proj

# ---------------------- host-side static constants ----------------------------
# batch-major (b*T + t) -> time-major (t*B + b) permutation as a 0/1 matrix
_PERM_NP = np.zeros((SEQ * BATCH, BATCH * SEQ), np.float32)
for _t in range(SEQ):
    for _b in range(BATCH):
        _PERM_NP[_t * BATCH + _b, _b * SEQ + _t] = 1.0

# additive block-diagonal batch mask for the flattened [BT, BT] attention scores
_BMASK_NP = np.full((BT, BT), -1e30, np.float32)
for _b in range(BATCH):
    _BMASK_NP[_b * SEQ:(_b + 1) * SEQ, _b * SEQ:(_b + 1) * SEQ] = 0.0
# NOTE: the reference GPT2 is built with isMask=False, so no causal mask.

# per-head 0/1 column masks over the head-ordered [*, D] q/k/v slabs
_HMASK_NP = np.zeros((H, 1, D), np.float32)
for _h in range(H):
    _HMASK_NP[_h, 0, _h * DH:(_h + 1) * DH] = 1.0


# --------------------------- in-kernel helpers --------------------------------
def _layernorm(x, g, b, eps=1e-5):
    mu = jnp.mean(x, axis=-1, keepdims=True)
    var = jnp.mean((x - mu) ** 2, axis=-1, keepdims=True)
    return (x - mu) * lax.rsqrt(var + eps) * g + b


def _leaky_relu(x):
    return jnp.where(x >= 0, x, 0.01 * x)   # PyTorch LeakyReLU default slope


# ------------------------------ fused kernel ----------------------------------
def gpt2_fused_kernel(le_ref,                     # SMEM [B] int32
                      h_ref,                      # [BT, D] embedded input
                      bmask_ref,                  # [BT, BT] additive batch mask
                      hmask_ref,                  # [H, 1, D] head column masks
                      perm_ref,                   # [T*B, B*T] permutation matrix
                      ln1_g_ref, ln1_b_ref,       # [NB, 1, D]
                      wq_ref, bq_ref,             # [NB, D, D], [NB, 1, D] (scale folded)
                      wk_ref, bk_ref,             # [NB, D, D], [NB, 1, D]
                      wv_ref, bv_ref,             # [NB, D, D], [NB, 1, D]
                      proj_w_ref, proj_b_ref,     # [NB, D, D],  [NB, 1, D]
                      ln2_g_ref, ln2_b_ref,       # [NB, 1, D]
                      mlp_w1_ref, mlp_b1_ref,     # [NB, D, 4D], [NB, 1, 4D]
                      mlp_w2_ref, mlp_b2_ref,     # [NB, 4D, D], [NB, 1, D]
                      lin_w_ref,                  # [NL, D, D]
                      lstm_wih_ref, lstm_whh_ref, lstm_b_ref,  # [NLSTM,D,4D]x2, [NLSTM,1,4D]
                      out_w_ref,                  # [D, OUT_PAD] (zero-padded past col 2)
                      o_ref,                      # [B, OUT_PAD]  (output)
                      seq_scratch):               # [T*B, D]      (VMEM scratch)
    f32 = jnp.float32
    x = h_ref[...].astype(f32)                                        # [BT, D]

    bmask = bmask_ref[...]                                            # [BT, BT]
    hmasks = [hmask_ref[hh] for hh in range(H)]                       # each [1, D]

    # ------------------------- transformer blocks ----------------------------
    for blk in range(cfg.block_num):
        hN = _layernorm(x, ln1_g_ref[blk], ln1_b_ref[blk])
        q = jnp.dot(hN, wq_ref[blk], preferred_element_type=f32) + bq_ref[blk]
        k = jnp.dot(hN, wk_ref[blk], preferred_element_type=f32) + bk_ref[blk]
        v = jnp.dot(hN, wv_ref[blk], preferred_element_type=f32) + bv_ref[blk]

        attn = jnp.zeros((BT, D), f32)
        for hh in range(H):
            hm = hmasks[hh]
            # full-width (K=D) masked matmul == per-head q_h @ k_h^T (scale folded)
            s = lax.dot_general(q * hm, k, (((1,), (1,)), ((), ())),
                                preferred_element_type=f32) + bmask    # [BT, BT]
            s = s - jnp.max(s, axis=-1, keepdims=True)
            p = jnp.exp(s)
            p = p * pl.reciprocal(jnp.sum(p, axis=-1, keepdims=True), approx=True)
            # head output lands in its own D columns thanks to the v mask
            attn = attn + jnp.dot(p, v * hm, preferred_element_type=f32)

        # c_proj + residual, LN2, MLP + residual
        a = jnp.dot(attn, proj_w_ref[blk], preferred_element_type=f32) \
            + proj_b_ref[blk] + x
        a = _layernorm(a, ln2_g_ref[blk], ln2_b_ref[blk])
        m = _leaky_relu(jnp.dot(a, mlp_w1_ref[blk],
                                preferred_element_type=f32) + mlp_b1_ref[blk])
        x = jnp.dot(m, mlp_w2_ref[blk],
                    preferred_element_type=f32) + mlp_b2_ref[blk] + a

    # TODO(synk): the reference's dead `b = self.output_layer(h)` branch is skipped.

    # ----------------------- bias-free linear stack --------------------------
    g = x
    for l in range(cfg.linenum):
        g = _leaky_relu(jnp.dot(g, lin_w_ref[l], preferred_element_type=f32))

    # ------- batch-major -> time-major via one MXU permutation matmul --------
    seq = jnp.dot(perm_ref[...], g, preferred_element_type=f32)       # [T*B, D]

    # ------------------- stacked LSTM (layer wavefront) ----------------------
    L = cfg.lstmnum
    # layer-0 input projection hoisted out of the recurrence (one wide matmul)
    gates_x0 = jnp.dot(seq, lstm_wih_ref[0],
                       preferred_element_type=f32) + lstm_b_ref[0]    # [T*B, 4D]
    h_st = [jnp.zeros((BATCH, D), f32) for _ in range(L)]
    c_st = [jnp.zeros((BATCH, D), f32) for _ in range(L)]
    for t in range(SEQ):
        x_in = None
        for l in range(L):
            if l == 0:
                gx = gates_x0[t * BATCH:(t + 1) * BATCH, :]           # [B, 4D]
            else:
                gx = jnp.dot(x_in, lstm_wih_ref[l],
                             preferred_element_type=f32) + lstm_b_ref[l]
            gates = gx + jnp.dot(h_st[l], lstm_whh_ref[l],
                                 preferred_element_type=f32)          # [B, 4D]
            sg = jax.nn.sigmoid(gates)              # ONE EUP pass over all gates
            i_g = sg[:, 0:D]                        # PyTorch gate order i, f, g, o
            f_g = sg[:, D:2 * D]
            o_g = sg[:, 3 * D:4 * D]
            g_g = jnp.tanh(gates[:, 2 * D:3 * D])
            c_st[l] = f_g * c_st[l] + i_g * g_g
            h_st[l] = o_g * jnp.tanh(c_st[l])
            x_in = h_st[l]
        # store top-layer output for step t at static offsets (time-major rows)
        seq_scratch[t * BATCH:(t + 1) * BATCH, :] = h_st[L - 1]

    # ------ select out[b, le[b], :] and project (time-major row = le[b]*B + b)
    out_w = out_w_ref[...]                                            # [D, OUT_PAD]
    for b in range(BATCH):
        row = seq_scratch[pl.ds(le_ref[b] * BATCH + b, 1), :]         # [1, D]
        o_ref[pl.ds(b, 1), :] = jnp.dot(
            row, out_w, preferred_element_type=f32).astype(o_ref.dtype)


# ------------------------------ host wrapper ----------------------------------
def gpt2_forward(params, x_tok, p_pos, le):
    B, T = x_tok.shape
    # embedding gather done in plain JAX glue
    e = jnp.take(params["vocab_embed"], x_tok, axis=0)                # [B,T,D]
    pe = jnp.take(params["pos_embed"], p_pos, axis=0)                 # [B,T,D]
    # dropout layers are identity (inference semantics)
    h = (e + pe).reshape(B * T, D).astype(jnp.float32)

    vmem_args = (
        h,
        jnp.asarray(_BMASK_NP), jnp.asarray(_HMASK_NP), jnp.asarray(_PERM_NP),
        params["ln1_g"], params["ln1_b"],
        params["attn_wq"], params["attn_bq"],
        params["attn_wk"], params["attn_bk"],
        params["attn_wv"], params["attn_bv"],
        params["proj_w"], params["proj_b"],
        params["ln2_g"], params["ln2_b"],
        params["mlp_w1"], params["mlp_b1"],
        params["mlp_w2"], params["mlp_b2"],
        params["lin_w"],
        params["lstm_wih"], params["lstm_whh"], params["lstm_b"],
        params["out_w_pad"],
    )

    out_pad = pl.pallas_call(
        gpt2_fused_kernel,
        out_shape=jax.ShapeDtypeStruct((B, OUT_PAD), jnp.float32),
        in_specs=[pl.BlockSpec(memory_space=pltpu.MemorySpace.SMEM)]
        + [pl.BlockSpec(memory_space=pltpu.MemorySpace.VMEM)] * len(vmem_args),
        out_specs=pl.BlockSpec(memory_space=pltpu.MemorySpace.VMEM),
        scratch_shapes=[pltpu.VMEM((SEQ * BATCH, D), jnp.float32)],
        compiler_params=pltpu.CompilerParams(
            vmem_limit_bytes=16 * 1024 * 1024,   # footprint < 1 MiB; safe on all gens
        ),
    )(le.astype(jnp.int32), *vmem_args)

    return out_pad[:, :2]                       # strip lane padding -> [B, 2]


gpt2_forward_jit = jax.jit(gpt2_forward)


# ----------------------------- parameters ------------------------------------
def init_params(key):
    Dv, V, P = cfg.embed_dim, cfg.vocab_num, cfg.pos_num
    keys = iter(jax.random.split(key, 64))

    def nrm(shape, scale=0.02):
        return jax.random.normal(next(keys), shape, jnp.float32) * scale

    NB, NL, NLSTM = cfg.block_num, cfg.linenum, cfg.lstmnum
    params = {}
    ve = nrm((V, Dv))
    params["vocab_embed"] = ve.at[0].set(0.0)   # row 0 zeroed, like the reference
    pe = nrm((P, Dv))
    params["pos_embed"] = pe.at[0].set(0.0)

    params["ln1_g"] = jnp.ones((NB, 1, Dv), jnp.float32)
    params["ln1_b"] = jnp.zeros((NB, 1, Dv), jnp.float32)

    # c_attn weight/bias in the reference's column layout: per head [q|k|v],
    # i.e. column = h*3*DH + part*DH + j.  Split host-side into head-ordered
    # Wq/Wk/Wv (head h -> columns h*DH:(h+1)*DH) and fold 1/sqrt(dk) into Q.
    attn_w = nrm((NB, Dv, 3 * Dv))
    attn_b = jnp.zeros((NB, 1, 3 * Dv), jnp.float32)
    q_cols = np.array([hh * 3 * DH + j for hh in range(H) for j in range(DH)])
    k_cols = q_cols + DH
    v_cols = q_cols + 2 * DH
    params["attn_wq"] = attn_w[:, :, q_cols] * ATTN_SCALE
    params["attn_bq"] = attn_b[:, :, q_cols] * ATTN_SCALE
    params["attn_wk"] = attn_w[:, :, k_cols]
    params["attn_bk"] = attn_b[:, :, k_cols]
    params["attn_wv"] = attn_w[:, :, v_cols]
    params["attn_bv"] = attn_b[:, :, v_cols]

    params["proj_w"] = nrm((NB, Dv, Dv))
    params["proj_b"] = jnp.zeros((NB, 1, Dv), jnp.float32)
    params["ln2_g"] = jnp.ones((NB, 1, Dv), jnp.float32)
    params["ln2_b"] = jnp.zeros((NB, 1, Dv), jnp.float32)
    params["mlp_w1"] = nrm((NB, Dv, cfg.multi * Dv))
    params["mlp_b1"] = jnp.zeros((NB, 1, cfg.multi * Dv), jnp.float32)
    params["mlp_w2"] = nrm((NB, cfg.multi * Dv, Dv))
    params["mlp_b2"] = jnp.zeros((NB, 1, Dv), jnp.float32)

    params["lin_w"] = nrm((NL, Dv, Dv))

    params["lstm_wih"] = nrm((NLSTM, Dv, 4 * Dv))
    params["lstm_whh"] = nrm((NLSTM, Dv, 4 * Dv))
    params["lstm_b"] = jnp.zeros((NLSTM, 1, 4 * Dv), jnp.float32)   # b_ih + b_hh summed

    out_w = nrm((Dv, 2))
    params["out_w_pad"] = jnp.pad(out_w, ((0, 0), (0, OUT_PAD - 2)))  # lane-dense pad
    return params


# -------------------------------- main ----------------------------------------
if __name__ == "__main__":
    params = init_params(jax.random.PRNGKey(0))

    x = jax.random.randint(jax.random.PRNGKey(0), (BATCH, SEQ), 0,
                           cfg.vocab_num, dtype=jnp.int32)
    p = jnp.broadcast_to(jnp.arange(SEQ, dtype=jnp.int32), (BATCH, SEQ))
    le = jnp.array([SEQ - 1, SEQ // 2], dtype=jnp.int32)

    out = gpt2_forward_jit(params, x, p, le)
    out = jax.block_until_ready(out)
    assert out.shape == (BATCH, 2) and out.dtype == jnp.float32
    print("KERNEL_OK")
</pallas_src>

<mosaic_0001>
module attributes {stable_mosaic.version = 11 : i64} {
  func.func @gpt2_fused_kernel(%arg0: memref<2xi32, #tpu.memory_space<smem>>, %arg1: memref<16x32xf32, #tpu.memory_space<vmem>>, %arg2: memref<16x16xf32, #tpu.memory_space<vmem>>, %arg3: memref<4x1x32xf32, #tpu.memory_space<vmem>>, %arg4: memref<16x16xf32, #tpu.memory_space<vmem>>, %arg5: memref<2x1x32xf32, #tpu.memory_space<vmem>>, %arg6: memref<2x1x32xf32, #tpu.memory_space<vmem>>, %arg7: memref<2x32x32xf32, #tpu.memory_space<vmem>>, %arg8: memref<2x1x32xf32, #tpu.memory_space<vmem>>, %arg9: memref<2x32x32xf32, #tpu.memory_space<vmem>>, %arg10: memref<2x1x32xf32, #tpu.memory_space<vmem>>, %arg11: memref<2x32x32xf32, #tpu.memory_space<vmem>>, %arg12: memref<2x1x32xf32, #tpu.memory_space<vmem>>, %arg13: memref<2x32x32xf32, #tpu.memory_space<vmem>>, %arg14: memref<2x1x32xf32, #tpu.memory_space<vmem>>, %arg15: memref<2x1x32xf32, #tpu.memory_space<vmem>>, %arg16: memref<2x1x32xf32, #tpu.memory_space<vmem>>, %arg17: memref<2x32x128xf32, #tpu.memory_space<vmem>>, %arg18: memref<2x1x128xf32, #tpu.memory_space<vmem>>, %arg19: memref<2x128x32xf32, #tpu.memory_space<vmem>>, %arg20: memref<2x1x32xf32, #tpu.memory_space<vmem>>, %arg21: memref<2x32x32xf32, #tpu.memory_space<vmem>>, %arg22: memref<2x32x128xf32, #tpu.memory_space<vmem>>, %arg23: memref<2x32x128xf32, #tpu.memory_space<vmem>>, %arg24: memref<2x1x128xf32, #tpu.memory_space<vmem>>, %arg25: memref<32x128xf32, #tpu.memory_space<vmem>>, %arg26: memref<2x128xf32, #tpu.memory_space<vmem>>, %arg27: memref<16x32xf32, #tpu.memory_space<vmem>>) attributes {dimension_semantics = [], scalar_prefetch = 0 : i64, scratch_operands = 1 : i64, tpu.core_type = #tpu.core_type<tc>} {
    %c0 = arith.constant 0 : index
    %c0_0 = arith.constant 0 : index
    %0 = vector.load %arg1[%c0, %c0_0] : memref<16x32xf32, #tpu.memory_space<vmem>>, vector<16x32xf32>
    %c0_1 = arith.constant 0 : index
    %c0_2 = arith.constant 0 : index
    %1 = vector.load %arg2[%c0_1, %c0_2] : memref<16x16xf32, #tpu.memory_space<vmem>>, vector<16x16xf32>
    %c0_3 = arith.constant 0 : index
    %c0_4 = arith.constant 0 : index
    %c0_5 = arith.constant 0 : index
    %2 = vector.load %arg3[%c0_3, %c0_4, %c0_5] : memref<4x1x32xf32, #tpu.memory_space<vmem>>, vector<1x1x32xf32>
    %3 = vector.shape_cast %2 : vector<1x1x32xf32> to vector<1x32xf32>
    %c1 = arith.constant 1 : index
    %c0_6 = arith.constant 0 : index
    %c0_7 = arith.constant 0 : index
    %4 = vector.load %arg3[%c1, %c0_6, %c0_7] : memref<4x1x32xf32, #tpu.memory_space<vmem>>, vector<1x1x32xf32>
    %5 = vector.shape_cast %4 : vector<1x1x32xf32> to vector<1x32xf32>
    %c2 = arith.constant 2 : index
    %c0_8 = arith.constant 0 : index
    %c0_9 = arith.constant 0 : index
    %6 = vector.load %arg3[%c2, %c0_8, %c0_9] : memref<4x1x32xf32, #tpu.memory_space<vmem>>, vector<1x1x32xf32>
    %7 = vector.shape_cast %6 : vector<1x1x32xf32> to vector<1x32xf32>
    %c3 = arith.constant 3 : index
    %c0_10 = arith.constant 0 : index
    %c0_11 = arith.constant 0 : index
    %8 = vector.load %arg3[%c3, %c0_10, %c0_11] : memref<4x1x32xf32, #tpu.memory_space<vmem>>, vector<1x1x32xf32>
    %9 = vector.shape_cast %8 : vector<1x1x32xf32> to vector<1x32xf32>
    %c0_12 = arith.constant 0 : index
    %c0_13 = arith.constant 0 : index
    %c0_14 = arith.constant 0 : index
    %10 = vector.load %arg5[%c0_12, %c0_13, %c0_14] : memref<2x1x32xf32, #tpu.memory_space<vmem>>, vector<1x1x32xf32>
    %11 = vector.shape_cast %10 : vector<1x1x32xf32> to vector<1x32xf32>
    %c0_15 = arith.constant 0 : index
    %c0_16 = arith.constant 0 : index
    %c0_17 = arith.constant 0 : index
    %12 = vector.load %arg6[%c0_15, %c0_16, %c0_17] : memref<2x1x32xf32, #tpu.memory_space<vmem>>, vector<1x1x32xf32>
    %13 = vector.shape_cast %12 : vector<1x1x32xf32> to vector<1x32xf32>
    %cst = arith.constant dense<0.000000e+00> : vector<16xf32>
    %14 = vector.multi_reduction <add>, %0, %cst [1] : vector<16x32xf32> to vector<16xf32>
    %15 = vector.shape_cast %14 : vector<16xf32> to vector<16x1xf32>
    %cst_18 = arith.constant 3.200000e+01 : f32
    %16 = vector.broadcast %cst_18 : f32 to vector<16x1xf32>
    %17 = arith.divf %15, %16 : vector<16x1xf32>
    %18 = vector.broadcast %17 : vector<16x1xf32> to vector<16x32xf32>
    %19 = arith.subf %0, %18 : vector<16x32xf32>
    %20 = arith.mulf %19, %19 : vector<16x32xf32>
    %cst_19 = arith.constant dense<0.000000e+00> : vector<16xf32>
    %21 = vector.multi_reduction <add>, %20, %cst_19 [1] : vector<16x32xf32> to vector<16xf32>
    %22 = vector.shape_cast %21 : vector<16xf32> to vector<16x1xf32>
    %cst_20 = arith.constant 3.200000e+01 : f32
    %23 = vector.broadcast %cst_20 : f32 to vector<16x1xf32>
    %24 = arith.divf %22, %23 : vector<16x1xf32>
    %25 = vector.broadcast %17 : vector<16x1xf32> to vector<16x32xf32>
    %26 = arith.subf %0, %25 : vector<16x32xf32>
    %cst_21 = arith.constant 9.99999974E-6 : f32
    %27 = vector.broadcast %cst_21 : f32 to vector<16x1xf32>
    %28 = arith.addf %24, %27 : vector<16x1xf32>
    %29 = math.rsqrt %28 : vector<16x1xf32>
    %30 = vector.broadcast %29 : vector<16x1xf32> to vector<16x32xf32>
    %31 = arith.mulf %26, %30 : vector<16x32xf32>
    %32 = vector.broadcast %11 : vector<1x32xf32> to vector<16x32xf32>
    %33 = arith.mulf %31, %32 : vector<16x32xf32>
    %34 = vector.broadcast %13 : vector<1x32xf32> to vector<16x32xf32>
    %35 = arith.addf %33, %34 : vector<16x32xf32>
    %c0_22 = arith.constant 0 : index
    %c0_23 = arith.constant 0 : index
    %c0_24 = arith.constant 0 : index
    %36 = vector.load %arg7[%c0_22, %c0_23, %c0_24] : memref<2x32x32xf32, #tpu.memory_space<vmem>>, vector<1x32x32xf32>
    %37 = vector.shape_cast %36 : vector<1x32x32xf32> to vector<32x32xf32>
    %cst_25 = arith.constant dense<0.000000e+00> : vector<16x32xf32>
    %38 = tpu.matmul %35, %37, %cst_25 {dimension_numbers = #tpu.dot_dimension_numbers<[1], [0], [0], [1], [0, 0, 1, 1], [], []>} : vector<16x32xf32>, vector<32x32xf32>, vector<16x32xf32> -> vector<16x32xf32>
    %c0_26 = arith.constant 0 : index
    %c0_27 = arith.constant 0 : index
    %c0_28 = arith.constant 0 : index
    %39 = vector.load %arg8[%c0_26, %c0_27, %c0_28] : memref<2x1x32xf32, #tpu.memory_space<vmem>>, vector<1x1x32xf32>
    %40 = vector.shape_cast %39 : vector<1x1x32xf32> to vector<1x32xf32>
    %41 = vector.broadcast %40 : vector<1x32xf32> to vector<16x32xf32>
    %42 = arith.addf %38, %41 : vector<16x32xf32>
    %c0_29 = arith.constant 0 : index
    %c0_30 = arith.constant 0 : index
    %c0_31 = arith.constant 0 : index
    %43 = vector.load %arg9[%c0_29, %c0_30, %c0_31] : memref<2x32x32xf32, #tpu.memory_space<vmem>>, vector<1x32x32xf32>
    %44 = vector.shape_cast %43 : vector<1x32x32xf32> to vector<32x32xf32>
    %cst_32 = arith.constant dense<0.000000e+00> : vector<16x32xf32>
    %45 = tpu.matmul %35, %44, %cst_32 {dimension_numbers = #tpu.dot_dimension_numbers<[1], [0], [0], [1], [0, 0, 1, 1], [], []>} : vector<16x32xf32>, vector<32x32xf32>, vector<16x32xf32> -> vector<16x32xf32>
    %c0_33 = arith.constant 0 : index
    %c0_34 = arith.constant 0 : index
    %c0_35 = arith.constant 0 : index
    %46 = vector.load %arg10[%c0_33, %c0_34, %c0_35] : memref<2x1x32xf32, #tpu.memory_space<vmem>>, vector<1x1x32xf32>
    %47 = vector.shape_cast %46 : vector<1x1x32xf32> to vector<1x32xf32>
    %48 = vector.broadcast %47 : vector<1x32xf32> to vector<16x32xf32>
    %49 = arith.addf %45, %48 : vector<16x32xf32>
    %c0_36 = arith.constant 0 : index
    %c0_37 = arith.constant 0 : index
    %c0_38 = arith.constant 0 : index
    %50 = vector.load %arg11[%c0_36, %c0_37, %c0_38] : memref<2x32x32xf32, #tpu.memory_space<vmem>>, vector<1x32x32xf32>
    %51 = vector.shape_cast %50 : vector<1x32x32xf32> to vector<32x32xf32>
    %cst_39 = arith.constant dense<0.000000e+00> : vector<16x32xf32>
    %52 = tpu.matmul %35, %51, %cst_39 {dimension_numbers = #tpu.dot_dimension_numbers<[1], [0], [0], [1], [0, 0, 1, 1], [], []>} : vector<16x32xf32>, vector<32x32xf32>, vector<16x32xf32> -> vector<16x32xf32>
    %c0_40 = arith.constant 0 : index
    %c0_41 = arith.constant 0 : index
    %c0_42 = arith.constant 0 : index
    %53 = vector.load %arg12[%c0_40, %c0_41, %c0_42] : memref<2x1x32xf32, #tpu.memory_space<vmem>>, vector<1x1x32xf32>
    %54 = vector.shape_cast %53 : vector<1x1x32xf32> to vector<1x32xf32>
    %55 = vector.broadcast %54 : vector<1x32xf32> to vector<16x32xf32>
    %56 = arith.addf %52, %55 : vector<16x32xf32>
    %cst_43 = arith.constant 0.000000e+00 : f32
    %57 = vector.broadcast %cst_43 : f32 to vector<16x32xf32>
    %58 = vector.broadcast %3 : vector<1x32xf32> to vector<16x32xf32>
    %59 = arith.mulf %42, %58 : vector<16x32xf32>
    %cst_44 = arith.constant dense<0.000000e+00> : vector<16x16xf32>
    %60 = tpu.matmul %59, %49, %cst_44 {dimension_numbers = #tpu.dot_dimension_numbers<[1], [1], [0], [0], [0, 0, 1, 0], [], []>} : vector<16x32xf32>, vector<16x32xf32>, vector<16x16xf32> -> vector<16x16xf32>
    %61 = arith.addf %60, %1 : vector<16x16xf32>
    %cst_45 = arith.constant dense<0xFF800000> : vector<16xf32>
    %62 = vector.multi_reduction <maximumf>, %61, %cst_45 [1] : vector<16x16xf32> to vector<16xf32>
    %63 = vector.shape_cast %62 : vector<16xf32> to vector<16x1xf32>
    %64 = vector.broadcast %63 : vector<16x1xf32> to vector<16x16xf32>
    %65 = arith.subf %61, %64 : vector<16x16xf32>
    %66 = math.exp %65 : vector<16x16xf32>
    %cst_46 = arith.constant dense<0.000000e+00> : vector<16xf32>
    %67 = vector.multi_reduction <add>, %66, %cst_46 [1] : vector<16x16xf32> to vector<16xf32>
    %68 = vector.shape_cast %67 : vector<16xf32> to vector<16x1xf32>
    %69 = tpu.reciprocal %68 {approx = true} : vector<16x1xf32> -> vector<16x1xf32>
    %70 = vector.broadcast %69 : vector<16x1xf32> to vector<16x16xf32>
    %71 = arith.mulf %66, %70 : vector<16x16xf32>
    %72 = vector.broadcast %3 : vector<1x32xf32> to vector<16x32xf32>
    %73 = arith.mulf %56, %72 : vector<16x32xf32>
    %cst_47 = arith.constant dense<0.000000e+00> : vector<16x32xf32>
    %74 = tpu.matmul %71, %73, %cst_47 {dimension_numbers = #tpu.dot_dimension_numbers<[1], [0], [0], [1], [0, 0, 1, 1], [], []>} : vector<16x16xf32>, vector<16x32xf32>, vector<16x32xf32> -> vector<16x32xf32>
    %75 = arith.addf %57, %74 : vector<16x32xf32>
    %76 = vector.broadcast %5 : vector<1x32xf32> to vector<16x32xf32>
    %77 = arith.mulf %42, %76 : vector<16x32xf32>
    %cst_48 = arith.constant dense<0.000000e+00> : vector<16x16xf32>
    %78 = tpu.matmul %77, %49, %cst_48 {dimension_numbers = #tpu.dot_dimension_numbers<[1], [1], [0], [0], [0, 0, 1, 0], [], []>} : vector<16x32xf32>, vector<16x32xf32>, vector<16x16xf32> -> vector<16x16xf32>
    %79 = arith.addf %78, %1 : vector<16x16xf32>
    %cst_49 = arith.constant dense<0xFF800000> : vector<16xf32>
    %80 = vector.multi_reduction <maximumf>, %79, %cst_49 [1] : vector<16x16xf32> to vector<16xf32>
    %81 = vector.shape_cast %80 : vector<16xf32> to vector<16x1xf32>
    %82 = vector.broadcast %81 : vector<16x1xf32> to vector<16x16xf32>
    %83 = arith.subf %79, %82 : vector<16x16xf32>
    %84 = math.exp %83 : vector<16x16xf32>
    %cst_50 = arith.constant dense<0.000000e+00> : vector<16xf32>
    %85 = vector.multi_reduction <add>, %84, %cst_50 [1] : vector<16x16xf32> to vector<16xf32>
    %86 = vector.shape_cast %85 : vector<16xf32> to vector<16x1xf32>
    %87 = tpu.reciprocal %86 {approx = true} : vector<16x1xf32> -> vector<16x1xf32>
    %88 = vector.broadcast %87 : vector<16x1xf32> to vector<16x16xf32>
    %89 = arith.mulf %84, %88 : vector<16x16xf32>
    %90 = vector.broadcast %5 : vector<1x32xf32> to vector<16x32xf32>
    %91 = arith.mulf %56, %90 : vector<16x32xf32>
    %cst_51 = arith.constant dense<0.000000e+00> : vector<16x32xf32>
    %92 = tpu.matmul %89, %91, %cst_51 {dimension_numbers = #tpu.dot_dimension_numbers<[1], [0], [0], [1], [0, 0, 1, 1], [], []>} : vector<16x16xf32>, vector<16x32xf32>, vector<16x32xf32> -> vector<16x32xf32>
    %93 = arith.addf %75, %92 : vector<16x32xf32>
    %94 = vector.broadcast %7 : vector<1x32xf32> to vector<16x32xf32>
    %95 = arith.mulf %42, %94 : vector<16x32xf32>
    %cst_52 = arith.constant dense<0.000000e+00> : vector<16x16xf32>
    %96 = tpu.matmul %95, %49, %cst_52 {dimension_numbers = #tpu.dot_dimension_numbers<[1], [1], [0], [0], [0, 0, 1, 0], [], []>} : vector<16x32xf32>, vector<16x32xf32>, vector<16x16xf32> -> vector<16x16xf32>
    %97 = arith.addf %96, %1 : vector<16x16xf32>
    %cst_53 = arith.constant dense<0xFF800000> : vector<16xf32>
    %98 = vector.multi_reduction <maximumf>, %97, %cst_53 [1] : vector<16x16xf32> to vector<16xf32>
    %99 = vector.shape_cast %98 : vector<16xf32> to vector<16x1xf32>
    %100 = vector.broadcast %99 : vector<16x1xf32> to vector<16x16xf32>
    %101 = arith.subf %97, %100 : vector<16x16xf32>
    %102 = math.exp %101 : vector<16x16xf32>
    %cst_54 = arith.constant dense<0.000000e+00> : vector<16xf32>
    %103 = vector.multi_reduction <add>, %102, %cst_54 [1] : vector<16x16xf32> to vector<16xf32>
    %104 = vector.shape_cast %103 : vector<16xf32> to vector<16x1xf32>
    %105 = tpu.reciprocal %104 {approx = true} : vector<16x1xf32> -> vector<16x1xf32>
    %106 = vector.broadcast %105 : vector<16x1xf32> to vector<16x16xf32>
    %107 = arith.mulf %102, %106 : vector<16x16xf32>
    %108 = vector.broadcast %7 : vector<1x32xf32> to vector<16x32xf32>
    %109 = arith.mulf %56, %108 : vector<16x32xf32>
    %cst_55 = arith.constant dense<0.000000e+00> : vector<16x32xf32>
    %110 = tpu.matmul %107, %109, %cst_55 {dimension_numbers = #tpu.dot_dimension_numbers<[1], [0], [0], [1], [0, 0, 1, 1], [], []>} : vector<16x16xf32>, vector<16x32xf32>, vector<16x32xf32> -> vector<16x32xf32>
    %111 = arith.addf %93, %110 : vector<16x32xf32>
    %112 = vector.broadcast %9 : vector<1x32xf32> to vector<16x32xf32>
    %113 = arith.mulf %42, %112 : vector<16x32xf32>
    %cst_56 = arith.constant dense<0.000000e+00> : vector<16x16xf32>
    %114 = tpu.matmul %113, %49, %cst_56 {dimension_numbers = #tpu.dot_dimension_numbers<[1], [1], [0], [0], [0, 0, 1, 0], [], []>} : vector<16x32xf32>, vector<16x32xf32>, vector<16x16xf32> -> vector<16x16xf32>
    %115 = arith.addf %114, %1 : vector<16x16xf32>
    %cst_57 = arith.constant dense<0xFF800000> : vector<16xf32>
    %116 = vector.multi_reduction <maximumf>, %115, %cst_57 [1] : vector<16x16xf32> to vector<16xf32>
    %117 = vector.shape_cast %116 : vector<16xf32> to vector<16x1xf32>
    %118 = vector.broadcast %117 : vector<16x1xf32> to vector<16x16xf32>
    %119 = arith.subf %115, %118 : vector<16x16xf32>
    %120 = math.exp %119 : vector<16x16xf32>
    %cst_58 = arith.constant dense<0.000000e+00> : vector<16xf32>
    %121 = vector.multi_reduction <add>, %120, %cst_58 [1] : vector<16x16xf32> to vector<16xf32>
    %122 = vector.shape_cast %121 : vector<16xf32> to vector<16x1xf32>
    %123 = tpu.reciprocal %122 {approx = true} : vector<16x1xf32> -> vector<16x1xf32>
    %124 = vector.broadcast %123 : vector<16x1xf32> to vector<16x16xf32>
    %125 = arith.mulf %120, %124 : vector<16x16xf32>
    %126 = vector.broadcast %9 : vector<1x32xf32> to vector<16x32xf32>
    %127 = arith.mulf %56, %126 : vector<16x32xf32>
    %cst_59 = arith.constant dense<0.000000e+00> : vector<16x32xf32>
    %128 = tpu.matmul %125, %127, %cst_59 {dimension_numbers = #tpu.dot_dimension_numbers<[1], [0], [0], [1], [0, 0, 1, 1], [], []>} : vector<16x16xf32>, vector<16x32xf32>, vector<16x32xf32> -> vector<16x32xf32>
    %129 = arith.addf %111, %128 : vector<16x32xf32>
    %c0_60 = arith.constant 0 : index
    %c0_61 = arith.constant 0 : index
    %c0_62 = arith.constant 0 : index
    %130 = vector.load %arg13[%c0_60, %c0_61, %c0_62] : memref<2x32x32xf32, #tpu.memory_space<vmem>>, vector<1x32x32xf32>
    %131 = vector.shape_cast %130 : vector<1x32x32xf32> to vector<32x32xf32>
    %cst_63 = arith.constant dense<0.000000e+00> : vector<16x32xf32>
    %132 = tpu.matmul %129, %131, %cst_63 {dimension_numbers = #tpu.dot_dimension_numbers<[1], [0], [0], [1], [0, 0, 1, 1], [], []>} : vector<16x32xf32>, vector<32x32xf32>, vector<16x32xf32> -> vector<16x32xf32>
    %c0_64 = arith.constant 0 : index
    %c0_65 = arith.constant 0 : index
    %c0_66 = arith.constant 0 : index
    %133 = vector.load %arg14[%c0_64, %c0_65, %c0_66] : memref<2x1x32xf32, #tpu.memory_space<vmem>>, vector<1x1x32xf32>
    %134 = vector.shape_cast %133 : vector<1x1x32xf32> to vector<1x32xf32>
    %135 = vector.broadcast %134 : vector<1x32xf32> to vector<16x32xf32>
    %136 = arith.addf %132, %135 : vector<16x32xf32>
    %137 = arith.addf %136, %0 : vector<16x32xf32>
    %c0_67 = arith.constant 0 : index
    %c0_68 = arith.constant 0 : index
    %c0_69 = arith.constant 0 : index
    %138 = vector.load %arg15[%c0_67, %c0_68, %c0_69] : memref<2x1x32xf32, #tpu.memory_space<vmem>>, vector<1x1x32xf32>
    %139 = vector.shape_cast %138 : vector<1x1x32xf32> to vector<1x32xf32>
    %c0_70 = arith.constant 0 : index
    %c0_71 = arith.constant 0 : index
    %c0_72 = arith.constant 0 : index
    %140 = vector.load %arg16[%c0_70, %c0_71, %c0_72] : memref<2x1x32xf32, #tpu.memory_space<vmem>>, vector<1x1x32xf32>
    %141 = vector.shape_cast %140 : vector<1x1x32xf32> to vector<1x32xf32>
    %cst_73 = arith.constant dense<0.000000e+00> : vector<16xf32>
    %142 = vector.multi_reduction <add>, %137, %cst_73 [1] : vector<16x32xf32> to vector<16xf32>
    %143 = vector.shape_cast %142 : vector<16xf32> to vector<16x1xf32>
    %cst_74 = arith.constant 3.200000e+01 : f32
    %144 = vector.broadcast %cst_74 : f32 to vector<16x1xf32>
    %145 = arith.divf %143, %144 : vector<16x1xf32>
    %146 = vector.broadcast %145 : vector<16x1xf32> to vector<16x32xf32>
    %147 = arith.subf %137, %146 : vector<16x32xf32>
    %148 = arith.mulf %147, %147 : vector<16x32xf32>
    %cst_75 = arith.constant dense<0.000000e+00> : vector<16xf32>
    %149 = vector.multi_reduction <add>, %148, %cst_75 [1] : vector<16x32xf32> to vector<16xf32>
    %150 = vector.shape_cast %149 : vector<16xf32> to vector<16x1xf32>
    %cst_76 = arith.constant 3.200000e+01 : f32
    %151 = vector.broadcast %cst_76 : f32 to vector<16x1xf32>
    %152 = arith.divf %150, %151 : vector<16x1xf32>
    %153 = vector.broadcast %145 : vector<16x1xf32> to vector<16x32xf32>
    %154 = arith.subf %137, %153 : vector<16x32xf32>
    %cst_77 = arith.constant 9.99999974E-6 : f32
    %155 = vector.broadcast %cst_77 : f32 to vector<16x1xf32>
    %156 = arith.addf %152, %155 : vector<16x1xf32>
    %157 = math.rsqrt %156 : vector<16x1xf32>
    %158 = vector.broadcast %157 : vector<16x1xf32> to vector<16x32xf32>
    %159 = arith.mulf %154, %158 : vector<16x32xf32>
    %160 = vector.broadcast %139 : vector<1x32xf32> to vector<16x32xf32>
    %161 = arith.mulf %159, %160 : vector<16x32xf32>
    %162 = vector.broadcast %141 : vector<1x32xf32> to vector<16x32xf32>
    %163 = arith.addf %161, %162 : vector<16x32xf32>
    %c0_78 = arith.constant 0 : index
    %c0_79 = arith.constant 0 : index
    %c0_80 = arith.constant 0 : index
    %164 = vector.load %arg17[%c0_78, %c0_79, %c0_80] : memref<2x32x128xf32, #tpu.memory_space<vmem>>, vector<1x32x128xf32>
    %165 = vector.shape_cast %164 : vector<1x32x128xf32> to vector<32x128xf32>
    %cst_81 = arith.constant dense<0.000000e+00> : vector<16x128xf32>
    %166 = tpu.matmul %163, %165, %cst_81 {dimension_numbers = #tpu.dot_dimension_numbers<[1], [0], [0], [1], [0, 0, 1, 1], [], []>} : vector<16x32xf32>, vector<32x128xf32>, vector<16x128xf32> -> vector<16x128xf32>
    %c0_82 = arith.constant 0 : index
    %c0_83 = arith.constant 0 : index
    %c0_84 = arith.constant 0 : index
    %167 = vector.load %arg18[%c0_82, %c0_83, %c0_84] : memref<2x1x128xf32, #tpu.memory_space<vmem>>, vector<1x1x128xf32>
    %168 = vector.shape_cast %167 : vector<1x1x128xf32> to vector<1x128xf32>
    %169 = vector.broadcast %168 : vector<1x128xf32> to vector<16x128xf32>
    %170 = arith.addf %166, %169 : vector<16x128xf32>
    %cst_85 = arith.constant 0.000000e+00 : f32
    %171 = vector.broadcast %cst_85 : f32 to vector<16x128xf32>
    %172 = arith.cmpf oge, %170, %171 : vector<16x128xf32>
    %cst_86 = arith.constant 0.00999999977 : f32
    %173 = vector.broadcast %cst_86 : f32 to vector<16x128xf32>
    %174 = arith.mulf %173, %170 : vector<16x128xf32>
    %175 = arith.select %172, %170, %174 : vector<16x128xi1>, vector<16x128xf32>
    %c0_87 = arith.constant 0 : index
    %c0_88 = arith.constant 0 : index
    %c0_89 = arith.constant 0 : index
    %176 = vector.load %arg19[%c0_87, %c0_88, %c0_89] : memref<2x128x32xf32, #tpu.memory_space<vmem>>, vector<1x128x32xf32>
    %177 = vector.shape_cast %176 : vector<1x128x32xf32> to vector<128x32xf32>
    %cst_90 = arith.constant dense<0.000000e+00> : vector<16x32xf32>
    %178 = tpu.matmul %175, %177, %cst_90 {dimension_numbers = #tpu.dot_dimension_numbers<[1], [0], [0], [1], [0, 0, 1, 1], [], []>} : vector<16x128xf32>, vector<128x32xf32>, vector<16x32xf32> -> vector<16x32xf32>
    %c0_91 = arith.constant 0 : index
    %c0_92 = arith.constant 0 : index
    %c0_93 = arith.constant 0 : index
    %179 = vector.load %arg20[%c0_91, %c0_92, %c0_93] : memref<2x1x32xf32, #tpu.memory_space<vmem>>, vector<1x1x32xf32>
    %180 = vector.shape_cast %179 : vector<1x1x32xf32> to vector<1x32xf32>
    %181 = vector.broadcast %180 : vector<1x32xf32> to vector<16x32xf32>
    %182 = arith.addf %178, %181 : vector<16x32xf32>
    %183 = arith.addf %182, %163 : vector<16x32xf32>
    %c1_94 = arith.constant 1 : index
    %c0_95 = arith.constant 0 : index
    %c0_96 = arith.constant 0 : index
    %184 = vector.load %arg5[%c1_94, %c0_95, %c0_96] : memref<2x1x32xf32, #tpu.memory_space<vmem>>, vector<1x1x32xf32>
    %185 = vector.shape_cast %184 : vector<1x1x32xf32> to vector<1x32xf32>
    %c1_97 = arith.constant 1 : index
    %c0_98 = arith.constant 0 : index
    %c0_99 = arith.constant 0 : index
    %186 = vector.load %arg6[%c1_97, %c0_98, %c0_99] : memref<2x1x32xf32, #tpu.memory_space<vmem>>, vector<1x1x32xf32>
    %187 = vector.shape_cast %186 : vector<1x1x32xf32> to vector<1x32xf32>
    %cst_100 = arith.constant dense<0.000000e+00> : vector<16xf32>
    %188 = vector.multi_reduction <add>, %183, %cst_100 [1] : vector<16x32xf32> to vector<16xf32>
    %189 = vector.shape_cast %188 : vector<16xf32> to vector<16x1xf32>
    %cst_101 = arith.constant 3.200000e+01 : f32
    %190 = vector.broadcast %cst_101 : f32 to vector<16x1xf32>
    %191 = arith.divf %189, %190 : vector<16x1xf32>
    %192 = vector.broadcast %191 : vector<16x1xf32> to vector<16x32xf32>
    %193 = arith.subf %183, %192 : vector<16x32xf32>
    %194 = arith.mulf %193, %193 : vector<16x32xf32>
    %cst_102 = arith.constant dense<0.000000e+00> : vector<16xf32>
    %195 = vector.multi_reduction <add>, %194, %cst_102 [1] : vector<16x32xf32> to vector<16xf32>
    %196 = vector.shape_cast %195 : vector<16xf32> to vector<16x1xf32>
    %cst_103 = arith.constant 3.200000e+01 : f32
    %197 = vector.broadcast %cst_103 : f32 to vector<16x1xf32>
    %198 = arith.divf %196, %197 : vector<16x1xf32>
    %199 = vector.broadcast %191 : vector<16x1xf32> to vector<16x32xf32>
    %200 = arith.subf %183, %199 : vector<16x32xf32>
    %cst_104 = arith.constant 9.99999974E-6 : f32
    %201 = vector.broadcast %cst_104 : f32 to vector<16x1xf32>
    %202 = arith.addf %198, %201 : vector<16x1xf32>
    %203 = math.rsqrt %202 : vector<16x1xf32>
    %204 = vector.broadcast %203 : vector<16x1xf32> to vector<16x32xf32>
    %205 = arith.mulf %200, %204 : vector<16x32xf32>
    %206 = vector.broadcast %185 : vector<1x32xf32> to vector<16x32xf32>
    %207 = arith.mulf %205, %206 : vector<16x32xf32>
    %208 = vector.broadcast %187 : vector<1x32xf32> to vector<16x32xf32>
    %209 = arith.addf %207, %208 : vector<16x32xf32>
    %c1_105 = arith.constant 1 : index
    %c0_106 = arith.constant 0 : index
    %c0_107 = arith.constant 0 : index
    %210 = vector.load %arg7[%c1_105, %c0_106, %c0_107] : memref<2x32x32xf32, #tpu.memory_space<vmem>>, vector<1x32x32xf32>
    %211 = vector.shape_cast %210 : vector<1x32x32xf32> to vector<32x32xf32>
    %cst_108 = arith.constant dense<0.000000e+00> : vector<16x32xf32>
    %212 = tpu.matmul %209, %211, %cst_108 {dimension_numbers = #tpu.dot_dimension_numbers<[1], [0], [0], [1], [0, 0, 1, 1], [], []>} : vector<16x32xf32>, vector<32x32xf32>, vector<16x32xf32> -> vector<16x32xf32>
    %c1_109 = arith.constant 1 : index
    %c0_110 = arith.constant 0 : index
    %c0_111 = arith.constant 0 : index
    %213 = vector.load %arg8[%c1_109, %c0_110, %c0_111] : memref<2x1x32xf32, #tpu.memory_space<vmem>>, vector<1x1x32xf32>
    %214 = vector.shape_cast %213 : vector<1x1x32xf32> to vector<1x32xf32>
    %215 = vector.broadcast %214 : vector<1x32xf32> to vector<16x32xf32>
    %216 = arith.addf %212, %215 : vector<16x32xf32>
    %c1_112 = arith.constant 1 : index
    %c0_113 = arith.constant 0 : index
    %c0_114 = arith.constant 0 : index
    %217 = vector.load %arg9[%c1_112, %c0_113, %c0_114] : memref<2x32x32xf32, #tpu.memory_space<vmem>>, vector<1x32x32xf32>
    %218 = vector.shape_cast %217 : vector<1x32x32xf32> to vector<32x32xf32>
    %cst_115 = arith.constant dense<0.000000e+00> : vector<16x32xf32>
    %219 = tpu.matmul %209, %218, %cst_115 {dimension_numbers = #tpu.dot_dimension_numbers<[1], [0], [0], [1], [0, 0, 1, 1], [], []>} : vector<16x32xf32>, vector<32x32xf32>, vector<16x32xf32> -> vector<16x32xf32>
    %c1_116 = arith.constant 1 : index
    %c0_117 = arith.constant 0 : index
    %c0_118 = arith.constant 0 : index
    %220 = vector.load %arg10[%c1_116, %c0_117, %c0_118] : memref<2x1x32xf32, #tpu.memory_space<vmem>>, vector<1x1x32xf32>
    %221 = vector.shape_cast %220 : vector<1x1x32xf32> to vector<1x32xf32>
    %222 = vector.broadcast %221 : vector<1x32xf32> to vector<16x32xf32>
    %223 = arith.addf %219, %222 : vector<16x32xf32>
    %c1_119 = arith.constant 1 : index
    %c0_120 = arith.constant 0 : index
    %c0_121 = arith.constant 0 : index
    %224 = vector.load %arg11[%c1_119, %c0_120, %c0_121] : memref<2x32x32xf32, #tpu.memory_space<vmem>>, vector<1x32x32xf32>
    %225 = vector.shape_cast %224 : vector<1x32x32xf32> to vector<32x32xf32>
    %cst_122 = arith.constant dense<0.000000e+00> : vector<16x32xf32>
    %226 = tpu.matmul %209, %225, %cst_122 {dimension_numbers = #tpu.dot_dimension_numbers<[1], [0], [0], [1], [0, 0, 1, 1], [], []>} : vector<16x32xf32>, vector<32x32xf32>, vector<16x32xf32> -> vector<16x32xf32>
    %c1_123 = arith.constant 1 : index
    %c0_124 = arith.constant 0 : index
    %c0_125 = arith.constant 0 : index
    %227 = vector.load %arg12[%c1_123, %c0_124, %c0_125] : memref<2x1x32xf32, #tpu.memory_space<vmem>>, vector<1x1x32xf32>
    %228 = vector.shape_cast %227 : vector<1x1x32xf32> to vector<1x32xf32>
    %229 = vector.broadcast %228 : vector<1x32xf32> to vector<16x32xf32>
    %230 = arith.addf %226, %229 : vector<16x32xf32>
    %cst_126 = arith.constant 0.000000e+00 : f32
    %231 = vector.broadcast %cst_126 : f32 to vector<16x32xf32>
    %232 = vector.broadcast %3 : vector<1x32xf32> to vector<16x32xf32>
    %233 = arith.mulf %216, %232 : vector<16x32xf32>
    %cst_127 = arith.constant dense<0.000000e+00> : vector<16x16xf32>
    %234 = tpu.matmul %233, %223, %cst_127 {dimension_numbers = #tpu.dot_dimension_numbers<[1], [1], [0], [0], [0, 0, 1, 0], [], []>} : vector<16x32xf32>, vector<16x32xf32>, vector<16x16xf32> -> vector<16x16xf32>
    %235 = arith.addf %234, %1 : vector<16x16xf32>
    %cst_128 = arith.constant dense<0xFF800000> : vector<16xf32>
    %236 = vector.multi_reduction <maximumf>, %235, %cst_128 [1] : vector<16x16xf32> to vector<16xf32>
    %237 = vector.shape_cast %236 : vector<16xf32> to vector<16x1xf32>
    %238 = vector.broadcast %237 : vector<16x1xf32> to vector<16x16xf32>
    %239 = arith.subf %235, %238 : vector<16x16xf32>
    %240 = math.exp %239 : vector<16x16xf32>
    %cst_129 = arith.constant dense<0.000000e+00> : vector<16xf32>
    %241 = vector.multi_reduction <add>, %240, %cst_129 [1] : vector<16x16xf32> to vector<16xf32>
    %242 = vector.shape_cast %241 : vector<16xf32> to vector<16x1xf32>
    %243 = tpu.reciprocal %242 {approx = true} : vector<16x1xf32> -> vector<16x1xf32>
    %244 = vector.broadcast %243 : vector<16x1xf32> to vector<16x16xf32>
    %245 = arith.mulf %240, %244 : vector<16x16xf32>
    %246 = vector.broadcast %3 : vector<1x32xf32> to vector<16x32xf32>
    %247 = arith.mulf %230, %246 : vector<16x32xf32>
    %cst_130 = arith.constant dense<0.000000e+00> : vector<16x32xf32>
    %248 = tpu.matmul %245, %247, %cst_130 {dimension_numbers = #tpu.dot_dimension_numbers<[1], [0], [0], [1], [0, 0, 1, 1], [], []>} : vector<16x16xf32>, vector<16x32xf32>, vector<16x32xf32> -> vector<16x32xf32>
    %249 = arith.addf %231, %248 : vector<16x32xf32>
    %250 = vector.broadcast %5 : vector<1x32xf32> to vector<16x32xf32>
    %251 = arith.mulf %216, %250 : vector<16x32xf32>
    %cst_131 = arith.constant dense<0.000000e+00> : vector<16x16xf32>
    %252 = tpu.matmul %251, %223, %cst_131 {dimension_numbers = #tpu.dot_dimension_numbers<[1], [1], [0], [0], [0, 0, 1, 0], [], []>} : vector<16x32xf32>, vector<16x32xf32>, vector<16x16xf32> -> vector<16x16xf32>
    %253 = arith.addf %252, %1 : vector<16x16xf32>
    %cst_132 = arith.constant dense<0xFF800000> : vector<16xf32>
    %254 = vector.multi_reduction <maximumf>, %253, %cst_132 [1] : vector<16x16xf32> to vector<16xf32>
    %255 = vector.shape_cast %254 : vector<16xf32> to vector<16x1xf32>
    %256 = vector.broadcast %255 : vector<16x1xf32> to vector<16x16xf32>
    %257 = arith.subf %253, %256 : vector<16x16xf32>
    %258 = math.exp %257 : vector<16x16xf32>
    %cst_133 = arith.constant dense<0.000000e+00> : vector<16xf32>
    %259 = vector.multi_reduction <add>, %258, %cst_133 [1] : vector<16x16xf32> to vector<16xf32>
    %260 = vector.shape_cast %259 : vector<16xf32> to vector<16x1xf32>
    %261 = tpu.reciprocal %260 {approx = true} : vector<16x1xf32> -> vector<16x1xf32>
    %262 = vector.broadcast %261 : vector<16x1xf32> to vector<16x16xf32>
    %263 = arith.mulf %258, %262 : vector<16x16xf32>
    %264 = vector.broadcast %5 : vector<1x32xf32> to vector<16x32xf32>
    %265 = arith.mulf %230, %264 : vector<16x32xf32>
    %cst_134 = arith.constant dense<0.000000e+00> : vector<16x32xf32>
    %266 = tpu.matmul %263, %265, %cst_134 {dimension_numbers = #tpu.dot_dimension_numbers<[1], [0], [0], [1], [0, 0, 1, 1], [], []>} : vector<16x16xf32>, vector<16x32xf32>, vector<16x32xf32> -> vector<16x32xf32>
    %267 = arith.addf %249, %266 : vector<16x32xf32>
    %268 = vector.broadcast %7 : vector<1x32xf32> to vector<16x32xf32>
    %269 = arith.mulf %216, %268 : vector<16x32xf32>
    %cst_135 = arith.constant dense<0.000000e+00> : vector<16x16xf32>
    %270 = tpu.matmul %269, %223, %cst_135 {dimension_numbers = #tpu.dot_dimension_numbers<[1], [1], [0], [0], [0, 0, 1, 0], [], []>} : vector<16x32xf32>, vector<16x32xf32>, vector<16x16xf32> -> vector<16x16xf32>
    %271 = arith.addf %270, %1 : vector<16x16xf32>
    %cst_136 = arith.constant dense<0xFF800000> : vector<16xf32>
    %272 = vector.multi_reduction <maximumf>, %271, %cst_136 [1] : vector<16x16xf32> to vector<16xf32>
    %273 = vector.shape_cast %272 : vector<16xf32> to vector<16x1xf32>
    %274 = vector.broadcast %273 : vector<16x1xf32> to vector<16x16xf32>
    %275 = arith.subf %271, %274 : vector<16x16xf32>
    %276 = math.exp %275 : vector<16x16xf32>
    %cst_137 = arith.constant dense<0.000000e+00> : vector<16xf32>
    %277 = vector.multi_reduction <add>, %276, %cst_137 [1] : vector<16x16xf32> to vector<16xf32>
    %278 = vector.shape_cast %277 : vector<16xf32> to vector<16x1xf32>
    %279 = tpu.reciprocal %278 {approx = true} : vector<16x1xf32> -> vector<16x1xf32>
    %280 = vector.broadcast %279 : vector<16x1xf32> to vector<16x16xf32>
    %281 = arith.mulf %276, %280 : vector<16x16xf32>
    %282 = vector.broadcast %7 : vector<1x32xf32> to vector<16x32xf32>
    %283 = arith.mulf %230, %282 : vector<16x32xf32>
    %cst_138 = arith.constant dense<0.000000e+00> : vector<16x32xf32>
    %284 = tpu.matmul %281, %283, %cst_138 {dimension_numbers = #tpu.dot_dimension_numbers<[1], [0], [0], [1], [0, 0, 1, 1], [], []>} : vector<16x16xf32>, vector<16x32xf32>, vector<16x32xf32> -> vector<16x32xf32>
    %285 = arith.addf %267, %284 : vector<16x32xf32>
    %286 = vector.broadcast %9 : vector<1x32xf32> to vector<16x32xf32>
    %287 = arith.mulf %216, %286 : vector<16x32xf32>
    %cst_139 = arith.constant dense<0.000000e+00> : vector<16x16xf32>
    %288 = tpu.matmul %287, %223, %cst_139 {dimension_numbers = #tpu.dot_dimension_numbers<[1], [1], [0], [0], [0, 0, 1, 0], [], []>} : vector<16x32xf32>, vector<16x32xf32>, vector<16x16xf32> -> vector<16x16xf32>
    %289 = arith.addf %288, %1 : vector<16x16xf32>
    %cst_140 = arith.constant dense<0xFF800000> : vector<16xf32>
    %290 = vector.multi_reduction <maximumf>, %289, %cst_140 [1] : vector<16x16xf32> to vector<16xf32>
    %291 = vector.shape_cast %290 : vector<16xf32> to vector<16x1xf32>
    %292 = vector.broadcast %291 : vector<16x1xf32> to vector<16x16xf32>
    %293 = arith.subf %289, %292 : vector<16x16xf32>
    %294 = math.exp %293 : vector<16x16xf32>
    %cst_141 = arith.constant dense<0.000000e+00> : vector<16xf32>
    %295 = vector.multi_reduction <add>, %294, %cst_141 [1] : vector<16x16xf32> to vector<16xf32>
    %296 = vector.shape_cast %295 : vector<16xf32> to vector<16x1xf32>
    %297 = tpu.reciprocal %296 {approx = true} : vector<16x1xf32> -> vector<16x1xf32>
    %298 = vector.broadcast %297 : vector<16x1xf32> to vector<16x16xf32>
    %299 = arith.mulf %294, %298 : vector<16x16xf32>
    %300 = vector.broadcast %9 : vector<1x32xf32> to vector<16x32xf32>
    %301 = arith.mulf %230, %300 : vector<16x32xf32>
    %cst_142 = arith.constant dense<0.000000e+00> : vector<16x32xf32>
    %302 = tpu.matmul %299, %301, %cst_142 {dimension_numbers = #tpu.dot_dimension_numbers<[1], [0], [0], [1], [0, 0, 1, 1], [], []>} : vector<16x16xf32>, vector<16x32xf32>, vector<16x32xf32> -> vector<16x32xf32>
    %303 = arith.addf %285, %302 : vector<16x32xf32>
    %c1_143 = arith.constant 1 : index
    %c0_144 = arith.constant 0 : index
    %c0_145 = arith.constant 0 : index
    %304 = vector.load %arg13[%c1_143, %c0_144, %c0_145] : memref<2x32x32xf32, #tpu.memory_space<vmem>>, vector<1x32x32xf32>
    %305 = vector.shape_cast %304 : vector<1x32x32xf32> to vector<32x32xf32>
    %cst_146 = arith.constant dense<0.000000e+00> : vector<16x32xf32>
    %306 = tpu.matmul %303, %305, %cst_146 {dimension_numbers = #tpu.dot_dimension_numbers<[1], [0], [0], [1], [0, 0, 1, 1], [], []>} : vector<16x32xf32>, vector<32x32xf32>, vector<16x32xf32> -> vector<16x32xf32>
    %c1_147 = arith.constant 1 : index
    %c0_148 = arith.constant 0 : index
    %c0_149 = arith.constant 0 : index
    %307 = vector.load %arg14[%c1_147, %c0_148, %c0_149] : memref<2x1x32xf32, #tpu.memory_space<vmem>>, vector<1x1x32xf32>
    %308 = vector.shape_cast %307 : vector<1x1x32xf32> to vector<1x32xf32>
    %309 = vector.broadcast %308 : vector<1x32xf32> to vector<16x32xf32>
    %310 = arith.addf %306, %309 : vector<16x32xf32>
    %311 = arith.addf %310, %183 : vector<16x32xf32>
    %c1_150 = arith.constant 1 : index
    %c0_151 = arith.constant 0 : index
    %c0_152 = arith.constant 0 : index
    %312 = vector.load %arg15[%c1_150, %c0_151, %c0_152] : memref<2x1x32xf32, #tpu.memory_space<vmem>>, vector<1x1x32xf32>
    %313 = vector.shape_cast %312 : vector<1x1x32xf32> to vector<1x32xf32>
    %c1_153 = arith.constant 1 : index
    %c0_154 = arith.constant 0 : index
    %c0_155 = arith.constant 0 : index
    %314 = vector.load %arg16[%c1_153, %c0_154, %c0_155] : memref<2x1x32xf32, #tpu.memory_space<vmem>>, vector<1x1x32xf32>
    %315 = vector.shape_cast %314 : vector<1x1x32xf32> to vector<1x32xf32>
    %cst_156 = arith.constant dense<0.000000e+00> : vector<16xf32>
    %316 = vector.multi_reduction <add>, %311, %cst_156 [1] : vector<16x32xf32> to vector<16xf32>
    %317 = vector.shape_cast %316 : vector<16xf32> to vector<16x1xf32>
    %cst_157 = arith.constant 3.200000e+01 : f32
    %318 = vector.broadcast %cst_157 : f32 to vector<16x1xf32>
    %319 = arith.divf %317, %318 : vector<16x1xf32>
    %320 = vector.broadcast %319 : vector<16x1xf32> to vector<16x32xf32>
    %321 = arith.subf %311, %320 : vector<16x32xf32>
    %322 = arith.mulf %321, %321 : vector<16x32xf32>
    %cst_158 = arith.constant dense<0.000000e+00> : vector<16xf32>
    %323 = vector.multi_reduction <add>, %322, %cst_158 [1] : vector<16x32xf32> to vector<16xf32>
    %324 = vector.shape_cast %323 : vector<16xf32> to vector<16x1xf32>
    %cst_159 = arith.constant 3.200000e+01 : f32
    %325 = vector.broadcast %cst_159 : f32 to vector<16x1xf32>
    %326 = arith.divf %324, %325 : vector<16x1xf32>
    %327 = vector.broadcast %319 : vector<16x1xf32> to vector<16x32xf32>
    %328 = arith.subf %311, %327 : vector<16x32xf32>
    %cst_160 = arith.constant 9.99999974E-6 : f32
    %329 = vector.broadcast %cst_160 : f32 to vector<16x1xf32>
    %330 = arith.addf %326, %329 : vector<16x1xf32>
    %331 = math.rsqrt %330 : vector<16x1xf32>
    %332 = vector.broadcast %331 : vector<16x1xf32> to vector<16x32xf32>
    %333 = arith.mulf %328, %332 : vector<16x32xf32>
    %334 = vector.broadcast %313 : vector<1x32xf32> to vector<16x32xf32>
    %335 = arith.mulf %333, %334 : vector<16x32xf32>
    %336 = vector.broadcast %315 : vector<1x32xf32> to vector<16x32xf32>
    %337 = arith.addf %335, %336 : vector<16x32xf32>
    %c1_161 = arith.constant 1 : index
    %c0_162 = arith.constant 0 : index
    %c0_163 = arith.constant 0 : index
    %338 = vector.load %arg17[%c1_161, %c0_162, %c0_163] : memref<2x32x128xf32, #tpu.memory_space<vmem>>, vector<1x32x128xf32>
    %339 = vector.shape_cast %338 : vector<1x32x128xf32> to vector<32x128xf32>
    %cst_164 = arith.constant dense<0.000000e+00> : vector<16x128xf32>
    %340 = tpu.matmul %337, %339, %cst_164 {dimension_numbers = #tpu.dot_dimension_numbers<[1], [0], [0], [1], [0, 0, 1, 1], [], []>} : vector<16x32xf32>, vector<32x128xf32>, vector<16x128xf32> -> vector<16x128xf32>
    %c1_165 = arith.constant 1 : index
    %c0_166 = arith.constant 0 : index
    %c0_167 = arith.constant 0 : index
    %341 = vector.load %arg18[%c1_165, %c0_166, %c0_167] : memref<2x1x128xf32, #tpu.memory_space<vmem>>, vector<1x1x128xf32>
    %342 = vector.shape_cast %341 : vector<1x1x128xf32> to vector<1x128xf32>
    %343 = vector.broadcast %342 : vector<1x128xf32> to vector<16x128xf32>
    %344 = arith.addf %340, %343 : vector<16x128xf32>
    %cst_168 = arith.constant 0.000000e+00 : f32
    %345 = vector.broadcast %cst_168 : f32 to vector<16x128xf32>
    %346 = arith.cmpf oge, %344, %345 : vector<16x128xf32>
    %cst_169 = arith.constant 0.00999999977 : f32
    %347 = vector.broadcast %cst_169 : f32 to vector<16x128xf32>
    %348 = arith.mulf %347, %344 : vector<16x128xf32>
    %349 = arith.select %346, %344, %348 : vector<16x128xi1>, vector<16x128xf32>
    %c1_170 = arith.constant 1 : index
    %c0_171 = arith.constant 0 : index
    %c0_172 = arith.constant 0 : index
    %350 = vector.load %arg19[%c1_170, %c0_171, %c0_172] : memref<2x128x32xf32, #tpu.memory_space<vmem>>, vector<1x128x32xf32>
    %351 = vector.shape_cast %350 : vector<1x128x32xf32> to vector<128x32xf32>
    %cst_173 = arith.constant dense<0.000000e+00> : vector<16x32xf32>
    %352 = tpu.matmul %349, %351, %cst_173 {dimension_numbers = #tpu.dot_dimension_numbers<[1], [0], [0], [1], [0, 0, 1, 1], [], []>} : vector<16x128xf32>, vector<128x32xf32>, vector<16x32xf32> -> vector<16x32xf32>
    %c1_174 = arith.constant 1 : index
    %c0_175 = arith.constant 0 : index
    %c0_176 = arith.constant 0 : index
    %353 = vector.load %arg20[%c1_174, %c0_175, %c0_176] : memref<2x1x32xf32, #tpu.memory_space<vmem>>, vector<1x1x32xf32>
    %354 = vector.shape_cast %353 : vector<1x1x32xf32> to vector<1x32xf32>
    %355 = vector.broadcast %354 : vector<1x32xf32> to vector<16x32xf32>
    %356 = arith.addf %352, %355 : vector<16x32xf32>
    %357 = arith.addf %356, %337 : vector<16x32xf32>
    %c0_177 = arith.constant 0 : index
    %c0_178 = arith.constant 0 : index
    %c0_179 = arith.constant 0 : index
    %358 = vector.load %arg21[%c0_177, %c0_178, %c0_179] : memref<2x32x32xf32, #tpu.memory_space<vmem>>, vector<1x32x32xf32>
    %359 = vector.shape_cast %358 : vector<1x32x32xf32> to vector<32x32xf32>
    %cst_180 = arith.constant dense<0.000000e+00> : vector<16x32xf32>
    %360 = tpu.matmul %357, %359, %cst_180 {dimension_numbers = #tpu.dot_dimension_numbers<[1], [0], [0], [1], [0, 0, 1, 1], [], []>} : vector<16x32xf32>, vector<32x32xf32>, vector<16x32xf32> -> vector<16x32xf32>
    %cst_181 = arith.constant 0.000000e+00 : f32
    %361 = vector.broadcast %cst_181 : f32 to vector<16x32xf32>
    %362 = arith.cmpf oge, %360, %361 : vector<16x32xf32>
    %cst_182 = arith.constant 0.00999999977 : f32
    %363 = vector.broadcast %cst_182 : f32 to vector<16x32xf32>
    %364 = arith.mulf %363, %360 : vector<16x32xf32>
    %365 = arith.select %362, %360, %364 : vector<16x32xi1>, vector<16x32xf32>
    %c1_183 = arith.constant 1 : index
    %c0_184 = arith.constant 0 : index
    %c0_185 = arith.constant 0 : index
    %366 = vector.load %arg21[%c1_183, %c0_184, %c0_185] : memref<2x32x32xf32, #tpu.memory_space<vmem>>, vector<1x32x32xf32>
    %367 = vector.shape_cast %366 : vector<1x32x32xf32> to vector<32x32xf32>
    %cst_186 = arith.constant dense<0.000000e+00> : vector<16x32xf32>
    %368 = tpu.matmul %365, %367, %cst_186 {dimension_numbers = #tpu.dot_dimension_numbers<[1], [0], [0], [1], [0, 0, 1, 1], [], []>} : vector<16x32xf32>, vector<32x32xf32>, vector<16x32xf32> -> vector<16x32xf32>
    %cst_187 = arith.constant 0.000000e+00 : f32
    %369 = vector.broadcast %cst_187 : f32 to vector<16x32xf32>
    %370 = arith.cmpf oge, %368, %369 : vector<16x32xf32>
    %cst_188 = arith.constant 0.00999999977 : f32
    %371 = vector.broadcast %cst_188 : f32 to vector<16x32xf32>
    %372 = arith.mulf %371, %368 : vector<16x32xf32>
    %373 = arith.select %370, %368, %372 : vector<16x32xi1>, vector<16x32xf32>
    %c0_189 = arith.constant 0 : index
    %c0_190 = arith.constant 0 : index
    %374 = vector.load %arg4[%c0_189, %c0_190] : memref<16x16xf32, #tpu.memory_space<vmem>>, vector<16x16xf32>
    %cst_191 = arith.constant dense<0.000000e+00> : vector<16x32xf32>
    %375 = tpu.matmul %374, %373, %cst_191 {dimension_numbers = #tpu.dot_dimension_numbers<[1], [0], [0], [1], [0, 0, 1, 1], [], []>} : vector<16x16xf32>, vector<16x32xf32>, vector<16x32xf32> -> vector<16x32xf32>
    %c0_192 = arith.constant 0 : index
    %c0_193 = arith.constant 0 : index
    %c0_194 = arith.constant 0 : index
    %376 = vector.load %arg22[%c0_192, %c0_193, %c0_194] : memref<2x32x128xf32, #tpu.memory_space<vmem>>, vector<1x32x128xf32>
    %377 = vector.shape_cast %376 : vector<1x32x128xf32> to vector<32x128xf32>
    %cst_195 = arith.constant dense<0.000000e+00> : vector<16x128xf32>
    %378 = tpu.matmul %375, %377, %cst_195 {dimension_numbers = #tpu.dot_dimension_numbers<[1], [0], [0], [1], [0, 0, 1, 1], [], []>} : vector<16x32xf32>, vector<32x128xf32>, vector<16x128xf32> -> vector<16x128xf32>
    %c0_196 = arith.constant 0 : index
    %c0_197 = arith.constant 0 : index
    %c0_198 = arith.constant 0 : index
    %379 = vector.load %arg24[%c0_196, %c0_197, %c0_198] : memref<2x1x128xf32, #tpu.memory_space<vmem>>, vector<1x1x128xf32>
    %380 = vector.shape_cast %379 : vector<1x1x128xf32> to vector<1x128xf32>
    %381 = vector.broadcast %380 : vector<1x128xf32> to vector<16x128xf32>
    %382 = arith.addf %378, %381 : vector<16x128xf32>
    %cst_199 = arith.constant 0.000000e+00 : f32
    %383 = vector.broadcast %cst_199 : f32 to vector<2x32xf32>
    %cst_200 = arith.constant 0.000000e+00 : f32
    %384 = vector.broadcast %cst_200 : f32 to vector<2x32xf32>
    %cst_201 = arith.constant 0.000000e+00 : f32
    %385 = vector.broadcast %cst_201 : f32 to vector<2x32xf32>
    %cst_202 = arith.constant 0.000000e+00 : f32
    %386 = vector.broadcast %cst_202 : f32 to vector<2x32xf32>
    %387 = vector.extract_strided_slice %382 {offsets = [0, 0], sizes = [2, 128], strides = [1, 1]} : vector<16x128xf32> to vector<2x128xf32>
    %c0_203 = arith.constant 0 : index
    %c0_204 = arith.constant 0 : index
    %c0_205 = arith.constant 0 : index
    %388 = vector.load %arg23[%c0_203, %c0_204, %c0_205] : memref<2x32x128xf32, #tpu.memory_space<vmem>>, vector<1x32x128xf32>
    %389 = vector.shape_cast %388 : vector<1x32x128xf32> to vector<32x128xf32>
    %cst_206 = arith.constant dense<0.000000e+00> : vector<2x128xf32>
    %390 = tpu.matmul %383, %389, %cst_206 {dimension_numbers = #tpu.dot_dimension_numbers<[1], [0], [0], [1], [0, 0, 1, 1], [], []>} : vector<2x32xf32>, vector<32x128xf32>, vector<2x128xf32> -> vector<2x128xf32>
    %391 = arith.addf %387, %390 : vector<2x128xf32>
    %392 = arith.negf %391 : vector<2x128xf32>
    %393 = math.exp %392 : vector<2x128xf32>
    %cst_207 = arith.constant 1.000000e+00 : f32
    %394 = vector.broadcast %cst_207 : f32 to vector<2x128xf32>
    %395 = arith.addf %394, %393 : vector<2x128xf32>
    %396 = arith.divf %394, %395 : vector<2x128xf32>
    %397 = vector.extract_strided_slice %396 {offsets = [0, 0], sizes = [2, 32], strides = [1, 1]} : vector<2x128xf32> to vector<2x32xf32>
    %398 = vector.extract_strided_slice %396 {offsets = [0, 32], sizes = [2, 32], strides = [1, 1]} : vector<2x128xf32> to vector<2x32xf32>
    %399 = vector.extract_strided_slice %396 {offsets = [0, 96], sizes = [2, 32], strides = [1, 1]} : vector<2x128xf32> to vector<2x32xf32>
    %400 = vector.extract_strided_slice %391 {offsets = [0, 64], sizes = [2, 32], strides = [1, 1]} : vector<2x128xf32> to vector<2x32xf32>
    %401 = math.tanh %400 : vector<2x32xf32>
    %402 = arith.mulf %398, %385 : vector<2x32xf32>
    %403 = arith.mulf %397, %401 : vector<2x32xf32>
    %404 = arith.addf %402, %403 : vector<2x32xf32>
    %405 = math.tanh %404 : vector<2x32xf32>
    %406 = arith.mulf %399, %405 : vector<2x32xf32>
    %c1_208 = arith.constant 1 : index
    %c0_209 = arith.constant 0 : index
    %c0_210 = arith.constant 0 : index
    %407 = vector.load %arg22[%c1_208, %c0_209, %c0_210] : memref<2x32x128xf32, #tpu.memory_space<vmem>>, vector<1x32x128xf32>
    %408 = vector.shape_cast %407 : vector<1x32x128xf32> to vector<32x128xf32>
    %cst_211 = arith.constant dense<0.000000e+00> : vector<2x128xf32>
    %409 = tpu.matmul %406, %408, %cst_211 {dimension_numbers = #tpu.dot_dimension_numbers<[1], [0], [0], [1], [0, 0, 1, 1], [], []>} : vector<2x32xf32>, vector<32x128xf32>, vector<2x128xf32> -> vector<2x128xf32>
    %c1_212 = arith.constant 1 : index
    %c0_213 = arith.constant 0 : index
    %c0_214 = arith.constant 0 : index
    %410 = vector.load %arg24[%c1_212, %c0_213, %c0_214] : memref<2x1x128xf32, #tpu.memory_space<vmem>>, vector<1x1x128xf32>
    %411 = vector.shape_cast %410 : vector<1x1x128xf32> to vector<1x128xf32>
    %412 = vector.broadcast %411 : vector<1x128xf32> to vector<2x128xf32>
    %413 = arith.addf %409, %412 : vector<2x128xf32>
    %c1_215 = arith.constant 1 : index
    %c0_216 = arith.constant 0 : index
    %c0_217 = arith.constant 0 : index
    %414 = vector.load %arg23[%c1_215, %c0_216, %c0_217] : memref<2x32x128xf32, #tpu.memory_space<vmem>>, vector<1x32x128xf32>
    %415 = vector.shape_cast %414 : vector<1x32x128xf32> to vector<32x128xf32>
    %cst_218 = arith.constant dense<0.000000e+00> : vector<2x128xf32>
    %416 = tpu.matmul %384, %415, %cst_218 {dimension_numbers = #tpu.dot_dimension_numbers<[1], [0], [0], [1], [0, 0, 1, 1], [], []>} : vector<2x32xf32>, vector<32x128xf32>, vector<2x128xf32> -> vector<2x128xf32>
    %417 = arith.addf %413, %416 : vector<2x128xf32>
    %418 = arith.negf %417 : vector<2x128xf32>
    %419 = math.exp %418 : vector<2x128xf32>
    %cst_219 = arith.constant 1.000000e+00 : f32
    %420 = vector.broadcast %cst_219 : f32 to vector<2x128xf32>
    %421 = arith.addf %420, %419 : vector<2x128xf32>
    %422 = arith.divf %420, %421 : vector<2x128xf32>
    %423 = vector.extract_strided_slice %422 {offsets = [0, 0], sizes = [2, 32], strides = [1, 1]} : vector<2x128xf32> to vector<2x32xf32>
    %424 = vector.extract_strided_slice %422 {offsets = [0, 32], sizes = [2, 32], strides = [1, 1]} : vector<2x128xf32> to vector<2x32xf32>
    %425 = vector.extract_strided_slice %422 {offsets = [0, 96], sizes = [2, 32], strides = [1, 1]} : vector<2x128xf32> to vector<2x32xf32>
    %426 = vector.extract_strided_slice %417 {offsets = [0, 64], sizes = [2, 32], strides = [1, 1]} : vector<2x128xf32> to vector<2x32xf32>
    %427 = math.tanh %426 : vector<2x32xf32>
    %428 = arith.mulf %424, %386 : vector<2x32xf32>
    %429 = arith.mulf %423, %427 : vector<2x32xf32>
    %430 = arith.addf %428, %429 : vector<2x32xf32>
    %431 = math.tanh %430 : vector<2x32xf32>
    %432 = arith.mulf %425, %431 : vector<2x32xf32>
    %c0_220 = arith.constant 0 : index
    %c0_221 = arith.constant 0 : index
    %433 = vector.load %arg27[%c0_220, %c0_221] : memref<16x32xf32, #tpu.memory_space<vmem>>, vector<2x32xf32>
    tpu.vector_store %arg27[%c0_220, %c0_221], %432 {strides = array<i32>} : memref<16x32xf32, #tpu.memory_space<vmem>>, vector<2x32xf32>,
    %434 = vector.extract_strided_slice %382 {offsets = [2, 0], sizes = [2, 128], strides = [1, 1]} : vector<16x128xf32> to vector<2x128xf32>
    %c0_222 = arith.constant 0 : index
    %c0_223 = arith.constant 0 : index
    %c0_224 = arith.constant 0 : index
    %435 = vector.load %arg23[%c0_222, %c0_223, %c0_224] : memref<2x32x128xf32, #tpu.memory_space<vmem>>, vector<1x32x128xf32>
    %436 = vector.shape_cast %435 : vector<1x32x128xf32> to vector<32x128xf32>
    %cst_225 = arith.constant dense<0.000000e+00> : vector<2x128xf32>
    %437 = tpu.matmul %406, %436, %cst_225 {dimension_numbers = #tpu.dot_dimension_numbers<[1], [0], [0], [1], [0, 0, 1, 1], [], []>} : vector<2x32xf32>, vector<32x128xf32>, vector<2x128xf32> -> vector<2x128xf32>
    %438 = arith.addf %434, %437 : vector<2x128xf32>
    %439 = arith.negf %438 : vector<2x128xf32>
    %440 = math.exp %439 : vector<2x128xf32>
    %cst_226 = arith.constant 1.000000e+00 : f32
    %441 = vector.broadcast %cst_226 : f32 to vector<2x128xf32>
    %442 = arith.addf %441, %440 : vector<2x128xf32>
    %443 = arith.divf %441, %442 : vector<2x128xf32>
    %444 = vector.extract_strided_slice %443 {offsets = [0, 0], sizes = [2, 32], strides = [1, 1]} : vector<2x128xf32> to vector<2x32xf32>
    %445 = vector.extract_strided_slice %443 {offsets = [0, 32], sizes = [2, 32], strides = [1, 1]} : vector<2x128xf32> to vector<2x32xf32>
    %446 = vector.extract_strided_slice %443 {offsets = [0, 96], sizes = [2, 32], strides = [1, 1]} : vector<2x128xf32> to vector<2x32xf32>
    %447 = vector.extract_strided_slice %438 {offsets = [0, 64], sizes = [2, 32], strides = [1, 1]} : vector<2x128xf32> to vector<2x32xf32>
    %448 = math.tanh %447 : vector<2x32xf32>
    %449 = arith.mulf %445, %404 : vector<2x32xf32>
    %450 = arith.mulf %444, %448 : vector<2x32xf32>
    %451 = arith.addf %449, %450 : vector<2x32xf32>
    %452 = math.tanh %451 : vector<2x32xf32>
    %453 = arith.mulf %446, %452 : vector<2x32xf32>
    %c1_227 = arith.constant 1 : index
    %c0_228 = arith.constant 0 : index
    %c0_229 = arith.constant 0 : index
    %454 = vector.load %arg22[%c1_227, %c0_228, %c0_229] : memref<2x32x128xf32, #tpu.memory_space<vmem>>, vector<1x32x128xf32>
    %455 = vector.shape_cast %454 : vector<1x32x128xf32> to vector<32x128xf32>
    %cst_230 = arith.constant dense<0.000000e+00> : vector<2x128xf32>
    %456 = tpu.matmul %453, %455, %cst_230 {dimension_numbers = #tpu.dot_dimension_numbers<[1], [0], [0], [1], [0, 0, 1, 1], [], []>} : vector<2x32xf32>, vector<32x128xf32>, vector<2x128xf32> -> vector<2x128xf32>
    %c1_231 = arith.constant 1 : index
    %c0_232 = arith.constant 0 : index
    %c0_233 = arith.constant 0 : index
    %457 = vector.load %arg24[%c1_231, %c0_232, %c0_233] : memref<2x1x128xf32, #tpu.memory_space<vmem>>, vector<1x1x128xf32>
    %458 = vector.shape_cast %457 : vector<1x1x128xf32> to vector<1x128xf32>
    %459 = vector.broadcast %458 : vector<1x128xf32> to vector<2x128xf32>
    %460 = arith.addf %456, %459 : vector<2x128xf32>
    %c1_234 = arith.constant 1 : index
    %c0_235 = arith.constant 0 : index
    %c0_236 = arith.constant 0 : index
    %461 = vector.load %arg23[%c1_234, %c0_235, %c0_236] : memref<2x32x128xf32, #tpu.memory_space<vmem>>, vector<1x32x128xf32>
    %462 = vector.shape_cast %461 : vector<1x32x128xf32> to vector<32x128xf32>
    %cst_237 = arith.constant dense<0.000000e+00> : vector<2x128xf32>
    %463 = tpu.matmul %432, %462, %cst_237 {dimension_numbers = #tpu.dot_dimension_numbers<[1], [0], [0], [1], [0, 0, 1, 1], [], []>} : vector<2x32xf32>, vector<32x128xf32>, vector<2x128xf32> -> vector<2x128xf32>
    %464 = arith.addf %460, %463 : vector<2x128xf32>
    %465 = arith.negf %464 : vector<2x128xf32>
    %466 = math.exp %465 : vector<2x128xf32>
    %cst_238 = arith.constant 1.000000e+00 : f32
    %467 = vector.broadcast %cst_238 : f32 to vector<2x128xf32>
    %468 = arith.addf %467, %466 : vector<2x128xf32>
    %469 = arith.divf %467, %468 : vector<2x128xf32>
    %470 = vector.extract_strided_slice %469 {offsets = [0, 0], sizes = [2, 32], strides = [1, 1]} : vector<2x128xf32> to vector<2x32xf32>
    %471 = vector.extract_strided_slice %469 {offsets = [0, 32], sizes = [2, 32], strides = [1, 1]} : vector<2x128xf32> to vector<2x32xf32>
    %472 = vector.extract_strided_slice %469 {offsets = [0, 96], sizes = [2, 32], strides = [1, 1]} : vector<2x128xf32> to vector<2x32xf32>
    %473 = vector.extract_strided_slice %464 {offsets = [0, 64], sizes = [2, 32], strides = [1, 1]} : vector<2x128xf32> to vector<2x32xf32>
    %474 = math.tanh %473 : vector<2x32xf32>
    %475 = arith.mulf %471, %430 : vector<2x32xf32>
    %476 = arith.mulf %470, %474 : vector<2x32xf32>
    %477 = arith.addf %475, %476 : vector<2x32xf32>
    %478 = math.tanh %477 : vector<2x32xf32>
    %479 = arith.mulf %472, %478 : vector<2x32xf32>
    %c2_239 = arith.constant 2 : index
    %c0_240 = arith.constant 0 : index
    %480 = vector.load %arg27[%c2_239, %c0_240] : memref<16x32xf32, #tpu.memory_space<vmem>>, vector<2x32xf32>
    tpu.vector_store %arg27[%c2_239, %c0_240], %479 {strides = array<i32>} : memref<16x32xf32, #tpu.memory_space<vmem>>, vector<2x32xf32>,
    %481 = vector.extract_strided_slice %382 {offsets = [4, 0], sizes = [2, 128], strides = [1, 1]} : vector<16x128xf32> to vector<2x128xf32>
    %c0_241 = arith.constant 0 : index
    %c0_242 = arith.constant 0 : index
    %c0_243 = arith.constant 0 : index
    %482 = vector.load %arg23[%c0_241, %c0_242, %c0_243] : memref<2x32x128xf32, #tpu.memory_space<vmem>>, vector<1x32x128xf32>
    %483 = vector.shape_cast %482 : vector<1x32x128xf32> to vector<32x128xf32>
    %cst_244 = arith.constant dense<0.000000e+00> : vector<2x128xf32>
    %484 = tpu.matmul %453, %483, %cst_244 {dimension_numbers = #tpu.dot_dimension_numbers<[1], [0], [0], [1], [0, 0, 1, 1], [], []>} : vector<2x32xf32>, vector<32x128xf32>, vector<2x128xf32> -> vector<2x128xf32>
    %485 = arith.addf %481, %484 : vector<2x128xf32>
    %486 = arith.negf %485 : vector<2x128xf32>
    %487 = math.exp %486 : vector<2x128xf32>
    %cst_245 = arith.constant 1.000000e+00 : f32
    %488 = vector.broadcast %cst_245 : f32 to vector<2x128xf32>
    %489 = arith.addf %488, %487 : vector<2x128xf32>
    %490 = arith.divf %488, %489 : vector<2x128xf32>
    %491 = vector.extract_strided_slice %490 {offsets = [0, 0], sizes = [2, 32], strides = [1, 1]} : vector<2x128xf32> to vector<2x32xf32>
    %492 = vector.extract_strided_slice %490 {offsets = [0, 32], sizes = [2, 32], strides = [1, 1]} : vector<2x128xf32> to vector<2x32xf32>
    %493 = vector.extract_strided_slice %490 {offsets = [0, 96], sizes = [2, 32], strides = [1, 1]} : vector<2x128xf32> to vector<2x32xf32>
    %494 = vector.extract_strided_slice %485 {offsets = [0, 64], sizes = [2, 32], strides = [1, 1]} : vector<2x128xf32> to vector<2x32xf32>
    %495 = math.tanh %494 : vector<2x32xf32>
    %496 = arith.mulf %492, %451 : vector<2x32xf32>
    %497 = arith.mulf %491, %495 : vector<2x32xf32>
    %498 = arith.addf %496, %497 : vector<2x32xf32>
    %499 = math.tanh %498 : vector<2x32xf32>
    %500 = arith.mulf %493, %499 : vector<2x32xf32>
    %c1_246 = arith.constant 1 : index
    %c0_247 = arith.constant 0 : index
    %c0_248 = arith.constant 0 : index
    %501 = vector.load %arg22[%c1_246, %c0_247, %c0_248] : memref<2x32x128xf32, #tpu.memory_space<vmem>>, vector<1x32x128xf32>
    %502 = vector.shape_cast %501 : vector<1x32x128xf32> to vector<32x128xf32>
    %cst_249 = arith.constant dense<0.000000e+00> : vector<2x128xf32>
    %503 = tpu.matmul %500, %502, %cst_249 {dimension_numbers = #tpu.dot_dimension_numbers<[1], [0], [0], [1], [0, 0, 1, 1], [], []>} : vector<2x32xf32>, vector<32x128xf32>, vector<2x128xf32> -> vector<2x128xf32>
    %c1_250 = arith.constant 1 : index
    %c0_251 = arith.constant 0 : index
    %c0_252 = arith.constant 0 : index
    %504 = vector.load %arg24[%c1_250, %c0_251, %c0_252] : memref<2x1x128xf32, #tpu.memory_space<vmem>>, vector<1x1x128xf32>
    %505 = vector.shape_cast %504 : vector<1x1x128xf32> to vector<1x128xf32>
    %506 = vector.broadcast %505 : vector<1x128xf32> to vector<2x128xf32>
    %507 = arith.addf %503, %506 : vector<2x128xf32>
    %c1_253 = arith.constant 1 : index
    %c0_254 = arith.constant 0 : index
    %c0_255 = arith.constant 0 : index
    %508 = vector.load %arg23[%c1_253, %c0_254, %c0_255] : memref<2x32x128xf32, #tpu.memory_space<vmem>>, vector<1x32x128xf32>
    %509 = vector.shape_cast %508 : vector<1x32x128xf32> to vector<32x128xf32>
    %cst_256 = arith.constant dense<0.000000e+00> : vector<2x128xf32>
    %510 = tpu.matmul %479, %509, %cst_256 {dimension_numbers = #tpu.dot_dimension_numbers<[1], [0], [0], [1], [0, 0, 1, 1], [], []>} : vector<2x32xf32>, vector<32x128xf32>, vector<2x128xf32> -> vector<2x128xf32>
    %511 = arith.addf %507, %510 : vector<2x128xf32>
    %512 = arith.negf %511 : vector<2x128xf32>
    %513 = math.exp %512 : vector<2x128xf32>
    %cst_257 = arith.constant 1.000000e+00 : f32
    %514 = vector.broadcast %cst_257 : f32 to vector<2x128xf32>
    %515 = arith.addf %514, %513 : vector<2x128xf32>
    %516 = arith.divf %514, %515 : vector<2x128xf32>
    %517 = vector.extract_strided_slice %516 {offsets = [0, 0], sizes = [2, 32], strides = [1, 1]} : vector<2x128xf32> to vector<2x32xf32>
    %518 = vector.extract_strided_slice %516 {offsets = [0, 32], sizes = [2, 32], strides = [1, 1]} : vector<2x128xf32> to vector<2x32xf32>
    %519 = vector.extract_strided_slice %516 {offsets = [0, 96], sizes = [2, 32], strides = [1, 1]} : vector<2x128xf32> to vector<2x32xf32>
    %520 = vector.extract_strided_slice %511 {offsets = [0, 64], sizes = [2, 32], strides = [1, 1]} : vector<2x128xf32> to vector<2x32xf32>
    %521 = math.tanh %520 : vector<2x32xf32>
    %522 = arith.mulf %518, %477 : vector<2x32xf32>
    %523 = arith.mulf %517, %521 : vector<2x32xf32>
    %524 = arith.addf %522, %523 : vector<2x32xf32>
    %525 = math.tanh %524 : vector<2x32xf32>
    %526 = arith.mulf %519, %525 : vector<2x32xf32>
    %c4 = arith.constant 4 : index
    %c0_258 = arith.constant 0 : index
    %527 = vector.load %arg27[%c4, %c0_258] : memref<16x32xf32, #tpu.memory_space<vmem>>, vector<2x32xf32>
    tpu.vector_store %arg27[%c4, %c0_258], %526 {strides = array<i32>} : memref<16x32xf32, #tpu.memory_space<vmem>>, vector<2x32xf32>,
    %528 = vector.extract_strided_slice %382 {offsets = [6, 0], sizes = [2, 128], strides = [1, 1]} : vector<16x128xf32> to vector<2x128xf32>
    %c0_259 = arith.constant 0 : index
    %c0_260 = arith.constant 0 : index
    %c0_261 = arith.constant 0 : index
    %529 = vector.load %arg23[%c0_259, %c0_260, %c0_261] : memref<2x32x128xf32, #tpu.memory_space<vmem>>, vector<1x32x128xf32>
    %530 = vector.shape_cast %529 : vector<1x32x128xf32> to vector<32x128xf32>
    %cst_262 = arith.constant dense<0.000000e+00> : vector<2x128xf32>
    %531 = tpu.matmul %500, %530, %cst_262 {dimension_numbers = #tpu.dot_dimension_numbers<[1], [0], [0], [1], [0, 0, 1, 1], [], []>} : vector<2x32xf32>, vector<32x128xf32>, vector<2x128xf32> -> vector<2x128xf32>
    %532 = arith.addf %528, %531 : vector<2x128xf32>
    %533 = arith.negf %532 : vector<2x128xf32>
    %534 = math.exp %533 : vector<2x128xf32>
    %cst_263 = arith.constant 1.000000e+00 : f32
    %535 = vector.broadcast %cst_263 : f32 to vector<2x128xf32>
    %536 = arith.addf %535, %534 : vector<2x128xf32>
    %537 = arith.divf %535, %536 : vector<2x128xf32>
    %538 = vector.extract_strided_slice %537 {offsets = [0, 0], sizes = [2, 32], strides = [1, 1]} : vector<2x128xf32> to vector<2x32xf32>
    %539 = vector.extract_strided_slice %537 {offsets = [0, 32], sizes = [2, 32], strides = [1, 1]} : vector<2x128xf32> to vector<2x32xf32>
    %540 = vector.extract_strided_slice %537 {offsets = [0, 96], sizes = [2, 32], strides = [1, 1]} : vector<2x128xf32> to vector<2x32xf32>
    %541 = vector.extract_strided_slice %532 {offsets = [0, 64], sizes = [2, 32], strides = [1, 1]} : vector<2x128xf32> to vector<2x32xf32>
    %542 = math.tanh %541 : vector<2x32xf32>
    %543 = arith.mulf %539, %498 : vector<2x32xf32>
    %544 = arith.mulf %538, %542 : vector<2x32xf32>
    %545 = arith.addf %543, %544 : vector<2x32xf32>
    %546 = math.tanh %545 : vector<2x32xf32>
    %547 = arith.mulf %540, %546 : vector<2x32xf32>
    %c1_264 = arith.constant 1 : index
    %c0_265 = arith.constant 0 : index
    %c0_266 = arith.constant 0 : index
    %548 = vector.load %arg22[%c1_264, %c0_265, %c0_266] : memref<2x32x128xf32, #tpu.memory_space<vmem>>, vector<1x32x128xf32>
    %549 = vector.shape_cast %548 : vector<1x32x128xf32> to vector<32x128xf32>
    %cst_267 = arith.constant dense<0.000000e+00> : vector<2x128xf32>
    %550 = tpu.matmul %547, %549, %cst_267 {dimension_numbers = #tpu.dot_dimension_numbers<[1], [0], [0], [1], [0, 0, 1, 1], [], []>} : vector<2x32xf32>, vector<32x128xf32>, vector<2x128xf32> -> vector<2x128xf32>
    %c1_268 = arith.constant 1 : index
    %c0_269 = arith.constant 0 : index
    %c0_270 = arith.constant 0 : index
    %551 = vector.load %arg24[%c1_268, %c0_269, %c0_270] : memref<2x1x128xf32, #tpu.memory_space<vmem>>, vector<1x1x128xf32>
    %552 = vector.shape_cast %551 : vector<1x1x128xf32> to vector<1x128xf32>
    %553 = vector.broadcast %552 : vector<1x128xf32> to vector<2x128xf32>
    %554 = arith.addf %550, %553 : vector<2x128xf32>
    %c1_271 = arith.constant 1 : index
    %c0_272 = arith.constant 0 : index
    %c0_273 = arith.constant 0 : index
    %555 = vector.load %arg23[%c1_271, %c0_272, %c0_273] : memref<2x32x128xf32, #tpu.memory_space<vmem>>, vector<1x32x128xf32>
    %556 = vector.shape_cast %555 : vector<1x32x128xf32> to vector<32x128xf32>
    %cst_274 = arith.constant dense<0.000000e+00> : vector<2x128xf32>
    %557 = tpu.matmul %526, %556, %cst_274 {dimension_numbers = #tpu.dot_dimension_numbers<[1], [0], [0], [1], [0, 0, 1, 1], [], []>} : vector<2x32xf32>, vector<32x128xf32>, vector<2x128xf32> -> vector<2x128xf32>
    %558 = arith.addf %554, %557 : vector<2x128xf32>
    %559 = arith.negf %558 : vector<2x128xf32>
    %560 = math.exp %559 : vector<2x128xf32>
    %cst_275 = arith.constant 1.000000e+00 : f32
    %561 = vector.broadcast %cst_275 : f32 to vector<2x128xf32>
    %562 = arith.addf %561, %560 : vector<2x128xf32>
    %563 = arith.divf %561, %562 : vector<2x128xf32>
    %564 = vector.extract_strided_slice %563 {offsets = [0, 0], sizes = [2, 32], strides = [1, 1]} : vector<2x128xf32> to vector<2x32xf32>
    %565 = vector.extract_strided_slice %563 {offsets = [0, 32], sizes = [2, 32], strides = [1, 1]} : vector<2x128xf32> to vector<2x32xf32>
    %566 = vector.extract_strided_slice %563 {offsets = [0, 96], sizes = [2, 32], strides = [1, 1]} : vector<2x128xf32> to vector<2x32xf32>
    %567 = vector.extract_strided_slice %558 {offsets = [0, 64], sizes = [2, 32], strides = [1, 1]} : vector<2x128xf32> to vector<2x32xf32>
    %568 = math.tanh %567 : vector<2x32xf32>
    %569 = arith.mulf %565, %524 : vector<2x32xf32>
    %570 = arith.mulf %564, %568 : vector<2x32xf32>
    %571 = arith.addf %569, %570 : vector<2x32xf32>
    %572 = math.tanh %571 : vector<2x32xf32>
    %573 = arith.mulf %566, %572 : vector<2x32xf32>
    %c6 = arith.constant 6 : index
    %c0_276 = arith.constant 0 : index
    %574 = vector.load %arg27[%c6, %c0_276] : memref<16x32xf32, #tpu.memory_space<vmem>>, vector<2x32xf32>
    tpu.vector_store %arg27[%c6, %c0_276], %573 {strides = array<i32>} : memref<16x32xf32, #tpu.memory_space<vmem>>, vector<2x32xf32>,
    %575 = vector.extract_strided_slice %382 {offsets = [8, 0], sizes = [2, 128], strides = [1, 1]} : vector<16x128xf32> to vector<2x128xf32>
    %c0_277 = arith.constant 0 : index
    %c0_278 = arith.constant 0 : index
    %c0_279 = arith.constant 0 : index
    %576 = vector.load %arg23[%c0_277, %c0_278, %c0_279] : memref<2x32x128xf32, #tpu.memory_space<vmem>>, vector<1x32x128xf32>
    %577 = vector.shape_cast %576 : vector<1x32x128xf32> to vector<32x128xf32>
    %cst_280 = arith.constant dense<0.000000e+00> : vector<2x128xf32>
    %578 = tpu.matmul %547, %577, %cst_280 {dimension_numbers = #tpu.dot_dimension_numbers<[1], [0], [0], [1], [0, 0, 1, 1], [], []>} : vector<2x32xf32>, vector<32x128xf32>, vector<2x128xf32> -> vector<2x128xf32>
    %579 = arith.addf %575, %578 : vector<2x128xf32>
    %580 = arith.negf %579 : vector<2x128xf32>
    %581 = math.exp %580 : vector<2x128xf32>
    %cst_281 = arith.constant 1.000000e+00 : f32
    %582 = vector.broadcast %cst_281 : f32 to vector<2x128xf32>
    %583 = arith.addf %582, %581 : vector<2x128xf32>
    %584 = arith.divf %582, %583 : vector<2x128xf32>
    %585 = vector.extract_strided_slice %584 {offsets = [0, 0], sizes = [2, 32], strides = [1, 1]} : vector<2x128xf32> to vector<2x32xf32>
    %586 = vector.extract_strided_slice %584 {offsets = [0, 32], sizes = [2, 32], strides = [1, 1]} : vector<2x128xf32> to vector<2x32xf32>
    %587 = vector.extract_strided_slice %584 {offsets = [0, 96], sizes = [2, 32], strides = [1, 1]} : vector<2x128xf32> to vector<2x32xf32>
    %588 = vector.extract_strided_slice %579 {offsets = [0, 64], sizes = [2, 32], strides = [1, 1]} : vector<2x128xf32> to vector<2x32xf32>
    %589 = math.tanh %588 : vector<2x32xf32>
    %590 = arith.mulf %586, %545 : vector<2x32xf32>
    %591 = arith.mulf %585, %589 : vector<2x32xf32>
    %592 = arith.addf %590, %591 : vector<2x32xf32>
    %593 = math.tanh %592 : vector<2x32xf32>
    %594 = arith.mulf %587, %593 : vector<2x32xf32>
    %c1_282 = arith.constant 1 : index
    %c0_283 = arith.constant 0 : index
    %c0_284 = arith.constant 0 : index
    %595 = vector.load %arg22[%c1_282, %c0_283, %c0_284] : memref<2x32x128xf32, #tpu.memory_space<vmem>>, vector<1x32x128xf32>
    %596 = vector.shape_cast %595 : vector<1x32x128xf32> to vector<32x128xf32>
    %cst_285 = arith.constant dense<0.000000e+00> : vector<2x128xf32>
    %597 = tpu.matmul %594, %596, %cst_285 {dimension_numbers = #tpu.dot_dimension_numbers<[1], [0], [0], [1], [0, 0, 1, 1], [], []>} : vector<2x32xf32>, vector<32x128xf32>, vector<2x128xf32> -> vector<2x128xf32>
    %c1_286 = arith.constant 1 : index
    %c0_287 = arith.constant 0 : index
    %c0_288 = arith.constant 0 : index
    %598 = vector.load %arg24[%c1_286, %c0_287, %c0_288] : memref<2x1x128xf32, #tpu.memory_space<vmem>>, vector<1x1x128xf32>
    %599 = vector.shape_cast %598 : vector<1x1x128xf32> to vector<1x128xf32>
    %600 = vector.broadcast %599 : vector<1x128xf32> to vector<2x128xf32>
    %601 = arith.addf %597, %600 : vector<2x128xf32>
    %c1_289 = arith.constant 1 : index
    %c0_290 = arith.constant 0 : index
    %c0_291 = arith.constant 0 : index
    %602 = vector.load %arg23[%c1_289, %c0_290, %c0_291] : memref<2x32x128xf32, #tpu.memory_space<vmem>>, vector<1x32x128xf32>
    %603 = vector.shape_cast %602 : vector<1x32x128xf32> to vector<32x128xf32>
    %cst_292 = arith.constant dense<0.000000e+00> : vector<2x128xf32>
    %604 = tpu.matmul %573, %603, %cst_292 {dimension_numbers = #tpu.dot_dimension_numbers<[1], [0], [0], [1], [0, 0, 1, 1], [], []>} : vector<2x32xf32>, vector<32x128xf32>, vector<2x128xf32> -> vector<2x128xf32>
    %605 = arith.addf %601, %604 : vector<2x128xf32>
    %606 = arith.negf %605 : vector<2x128xf32>
    %607 = math.exp %606 : vector<2x128xf32>
    %cst_293 = arith.constant 1.000000e+00 : f32
    %608 = vector.broadcast %cst_293 : f32 to vector<2x128xf32>
    %609 = arith.addf %608, %607 : vector<2x128xf32>
    %610 = arith.divf %608, %609 : vector<2x128xf32>
    %611 = vector.extract_strided_slice %610 {offsets = [0, 0], sizes = [2, 32], strides = [1, 1]} : vector<2x128xf32> to vector<2x32xf32>
    %612 = vector.extract_strided_slice %610 {offsets = [0, 32], sizes = [2, 32], strides = [1, 1]} : vector<2x128xf32> to vector<2x32xf32>
    %613 = vector.extract_strided_slice %610 {offsets = [0, 96], sizes = [2, 32], strides = [1, 1]} : vector<2x128xf32> to vector<2x32xf32>
    %614 = vector.extract_strided_slice %605 {offsets = [0, 64], sizes = [2, 32], strides = [1, 1]} : vector<2x128xf32> to vector<2x32xf32>
    %615 = math.tanh %614 : vector<2x32xf32>
    %616 = arith.mulf %612, %571 : vector<2x32xf32>
    %617 = arith.mulf %611, %615 : vector<2x32xf32>
    %618 = arith.addf %616, %617 : vector<2x32xf32>
    %619 = math.tanh %618 : vector<2x32xf32>
    %620 = arith.mulf %613, %619 : vector<2x32xf32>
    %c8 = arith.constant 8 : index
    %c0_294 = arith.constant 0 : index
    %621 = vector.load %arg27[%c8, %c0_294] : memref<16x32xf32, #tpu.memory_space<vmem>>, vector<2x32xf32>
    tpu.vector_store %arg27[%c8, %c0_294], %620 {strides = array<i32>} : memref<16x32xf32, #tpu.memory_space<vmem>>, vector<2x32xf32>,
    %622 = vector.extract_strided_slice %382 {offsets = [10, 0], sizes = [2, 128], strides = [1, 1]} : vector<16x128xf32> to vector<2x128xf32>
    %c0_295 = arith.constant 0 : index
    %c0_296 = arith.constant 0 : index
    %c0_297 = arith.constant 0 : index
    %623 = vector.load %arg23[%c0_295, %c0_296, %c0_297] : memref<2x32x128xf32, #tpu.memory_space<vmem>>, vector<1x32x128xf32>
    %624 = vector.shape_cast %623 : vector<1x32x128xf32> to vector<32x128xf32>
    %cst_298 = arith.constant dense<0.000000e+00> : vector<2x128xf32>
    %625 = tpu.matmul %594, %624, %cst_298 {dimension_numbers = #tpu.dot_dimension_numbers<[1], [0], [0], [1], [0, 0, 1, 1], [], []>} : vector<2x32xf32>, vector<32x128xf32>, vector<2x128xf32> -> vector<2x128xf32>
    %626 = arith.addf %622, %625 : vector<2x128xf32>
    %627 = arith.negf %626 : vector<2x128xf32>
    %628 = math.exp %627 : vector<2x128xf32>
    %cst_299 = arith.constant 1.000000e+00 : f32
    %629 = vector.broadcast %cst_299 : f32 to vector<2x128xf32>
    %630 = arith.addf %629, %628 : vector<2x128xf32>
    %631 = arith.divf %629, %630 : vector<2x128xf32>
    %632 = vector.extract_strided_slice %631 {offsets = [0, 0], sizes = [2, 32], strides = [1, 1]} : vector<2x128xf32> to vector<2x32xf32>
    %633 = vector.extract_strided_slice %631 {offsets = [0, 32], sizes = [2, 32], strides = [1, 1]} : vector<2x128xf32> to vector<2x32xf32>
    %634 = vector.extract_strided_slice %631 {offsets = [0, 96], sizes = [2, 32], strides = [1, 1]} : vector<2x128xf32> to vector<2x32xf32>
    %635 = vector.extract_strided_slice %626 {offsets = [0, 64], sizes = [2, 32], strides = [1, 1]} : vector<2x128xf32> to vector<2x32xf32>
    %636 = math.tanh %635 : vector<2x32xf32>
    %637 = arith.mulf %633, %592 : vector<2x32xf32>
    %638 = arith.mulf %632, %636 : vector<2x32xf32>
    %639 = arith.addf %637, %638 : vector<2x32xf32>
    %640 = math.tanh %639 : vector<2x32xf32>
    %641 = arith.mulf %634, %640 : vector<2x32xf32>
    %c1_300 = arith.constant 1 : index
    %c0_301 = arith.constant 0 : index
    %c0_302 = arith.constant 0 : index
    %642 = vector.load %arg22[%c1_300, %c0_301, %c0_302] : memref<2x32x128xf32, #tpu.memory_space<vmem>>, vector<1x32x128xf32>
    %643 = vector.shape_cast %642 : vector<1x32x128xf32> to vector<32x128xf32>
    %cst_303 = arith.constant dense<0.000000e+00> : vector<2x128xf32>
    %644 = tpu.matmul %641, %643, %cst_303 {dimension_numbers = #tpu.dot_dimension_numbers<[1], [0], [0], [1], [0, 0, 1, 1], [], []>} : vector<2x32xf32>, vector<32x128xf32>, vector<2x128xf32> -> vector<2x128xf32>
    %c1_304 = arith.constant 1 : index
    %c0_305 = arith.constant 0 : index
    %c0_306 = arith.constant 0 : index
    %645 = vector.load %arg24[%c1_304, %c0_305, %c0_306] : memref<2x1x128xf32, #tpu.memory_space<vmem>>, vector<1x1x128xf32>
    %646 = vector.shape_cast %645 : vector<1x1x128xf32> to vector<1x128xf32>
    %647 = vector.broadcast %646 : vector<1x128xf32> to vector<2x128xf32>
    %648 = arith.addf %644, %647 : vector<2x128xf32>
    %c1_307 = arith.constant 1 : index
    %c0_308 = arith.constant 0 : index
    %c0_309 = arith.constant 0 : index
    %649 = vector.load %arg23[%c1_307, %c0_308, %c0_309] : memref<2x32x128xf32, #tpu.memory_space<vmem>>, vector<1x32x128xf32>
    %650 = vector.shape_cast %649 : vector<1x32x128xf32> to vector<32x128xf32>
    %cst_310 = arith.constant dense<0.000000e+00> : vector<2x128xf32>
    %651 = tpu.matmul %620, %650, %cst_310 {dimension_numbers = #tpu.dot_dimension_numbers<[1], [0], [0], [1], [0, 0, 1, 1], [], []>} : vector<2x32xf32>, vector<32x128xf32>, vector<2x128xf32> -> vector<2x128xf32>
    %652 = arith.addf %648, %651 : vector<2x128xf32>
    %653 = arith.negf %652 : vector<2x128xf32>
    %654 = math.exp %653 : vector<2x128xf32>
    %cst_311 = arith.constant 1.000000e+00 : f32
    %655 = vector.broadcast %cst_311 : f32 to vector<2x128xf32>
    %656 = arith.addf %655, %654 : vector<2x128xf32>
    %657 = arith.divf %655, %656 : vector<2x128xf32>
    %658 = vector.extract_strided_slice %657 {offsets = [0, 0], sizes = [2, 32], strides = [1, 1]} : vector<2x128xf32> to vector<2x32xf32>
    %659 = vector.extract_strided_slice %657 {offsets = [0, 32], sizes = [2, 32], strides = [1, 1]} : vector<2x128xf32> to vector<2x32xf32>
    %660 = vector.extract_strided_slice %657 {offsets = [0, 96], sizes = [2, 32], strides = [1, 1]} : vector<2x128xf32> to vector<2x32xf32>
    %661 = vector.extract_strided_slice %652 {offsets = [0, 64], sizes = [2, 32], strides = [1, 1]} : vector<2x128xf32> to vector<2x32xf32>
    %662 = math.tanh %661 : vector<2x32xf32>
    %663 = arith.mulf %659, %618 : vector<2x32xf32>
    %664 = arith.mulf %658, %662 : vector<2x32xf32>
    %665 = arith.addf %663, %664 : vector<2x32xf32>
    %666 = math.tanh %665 : vector<2x32xf32>
    %667 = arith.mulf %660, %666 : vector<2x32xf32>
    %c10 = arith.constant 10 : index
    %c0_312 = arith.constant 0 : index
    %668 = vector.load %arg27[%c10, %c0_312] : memref<16x32xf32, #tpu.memory_space<vmem>>, vector<2x32xf32>
    tpu.vector_store %arg27[%c10, %c0_312], %667 {strides = array<i32>} : memref<16x32xf32, #tpu.memory_space<vmem>>, vector<2x32xf32>,
    %669 = vector.extract_strided_slice %382 {offsets = [12, 0], sizes = [2, 128], strides = [1, 1]} : vector<16x128xf32> to vector<2x128xf32>
    %c0_313 = arith.constant 0 : index
    %c0_314 = arith.constant 0 : index
    %c0_315 = arith.constant 0 : index
    %670 = vector.load %arg23[%c0_313, %c0_314, %c0_315] : memref<2x32x128xf32, #tpu.memory_space<vmem>>, vector<1x32x128xf32>
    %671 = vector.shape_cast %670 : vector<1x32x128xf32> to vector<32x128xf32>
    %cst_316 = arith.constant dense<0.000000e+00> : vector<2x128xf32>
    %672 = tpu.matmul %641, %671, %cst_316 {dimension_numbers = #tpu.dot_dimension_numbers<[1], [0], [0], [1], [0, 0, 1, 1], [], []>} : vector<2x32xf32>, vector<32x128xf32>, vector<2x128xf32> -> vector<2x128xf32>
    %673 = arith.addf %669, %672 : vector<2x128xf32>
    %674 = arith.negf %673 : vector<2x128xf32>
    %675 = math.exp %674 : vector<2x128xf32>
    %cst_317 = arith.constant 1.000000e+00 : f32
    %676 = vector.broadcast %cst_317 : f32 to vector<2x128xf32>
    %677 = arith.addf %676, %675 : vector<2x128xf32>
    %678 = arith.divf %676, %677 : vector<2x128xf32>
    %679 = vector.extract_strided_slice %678 {offsets = [0, 0], sizes = [2, 32], strides = [1, 1]} : vector<2x128xf32> to vector<2x32xf32>
    %680 = vector.extract_strided_slice %678 {offsets = [0, 32], sizes = [2, 32], strides = [1, 1]} : vector<2x128xf32> to vector<2x32xf32>
    %681 = vector.extract_strided_slice %678 {offsets = [0, 96], sizes = [2, 32], strides = [1, 1]} : vector<2x128xf32> to vector<2x32xf32>
    %682 = vector.extract_strided_slice %673 {offsets = [0, 64], sizes = [2, 32], strides = [1, 1]} : vector<2x128xf32> to vector<2x32xf32>
    %683 = math.tanh %682 : vector<2x32xf32>
    %684 = arith.mulf %680, %639 : vector<2x32xf32>
    %685 = arith.mulf %679, %683 : vector<2x32xf32>
    %686 = arith.addf %684, %685 : vector<2x32xf32>
    %687 = math.tanh %686 : vector<2x32xf32>
    %688 = arith.mulf %681, %687 : vector<2x32xf32>
    %c1_318 = arith.constant 1 : index
    %c0_319 = arith.constant 0 : index
    %c0_320 = arith.constant 0 : index
    %689 = vector.load %arg22[%c1_318, %c0_319, %c0_320] : memref<2x32x128xf32, #tpu.memory_space<vmem>>, vector<1x32x128xf32>
    %690 = vector.shape_cast %689 : vector<1x32x128xf32> to vector<32x128xf32>
    %cst_321 = arith.constant dense<0.000000e+00> : vector<2x128xf32>
    %691 = tpu.matmul %688, %690, %cst_321 {dimension_numbers = #tpu.dot_dimension_numbers<[1], [0], [0], [1], [0, 0, 1, 1], [], []>} : vector<2x32xf32>, vector<32x128xf32>, vector<2x128xf32> -> vector<2x128xf32>
    %c1_322 = arith.constant 1 : index
    %c0_323 = arith.constant 0 : index
    %c0_324 = arith.constant 0 : index
    %692 = vector.load %arg24[%c1_322, %c0_323, %c0_324] : memref<2x1x128xf32, #tpu.memory_space<vmem>>, vector<1x1x128xf32>
    %693 = vector.shape_cast %692 : vector<1x1x128xf32> to vector<1x128xf32>
    %694 = vector.broadcast %693 : vector<1x128xf32> to vector<2x128xf32>
    %695 = arith.addf %691, %694 : vector<2x128xf32>
    %c1_325 = arith.constant 1 : index
    %c0_326 = arith.constant 0 : index
    %c0_327 = arith.constant 0 : index
    %696 = vector.load %arg23[%c1_325, %c0_326, %c0_327] : memref<2x32x128xf32, #tpu.memory_space<vmem>>, vector<1x32x128xf32>
    %697 = vector.shape_cast %696 : vector<1x32x128xf32> to vector<32x128xf32>
    %cst_328 = arith.constant dense<0.000000e+00> : vector<2x128xf32>
    %698 = tpu.matmul %667, %697, %cst_328 {dimension_numbers = #tpu.dot_dimension_numbers<[1], [0], [0], [1], [0, 0, 1, 1], [], []>} : vector<2x32xf32>, vector<32x128xf32>, vector<2x128xf32> -> vector<2x128xf32>
    %699 = arith.addf %695, %698 : vector<2x128xf32>
    %700 = arith.negf %699 : vector<2x128xf32>
    %701 = math.exp %700 : vector<2x128xf32>
    %cst_329 = arith.constant 1.000000e+00 : f32
    %702 = vector.broadcast %cst_329 : f32 to vector<2x128xf32>
    %703 = arith.addf %702, %701 : vector<2x128xf32>
    %704 = arith.divf %702, %703 : vector<2x128xf32>
    %705 = vector.extract_strided_slice %704 {offsets = [0, 0], sizes = [2, 32], strides = [1, 1]} : vector<2x128xf32> to vector<2x32xf32>
    %706 = vector.extract_strided_slice %704 {offsets = [0, 32], sizes = [2, 32], strides = [1, 1]} : vector<2x128xf32> to vector<2x32xf32>
    %707 = vector.extract_strided_slice %704 {offsets = [0, 96], sizes = [2, 32], strides = [1, 1]} : vector<2x128xf32> to vector<2x32xf32>
    %708 = vector.extract_strided_slice %699 {offsets = [0, 64], sizes = [2, 32], strides = [1, 1]} : vector<2x128xf32> to vector<2x32xf32>
    %709 = math.tanh %708 : vector<2x32xf32>
    %710 = arith.mulf %706, %665 : vector<2x32xf32>
    %711 = arith.mulf %705, %709 : vector<2x32xf32>
    %712 = arith.addf %710, %711 : vector<2x32xf32>
    %713 = math.tanh %712 : vector<2x32xf32>
    %714 = arith.mulf %707, %713 : vector<2x32xf32>
    %c12 = arith.constant 12 : index
    %c0_330 = arith.constant 0 : index
    %715 = vector.load %arg27[%c12, %c0_330] : memref<16x32xf32, #tpu.memory_space<vmem>>, vector<2x32xf32>
    tpu.vector_store %arg27[%c12, %c0_330], %714 {strides = array<i32>} : memref<16x32xf32, #tpu.memory_space<vmem>>, vector<2x32xf32>,
    %716 = vector.extract_strided_slice %382 {offsets = [14, 0], sizes = [2, 128], strides = [1, 1]} : vector<16x128xf32> to vector<2x128xf32>
    %c0_331 = arith.constant 0 : index
    %c0_332 = arith.constant 0 : index
    %c0_333 = arith.constant 0 : index
    %717 = vector.load %arg23[%c0_331, %c0_332, %c0_333] : memref<2x32x128xf32, #tpu.memory_space<vmem>>, vector<1x32x128xf32>
    %718 = vector.shape_cast %717 : vector<1x32x128xf32> to vector<32x128xf32>
    %cst_334 = arith.constant dense<0.000000e+00> : vector<2x128xf32>
    %719 = tpu.matmul %688, %718, %cst_334 {dimension_numbers = #tpu.dot_dimension_numbers<[1], [0], [0], [1], [0, 0, 1, 1], [], []>} : vector<2x32xf32>, vector<32x128xf32>, vector<2x128xf32> -> vector<2x128xf32>
    %720 = arith.addf %716, %719 : vector<2x128xf32>
    %721 = arith.negf %720 : vector<2x128xf32>
    %722 = math.exp %721 : vector<2x128xf32>
    %cst_335 = arith.constant 1.000000e+00 : f32
    %723 = vector.broadcast %cst_335 : f32 to vector<2x128xf32>
    %724 = arith.addf %723, %722 : vector<2x128xf32>
    %725 = arith.divf %723, %724 : vector<2x128xf32>
    %726 = vector.extract_strided_slice %725 {offsets = [0, 0], sizes = [2, 32], strides = [1, 1]} : vector<2x128xf32> to vector<2x32xf32>
    %727 = vector.extract_strided_slice %725 {offsets = [0, 32], sizes = [2, 32], strides = [1, 1]} : vector<2x128xf32> to vector<2x32xf32>
    %728 = vector.extract_strided_slice %725 {offsets = [0, 96], sizes = [2, 32], strides = [1, 1]} : vector<2x128xf32> to vector<2x32xf32>
    %729 = vector.extract_strided_slice %720 {offsets = [0, 64], sizes = [2, 32], strides = [1, 1]} : vector<2x128xf32> to vector<2x32xf32>
    %730 = math.tanh %729 : vector<2x32xf32>
    %731 = arith.mulf %727, %686 : vector<2x32xf32>
    %732 = arith.mulf %726, %730 : vector<2x32xf32>
    %733 = arith.addf %731, %732 : vector<2x32xf32>
    %734 = math.tanh %733 : vector<2x32xf32>
    %735 = arith.mulf %728, %734 : vector<2x32xf32>
    %c1_336 = arith.constant 1 : index
    %c0_337 = arith.constant 0 : index
    %c0_338 = arith.constant 0 : index
    %736 = vector.load %arg22[%c1_336, %c0_337, %c0_338] : memref<2x32x128xf32, #tpu.memory_space<vmem>>, vector<1x32x128xf32>
    %737 = vector.shape_cast %736 : vector<1x32x128xf32> to vector<32x128xf32>
    %cst_339 = arith.constant dense<0.000000e+00> : vector<2x128xf32>
    %738 = tpu.matmul %735, %737, %cst_339 {dimension_numbers = #tpu.dot_dimension_numbers<[1], [0], [0], [1], [0, 0, 1, 1], [], []>} : vector<2x32xf32>, vector<32x128xf32>, vector<2x128xf32> -> vector<2x128xf32>
    %c1_340 = arith.constant 1 : index
    %c0_341 = arith.constant 0 : index
    %c0_342 = arith.constant 0 : index
    %739 = vector.load %arg24[%c1_340, %c0_341, %c0_342] : memref<2x1x128xf32, #tpu.memory_space<vmem>>, vector<1x1x128xf32>
    %740 = vector.shape_cast %739 : vector<1x1x128xf32> to vector<1x128xf32>
    %741 = vector.broadcast %740 : vector<1x128xf32> to vector<2x128xf32>
    %742 = arith.addf %738, %741 : vector<2x128xf32>
    %c1_343 = arith.constant 1 : index
    %c0_344 = arith.constant 0 : index
    %c0_345 = arith.constant 0 : index
    %743 = vector.load %arg23[%c1_343, %c0_344, %c0_345] : memref<2x32x128xf32, #tpu.memory_space<vmem>>, vector<1x32x128xf32>
    %744 = vector.shape_cast %743 : vector<1x32x128xf32> to vector<32x128xf32>
    %cst_346 = arith.constant dense<0.000000e+00> : vector<2x128xf32>
    %745 = tpu.matmul %714, %744, %cst_346 {dimension_numbers = #tpu.dot_dimension_numbers<[1], [0], [0], [1], [0, 0, 1, 1], [], []>} : vector<2x32xf32>, vector<32x128xf32>, vector<2x128xf32> -> vector<2x128xf32>
    %746 = arith.addf %742, %745 : vector<2x128xf32>
    %747 = arith.negf %746 : vector<2x128xf32>
    %748 = math.exp %747 : vector<2x128xf32>
    %cst_347 = arith.constant 1.000000e+00 : f32
    %749 = vector.broadcast %cst_347 : f32 to vector<2x128xf32>
    %750 = arith.addf %749, %748 : vector<2x128xf32>
    %751 = arith.divf %749, %750 : vector<2x128xf32>
    %752 = vector.extract_strided_slice %751 {offsets = [0, 0], sizes = [2, 32], strides = [1, 1]} : vector<2x128xf32> to vector<2x32xf32>
    %753 = vector.extract_strided_slice %751 {offsets = [0, 32], sizes = [2, 32], strides = [1, 1]} : vector<2x128xf32> to vector<2x32xf32>
    %754 = vector.extract_strided_slice %751 {offsets = [0, 96], sizes = [2, 32], strides = [1, 1]} : vector<2x128xf32> to vector<2x32xf32>
    %755 = vector.extract_strided_slice %746 {offsets = [0, 64], sizes = [2, 32], strides = [1, 1]} : vector<2x128xf32> to vector<2x32xf32>
    %756 = math.tanh %755 : vector<2x32xf32>
    %757 = arith.mulf %753, %712 : vector<2x32xf32>
    %758 = arith.mulf %752, %756 : vector<2x32xf32>
    %759 = arith.addf %757, %758 : vector<2x32xf32>
    %760 = math.tanh %759 : vector<2x32xf32>
    %761 = arith.mulf %754, %760 : vector<2x32xf32>
    %c14 = arith.constant 14 : index
    %c0_348 = arith.constant 0 : index
    %762 = vector.load %arg27[%c14, %c0_348] : memref<16x32xf32, #tpu.memory_space<vmem>>, vector<2x32xf32>
    tpu.vector_store %arg27[%c14, %c0_348], %761 {strides = array<i32>} : memref<16x32xf32, #tpu.memory_space<vmem>>, vector<2x32xf32>,
    %c0_349 = arith.constant 0 : index
    %c0_350 = arith.constant 0 : index
    %763 = vector.load %arg25[%c0_349, %c0_350] : memref<32x128xf32, #tpu.memory_space<vmem>>, vector<32x128xf32>
    %c0_351 = arith.constant 0 : index
    %764 = memref.load %arg0[%c0_351] : memref<2xi32, #tpu.memory_space<smem>>
    %c2_i32 = arith.constant 2 : i32
    %765 = arith.muli %764, %c2_i32 : i32
    %c0_i32 = arith.constant 0 : i32
    %766 = arith.addi %765, %c0_i32 : i32
    %767 = arith.index_cast %766 : i32 to index
    %c0_352 = arith.constant 0 : index
    %768 = vector.load %arg27[%767, %c0_352] : memref<16x32xf32, #tpu.memory_space<vmem>>, vector<1x32xf32>
    %cst_353 = arith.constant dense<0.000000e+00> : vector<1x128xf32>
    %769 = tpu.matmul %768, %763, %cst_353 {dimension_numbers = #tpu.dot_dimension_numbers<[1], [0], [0], [1], [0, 0, 1, 1], [], []>} : vector<1x32xf32>, vector<32x128xf32>, vector<1x128xf32> -> vector<1x128xf32>
    %c0_354 = arith.constant 0 : index
    %c0_355 = arith.constant 0 : index
    %770 = vector.load %arg26[%c0_354, %c0_355] : memref<2x128xf32, #tpu.memory_space<vmem>>, vector<1x128xf32>
    tpu.vector_store %arg26[%c0_354, %c0_355], %769 {strides = array<i32>} : memref<2x128xf32, #tpu.memory_space<vmem>>, vector<1x128xf32>,
    %c1_356 = arith.constant 1 : index
    %771 = memref.load %arg0[%c1_356] : memref<2xi32, #tpu.memory_space<smem>>
    %c2_i32_357 = arith.constant 2 : i32
    %772 = arith.muli %771, %c2_i32_357 : i32
    %c1_i32 = arith.constant 1 : i32
    %773 = arith.addi %772, %c1_i32 : i32
    %774 = arith.index_cast %773 : i32 to index
    %c0_358 = arith.constant 0 : index
    %775 = vector.load %arg27[%774, %c0_358] : memref<16x32xf32, #tpu.memory_space<vmem>>, vector<1x32xf32>
    %cst_359 = arith.constant dense<0.000000e+00> : vector<1x128xf32>
    %776 = tpu.matmul %775, %763, %cst_359 {dimension_numbers = #tpu.dot_dimension_numbers<[1], [0], [0], [1], [0, 0, 1, 1], [], []>} : vector<1x32xf32>, vector<32x128xf32>, vector<1x128xf32> -> vector<1x128xf32>
    %c1_360 = arith.constant 1 : index
    %c0_361 = arith.constant 0 : index
    %777 = vector.load %arg26[%c1_360, %c0_361] : memref<2x128xf32, #tpu.memory_space<vmem>>, vector<1x128xf32>
    tpu.vector_store %arg26[%c1_360, %c0_361], %776 {strides = array<i32>} : memref<2x128xf32, #tpu.memory_space<vmem>>, vector<1x128xf32>,
    return
  }
}

</mosaic_0001>

<bundles_post_ra>
// kernel: gpt2_forward.1
= control target key start
LH: loop header
LB: loop body
LE: loop exit
PB: predicated region body
PF: predicated region fallthrough
CT: control target
= control target key end

     0   :  { %s4802_s0 = inlined_call_operand.vmem [shape: s32[2], index: 0, kind: input, shape index: {}]   ;;  %s4803_s1 = inlined_call_operand.vmem [shape: f32[16,32], index: 1, kind: input, shape index: {}]   ;;  %s4804_s2 = inlined_call_operand.vmem [shape: f32[16,16], index: 2, kind: input, shape index: {}]   ;;  %s4805_s3 = inlined_call_operand.vmem [shape: f32[4,1,32], index: 3, kind: input, shape index: {}]   ;;  %s4806_s4 = inlined_call_operand.vmem [shape: f32[16,16], index: 4, kind: input, shape index: {}]   ;;  %s4807_s5 = inlined_call_operand.vmem [shape: f32[2,1,32], index: 5, kind: input, shape index: {}]   ;;  %s4808_s6 = inlined_call_operand.vmem [shape: f32[2,1,32], index: 6, kind: input, shape index: {}]   ;;  %s4809_s7 = inlined_call_operand.vmem [shape: f32[2,32,32], index: 7, kind: input, shape index: {}]   ;;  %s4810_s8 = inlined_call_operand.vmem [shape: f32[2,1,32], index: 8, kind: input, shape index: {}]   ;;  %s4811_s9 = inlined_call_operand.vmem [shape: f32[2,32,32], index: 9, kind: input, shape index: {}]   ;;  %s4812_s10 = inlined_call_operand.vmem [shape: f32[2,1,32], index: 10, kind: input, shape index: {}]   ;;  %s4813_s11 = inlined_call_operand.vmem [shape: f32[2,32,32], index: 11, kind: input, shape index: {}]   ;;  %s4814_s12 = inlined_call_operand.vmem [shape: f32[2,1,32], index: 12, kind: input, shape index: {}]   ;;  %s4815_s13 = inlined_call_operand.vmem [shape: f32[2,32,32], index: 13, kind: input, shape index: {}]   ;;  %s4816_s14 = inlined_call_operand.vmem [shape: f32[2,1,32], index: 14, kind: input, shape index: {}]   ;;  %s4817_s15 = inlined_call_operand.vmem [shape: f32[2,1,32], index: 15, kind: input, shape index: {}]   ;;  %s4818_s16 = inlined_call_operand.vmem [shape: f32[2,1,32], index: 16, kind: input, shape index: {}]   ;;  %s4819_s17 = inlined_call_operand.vmem [shape: f32[2,32,128], index: 17, kind: input, shape index: {}]   ;;  %s4820_s18 = inlined_call_operand.vmem [shape: f32[2,1,128], index: 18, kind: input, shape index: {}]   ;;  %s4821_s19 = inlined_call_operand.vmem [shape: f32[2,128,32], index: 19, kind: input, shape index: {}]   ;;  %s4822_s20 = inlined_call_operand.vmem [shape: f32[2,1,32], index: 20, kind: input, shape index: {}]   ;;  %s4823_s21 = inlined_call_operand.vmem [shape: f32[2,32,32], index: 21, kind: input, shape index: {}]   ;;  %s4824_s22 = inlined_call_operand.vmem [shape: f32[2,32,128], index: 22, kind: input, shape index: {}]   ;;  %s4825_s23 = inlined_call_operand.vmem [shape: f32[2,32,128], index: 23, kind: input, shape index: {}]   ;;  %s4826_s24 = inlined_call_operand.vmem [shape: f32[2,1,128], index: 24, kind: input, shape index: {}]   ;;  %s4827_s25 = inlined_call_operand.vmem [shape: f32[32,128], index: 25, kind: input, shape index: {}]   ;;  %s4828_s26 = inlined_call_operand.hbm [shape: f32[2,128], index: 26, kind: output, shape index: {}]  }
   0x1   :  { %4839 = sst [smem:[#allocation9_spill]] %s4802_s0 }
   0x2   :  { %4840 = sst [smem:[#allocation10_spill]] %s4803_s1 }
   0x3   :  { %4841 = sst [smem:[#allocation11_spill]] %s4804_s2 }
   0x4   :  { %4842 = sst [smem:[#allocation12_spill]] %s4805_s3 }
   0x5   :  { %4843 = sst [smem:[#allocation13_spill]] %s4806_s4 }
   0x6   :  { %4844 = sst [smem:[#allocation14_spill]] %s4807_s5 }
   0x7   :  { %4845 = sst [smem:[#allocation15_spill]] %s4808_s6 }
   0x8   :  { %4846 = sst [smem:[#allocation16_spill]] %s4809_s7 }
   0x9   :  { %4847 = sst [smem:[#allocation17_spill]] %s4810_s8 }
   0xa   :  { %4848 = sst [smem:[#allocation18_spill]] %s4811_s9 }
   0xb   :  { %4849 = sst [smem:[#allocation19_spill]] %s4812_s10 }
   0xc   :  { %4850 = sst [smem:[#allocation20_spill]] %s4828_s26 }
   0xd   :  { %31 = vsyncpa [#allocation5], 0 }
   0xe   :  { %32 = vsyncpa [#allocation4], 0  ;;  %s4851_s7 = sld [smem:[#allocation9_spill]]  ;;  %s3639_s8 = smov [#allocation3]  }
  0x14   :  { %s38_s28 = sshll.u32 %s4851_s7, 4  ;;  %s39_s28 = int_to_ptr.vmem [resolvable:$true] %s38_s28 }
  0x15   :  { %41 = dma.vmem_to_smem %s39_s28, 16, %s3639_s8, [#allocation5]  }
  0x16   :  { %3635 = dma.done.wait [#allocation5], 16  }
  0x17   :  { %3636 = vsyncadd [#allocation5], 4294967280 }
  0x18   :  { %96 = sfence }
  0x19   :  { %s4852_s0 = sld [smem:[#allocation10_spill]]  ;;  %vm110_vm0 = vcmask 261120   ;;  %v3640_v4 = vmov 32.0   ;;  %v243_v23 = vld [vmem:[%s4813_s11 + $0x18] sm:$0xff]  ;;  %v242_v26 = vld [vmem:[%s4813_s11 + $0x10] sm:$0xff]  ;;  %v241_v29 = vld [vmem:[%s4813_s11 + $0x8] sm:$0xff] }
  0x1a   :  { %3389 = vrcp.f32 %v3640_v4  ;;  %s4853_s10 = sld [smem:[#allocation16_spill]]  ;;  %260 = vmatpush.msra.mxu2 %v243_v23  ;;  %v240_v32 = vld [vmem:[%s4813_s11] sm:$0xff]  ;;  %vm311_vm8 = vcmask 130048  }
  0x1b   :  { %s4854_s27 = sld [smem:[#allocation18_spill]] }
  0x1c   :  { %261 = vmatpush.msra.mxu2 %v242_v26  ;;  %s4855_s2 = sld [smem:[#allocation14_spill]] }
  0x1d   :  { %s4856_s1 = sld [smem:[#allocation15_spill]] }
  0x1e   :  { %262 = vmatpush.msra.mxu2 %v241_v29  ;;  %s4857_s28 = sld [smem:[#allocation19_spill]] }
  0x1f   :  { %v3786_v0 = vld [vmem:[%s4852_s0] sm:$0xff]  ;;  %v3791_v1 = vld [vmem:[%s4852_s0 + $0x8] sm:$0xff]  ;;  %s4858_s29 = sld [smem:[#allocation17_spill]] }
  0x20   :  { %v111_v2 = vsel %vm110_vm0, %v3786_v0, 0.0  ;;  %v114_v3 = vsel %vm110_vm0, %v3791_v1, 0.0  ;;  %v3390_v5 = vpop.eup %3389  ;;  %v175_v21 = vld [vmem:[%s4853_s10 + $0x18] sm:$0xff]  ;;  %v174_v24 = vld [vmem:[%s4853_s10 + $0x10] sm:$0xff]  ;;  %v173_v27 = vld [vmem:[%s4853_s10 + $0x8] sm:$0xff]  ;;  %263 = vmatpush.msra.mxu2 %v240_v32  ;;  %s4859_s6 = sld [smem:[#allocation12_spill]] }
  0x21   :  { %112 = vadd.xlane.f32.xlu0 %v111_v2  ;;  %v118_v6 = vmul.f32 32.0, %v3390_v5  ;;  %vm122_vm1 = vweird.f32 %v3390_v5  ;;  %v212_v22 = vld [vmem:[%s4854_s27 + $0x18] sm:$0xff]  ;;  %198 = vmatpush.msra.mxu0 %v175_v21  ;;  %v211_v25 = vld [vmem:[%s4854_s27 + $0x10] sm:$0xff]  ;;  %v210_v28 = vld [vmem:[%s4854_s27 + $0x8] sm:$0xff]  ;;  %s4861_s4 = sld [smem:[#allocation13_spill]] }
  0x22   :  { %229 = vmatpush.msra.mxu1 %v212_v22  ;;  %v172_v30 = vld [vmem:[%s4853_s10] sm:$0xff] }
  0x23   :  { %v119_v7 = vsub.f32 1.0, %v118_v6  ;;  %199 = vmatpush.msra.mxu0 %v174_v24  ;;  %v209_v31 = vld [vmem:[%s4854_s27] sm:$0xff] }
  0x24   :  { %230 = vmatpush.msra.mxu1 %v211_v25  ;;  %v3356_v47 = vld [vmem:[%s4855_s2] ss:$0 sm:$0xff] }
  0x25   :  { %v120_v8 = vmul.f32 %v3390_v5, %v119_v7  ;;  %200 = vmatpush.msra.mxu0 %v173_v27  ;;  %v3357_v51 = vld [vmem:[%s4856_s1] ss:$0 sm:$0xff] }
  0x26   :  { %231 = vmatpush.msra.mxu1 %v210_v28  ;;  %v3360_v63 = vld [vmem:[%s4857_s28] ss:$0 sm:$0xff]  ;;  %v3903_v22 = vld [vmem:[%s4859_s6 + $0x3] ss:$0 sm:$0xff] }
  0x27   :  { %v121_v9 = vadd.f32 %v3390_v5, %v120_v8  ;;  %201 = vmatpush.msra.mxu0 %v172_v30  ;;  %v3361_v7 = vld [vmem:[%s4814_s12] ss:$0 sm:$0xff] }
  0x28   :  { %232 = vmatpush.msra.mxu1 %v209_v31  ;;  %v3876_v8 = vld [vmem:[%s4859_s6] ss:$0 sm:$0xff] }
  0x29   :  { %115 = vadd.xlane.f32.xlu0 %v114_v3  ;;  %v3797_v10 = vsel %vm122_vm1, %v3390_v5, %v121_v9  ;;  %v3358_v3 = vld [vmem:[%s4858_s29] ss:$0 sm:$0xff]  ;;  %v3881_v9 = vld [vmem:[%s4859_s6 + $0x1] ss:$0 sm:$0xff] }
  0x94   :  { %v113_v11 = vpop.xlane.xlu0 %112 }
  0x95   :  { %v124_v12 = vmul.f32 %v3797_v10, %v113_v11 }
  0x97   :  { %v126_v13 = vsub.f32 %v3786_v0, %v124_v12 }
  0x99   :  { %v128_v14 = vmul.f32 %v126_v13, %v126_v13 }
  0x9b   :  { %v130_v15 = vsel %vm110_vm0, %v128_v14, 0.0 }
  0x9c   :  { %131 = vadd.xlane.f32.xlu1 %v130_v15  ;;  %v116_v16 = vpop.xlane.xlu0 %115 }
  0x9d   :  { %v125_v17 = vmul.f32 %v3797_v10, %v116_v16 }
  0x9f   :  { %v3804_v18 = vsub.f32 %v3791_v1, %v125_v17  ;;  %v3893_v17 = vld [vmem:[%s4859_s6 + $0x2] ss:$0 sm:$0xff]  ;;  %s4860_s6 = sld [smem:[#allocation11_spill]] }
  0xa1   :  { %v129_v19 = vmul.f32 %v3804_v18, %v3804_v18 }
  0xa3   :  { %v133_v20 = vsel %vm110_vm0, %v129_v19, 0.0 }
  0xa4   :  { %134 = vadd.xlane.f32.xlu1 %v133_v20 }
 0x10f   :  { %v132_v33 = vpop.xlane.xlu1 %131 }
 0x110   :  { %v136_v34 = vmul.f32 %v132_v33, %v3797_v10  ;;  %v3930_v33 = vld [vmem:[%s4860_s6] sm:$0xff] }
 0x112   :  { %v138_v35 = vadd.f32 1e-05, %v136_v34 }
 0x114   :  { %3391 = vrsqrt.f32 %v138_v35  ;;  %vm146_vm3 = vweird.f32 %v138_v35 }
 0x117   :  { %v135_v36 = vpop.xlane.xlu1 %134 }
 0x118   :  { %v137_v37 = vmul.f32 %v135_v36, %v3797_v10 }
 0x11a   :  { %v3392_v38 = vpop.eup %3391  ;;  %v139_v39 = vadd.f32 1e-05, %v137_v37 }
 0x11b   :  { %v141_v40 = vmul.f32 %v3392_v38, %v138_v35  ;;  %vm147_vm2 = vweird.f32 %v3392_v38 }
 0x11c   :  { %3393 = vrsqrt.f32 %v139_v39  ;;  %vm148_vm4 = vmor %vm146_vm3, %vm147_vm2  ;;  %vm156_vm6 = vweird.f32 %v139_v39 }
 0x11d   :  { %v142_v41 = vmul.f32 %v3392_v38, %v141_v40 }
 0x11f   :  { %v143_v42 = vmul.f32 0.5, %v142_v41 }
 0x121   :  { %v144_v43 = vsub.f32 1.5, %v143_v42 }
 0x122   :  { %v3394_v44 = vpop.eup %3393 }
 0x123   :  { %v145_v45 = vmul.f32 %v3392_v38, %v144_v43  ;;  %v151_v46 = vmul.f32 %v3394_v44, %v139_v39  ;;  %vm157_vm5 = vweird.f32 %v3394_v44 }
 0x124   :  { %vm158_vm7 = vmor %vm156_vm6, %vm157_vm5 }
 0x125   :  { %v149_v48 = vsel %vm148_vm4, %v3392_v38, %v145_v45  ;;  %v152_v49 = vmul.f32 %v3394_v44, %v151_v46  ;;  %v3937_v38 = vld [vmem:[%s4860_s6 + $0x8] sm:$0xff] }
 0x126   :  { %v160_v50 = vmul.f32 %v149_v48, %v126_v13 }
 0x127   :  { %v153_v52 = vmul.f32 0.5, %v152_v49 }
 0x128   :  { %v165_v53 = vmul.f32 %v3356_v47, %v160_v50 }
 0x129   :  { %v154_v54 = vsub.f32 1.5, %v153_v52 }
 0x12a   :  { %v170_v55 = vadd.f32 %v3357_v51, %v165_v53 }
 0x12b   :  { %v155_v56 = vmul.f32 %v3394_v44, %v154_v54 }
 0x12c   :  { %3108 = vmatmul.msk.f32.vlgmr.msra.gmra.mxu0 %vm110_vm0, %v170_v55  ;;  %3110 = vmatmul.msk.f32.vlgmr.msra.gmra.mxu1 %vm110_vm0, %v170_v55 }
 0x12d   :  { %v159_v57 = vsel %vm158_vm7, %v3394_v44, %v155_v56  ;;  %3112 = vmatmul.msk.f32.vlgmr.msra.gmra.mxu2 %vm110_vm0, %v170_v55 }
 0x12e   :  { %v161_v58 = vmul.f32 %v159_v57, %v3804_v18 }
 0x130   :  { %v166_v59 = vmul.f32 %v3356_v47, %v161_v58 }
 0x132   :  { %v171_v60 = vadd.f32 %v3357_v51, %v166_v59 }
 0x134   :  { %3109 = vmatmul.msk.f32.gmra.mxu0 %vm110_vm0, %v171_v60  ;;  %3111 = vmatmul.msk.f32.gmra.mxu1 %vm110_vm0, %v171_v60 }
 0x135   :  { %3113 = vmatmul.msk.f32.gmra.mxu2 %vm110_vm0, %v171_v60 }
 0x1a9   :  { %v234_v61 = vpop.f32.mrf.mxu1  ;;  %v203_v62 = vpop.f32.mrf.mxu0 }
 0x1aa   :  { %v3868_v6 = vadd.f32 %v3358_v3, %v203_v62  ;;  %v235_v11 = vadd.f32 %v3360_v63, %v234_v61 }
 0x1ac   :  { %v274_v15 = vmul.f32 %v3876_v8, %v3868_v6  ;;  %v339_v16 = vmul.f32 %v3881_v9, %v3868_v6  ;;  %v455_v31 = vmul.f32 %v3893_v17, %v3868_v6 }
 0x1b0   :  { %v265_v2 = vpop.f32.mrf.mxu2 }
 0x1b1   :  { %v237_v4 = vpop.f32.mrf.mxu1  ;;  %v266_v13 = vadd.f32 %v3361_v7, %v265_v2  ;;  %v206_v18 = vpop.f32.mrf.mxu0 }
 0x1b2   :  { %v238_v5 = vadd.f32 %v3360_v63, %v237_v4  ;;  %v3905_v23 = vadd.f32 %v3358_v3, %v206_v18 }
 0x1b3   :  { %v392_v24 = vmul.f32 %v3881_v9, %v266_v13  ;;  %v334_v25 = vmul.f32 %v3876_v8, %v266_v13  ;;  %v508_v26 = vmul.f32 %v3893_v17, %v266_v13  ;;  %v597_v28 = vmul.f32 %v3903_v22, %v266_v13 }
 0x1b4   :  { %3114 = vmatpush.xpose.msk.msra.mxu3 %vm110_vm0, %v238_v5  ;;  %3118 = vmatpush.xpose.msk.msrb.mxu0 %vm110_vm0, %v238_v5  ;;  %v275_v29 = vmul.f32 %v3876_v8, %v3905_v23  ;;  %v340_v30 = vmul.f32 %v3881_v9, %v3905_v23  ;;  %v456_v32 = vmul.f32 %v3893_v17, %v3905_v23 }
 0x1b8   :  { %v268_v12 = vpop.f32.mrf.mxu2  ;;  %3115 = vmatpush.xpose.msk.msra.mxu3 %vm110_vm0, %v235_v11  ;;  %3119 = vmatpush.xpose.msk.msrb.mxu0 %vm110_vm0, %v235_v11 }
 0x1b9   :  { %v269_v14 = vadd.f32 %v3361_v7, %v268_v12 }
 0x1bb   :  { %3116 = vmatmul.msk.f32.vlgmr.msra.gmra.mxu3 %vm110_vm0, %v274_v15  ;;  %3120 = vmatmul.msk.f32.vlgmr.msrb.gmra.mxu0 %vm110_vm0, %v339_v16  ;;  %v393_v19 = vmul.f32 %v3881_v9, %v269_v14  ;;  %v335_v20 = vmul.f32 %v3876_v8, %v269_v14  ;;  %v509_v21 = vmul.f32 %v3893_v17, %v269_v14 }
 0x1bc   :  { %3126 = vmatpush.xpose.msk.msrb.mxu3 %vm110_vm0, %v238_v5  ;;  %v598_v27 = vmul.f32 %v3903_v22, %v269_v14 }
 0x1bd   :  { %414 = vmatpush.msrb.mxu1 %v393_v19  ;;  %443 = vmatpush.msrb.mxu2 %v335_v20 }
 0x1be   :  { %530 = vmatpush.msra.mxu0 %v509_v21  ;;  %v544_v21 = vmul.f32 %v3903_v22, %v3868_v6 }
 0x1bf   :  { %415 = vmatpush.msrb.mxu1 %v392_v24  ;;  %444 = vmatpush.msrb.mxu2 %v334_v25 }
 0x1c0   :  { %3127 = vmatpush.xpose.msk.msrb.mxu3 %vm110_vm0, %v235_v11  ;;  %531 = vmatpush.msra.mxu0 %v508_v26 }
 0x1c1   :  { %3132 = vmatpush.xpose.msk.msra.mxu1 %vm110_vm0, %v238_v5  ;;  %619 = vmatpush.msra.mxu2 %v598_v27 }
 0x1c3   :  { %620 = vmatpush.msra.mxu2 %v597_v28  ;;  %3117 = vmatmul.msk.f32.gmra.mxu3 %vm110_vm0, %v275_v29  ;;  %v545_v28 = vmul.f32 %v3903_v22, %v3905_v23 }
 0x1c4   :  { %3121 = vmatmul.msk.f32.gmra.mxu0 %vm110_vm0, %v340_v30 }
 0x1c5   :  { %3133 = vmatpush.xpose.msk.msra.mxu1 %vm110_vm0, %v235_v11 }
 0x1cb   :  { %3128 = vmatmul.msk.f32.vlgmr.msrb.gmra.mxu3 %vm110_vm0, %v455_v31 }
 0x1d3   :  { %3129 = vmatmul.msk.f32.gmra.mxu3 %vm110_vm0, %v456_v32 }
 0x238   :  { %v364_v34 = vpop.f32.mrf.mxu0 }
 0x239   :  { %v365_v35 = vadd.f32 %v364_v34, %v3930_v33 }
 0x23b   :  { %v370_v36 = vsel %vm311_vm8, %v365_v35, -inf }
 0x23c   :  { %371 = vmax.xlane.f32.xlu2 %v370_v36 }
 0x23e   :  { %v305_v37 = vpop.f32.mrf.mxu3 }
 0x23f   :  { %v306_v43 = vadd.f32 %v305_v37, %v3930_v33 }
 0x241   :  { %v367_v39 = vpop.f32.mrf.mxu0  ;;  %v312_v44 = vsel %vm311_vm8, %v306_v43, -inf }
 0x242   :  { %v368_v40 = vadd.f32 %v367_v39, %v3937_v38 }
 0x244   :  { %v373_v41 = vsel %vm311_vm8, %v368_v40, -inf }
 0x245   :  { %374 = vmax.xlane.f32.xlu2 %v373_v41 }
 0x246   :  { %v308_v42 = vpop.f32.mrf.mxu3 }
 0x247   :  { %v309_v56 = vadd.f32 %v308_v42, %v3937_v38 }
 0x249   :  { %v315_v61 = vsel %vm311_vm8, %v309_v56, -inf }
 0x24d   :  { %313 = vmax.xlane.f32.xlu2 %v312_v44 }
 0x24e   :  { %v480_v45 = vpop.f32.mrf.mxu3 }
 0x24f   :  { %v481_v46 = vadd.f32 %v480_v45, %v3930_v33 }
 0x251   :  { %v486_v47 = vsel %vm311_vm8, %v481_v46, -inf }
 0x255   :  { %487 = vmax.xlane.f32.xlu2 %v486_v47 }
 0x256   :  { %v483_v36 = vpop.f32.mrf.mxu3 }
 0x257   :  { %v484_v23 = vadd.f32 %v483_v36, %v3937_v38 }
 0x259   :  { %v489_v41 = vsel %vm311_vm8, %v484_v23, -inf }
 0x2af   :  { %v372_v48 = vpop.xlane.xlu2 %371 }
 0x2b0   :  { %v376_v49 = vsub.f32 %v365_v35, %v372_v48 }
 0x2b2   :  { %v378_v50 = vmul.f32 1.442695, %v376_v49 }
 0x2b4   :  { %3395 = vpow2.f32 %v378_v50 }
 0x2b8   :  { %v375_v51 = vpop.xlane.xlu2 %374 }
 0x2b9   :  { %v377_v52 = vsub.f32 %v368_v40, %v375_v51 }
 0x2ba   :  { %v3396_v53 = vpop.eup %3395 }
 0x2bb   :  { %v380_v54 = vmul.f32 1.442695, %v377_v52  ;;  %v382_v55 = vsel %vm311_vm8, %v3396_v53, 0.0 }
 0x2bc   :  { %383 = vadd.xlane.f32.xlu0 %v382_v55 }
 0x2bd   :  { %3397 = vpow2.f32 %v380_v54 }
 0x2c0   :  { %v314_v57 = vpop.xlane.xlu2 %313 }
 0x2c1   :  { %v318_v58 = vsub.f32 %v306_v43, %v314_v57 }
 0x2c3   :  { %v3398_v59 = vpop.eup %3397  ;;  %v320_v60 = vmul.f32 1.442695, %v318_v58 }
 0x2c4   :  { %v385_v62 = vsel %vm311_vm8, %v3398_v59, 0.0  ;;  %316 = vmax.xlane.f32.xlu0 %v315_v61 }
 0x2c5   :  { %3399 = vpow2.f32 %v320_v60  ;;  %386 = vadd.xlane.f32.xlu1 %v385_v62 }
 0x2c8   :  { %v488_v63 = vpop.xlane.xlu2 %487 }
 0x2c9   :  { %v492_v2 = vsub.f32 %v481_v46, %v488_v63  ;;  %v633_v63 = vld [vmem:[%s4815_s13 + $0x18] sm:$0xff] }
 0x2ca   :  { %656 = vmatpush.msra.mxu3 %v633_v63 }
 0x2cb   :  { %v3400_v3 = vpop.eup %3399  ;;  %v494_v4 = vmul.f32 1.442695, %v492_v2  ;;  %v632_v2 = vld [vmem:[%s4815_s13 + $0x10] sm:$0xff] }
 0x2cc   :  { %v324_v5 = vsel %vm311_vm8, %v3400_v3, 0.0  ;;  %657 = vmatpush.msra.mxu3 %v632_v2 }
 0x2cd   :  { %3401 = vpow2.f32 %v494_v4  ;;  %325 = vadd.xlane.f32.xlu2 %v324_v5 }
 0x2d3   :  { %v3402_v7 = vpop.eup %3401 }
 0x2d4   :  { %v498_v11 = vsel %vm311_vm8, %v3402_v7, 0.0 }
 0x2d5   :  { %499 = vadd.xlane.f32.xlu2 %v498_v11 }
 0x32f   :  { %v384_v12 = vpop.xlane.xlu0 %383 }
 0x330   :  { %3403 = vrcp.f32 %v384_v12 }
 0x336   :  { %v3404_v13 = vpop.eup %3403 }
 0x337   :  { %v390_v14 = vmul.f32 %v3404_v13, %v3396_v53  ;;  %v317_v6 = vpop.xlane.xlu0 %316 }
 0x338   :  { %v387_v15 = vpop.xlane.xlu1 %386  ;;  %v319_v34 = vsub.f32 %v309_v56, %v317_v6 }
 0x339   :  { %3405 = vrcp.f32 %v387_v15  ;;  %3122 = vmatmul.msk.f32.vlgmr.msrb.gmra.mxu1 %vm311_vm8, %v390_v14 }
 0x33a   :  { %v322_v37 = vmul.f32 1.442695, %v319_v34 }
 0x33f   :  { %v3406_v16 = vpop.eup %3405 }
 0x340   :  { %v326_v18 = vpop.xlane.xlu2 %325  ;;  %v391_v19 = vmul.f32 %v3406_v16, %v3398_v59  ;;  %v631_v16 = vld [vmem:[%s4815_s13 + $0x8] sm:$0xff] }
 0x341   :  { %3407 = vrcp.f32 %v326_v18  ;;  %658 = vmatpush.msra.mxu3 %v631_v16  ;;  %v630_v18 = vld [vmem:[%s4815_s13] sm:$0xff] }
 0x342   :  { %3123 = vmatmul.msk.f32.gmra.mxu1 %vm311_vm8, %v391_v19 }
 0x343   :  { %659 = vmatpush.msra.mxu3 %v630_v18  ;;  %v775_v18 = vld [vmem:[%s4821_s19 + $0x38] sm:$0xff] }
 0x347   :  { %v3408_v20 = vpop.eup %3407 }
 0x348   :  { %v500_v24 = vpop.xlane.xlu2 %499  ;;  %v332_v25 = vmul.f32 %v3408_v20, %v3400_v3 }
 0x349   :  { %3409 = vrcp.f32 %v500_v24 }
 0x34a   :  { %3124 = vmatmul.msk.f32.vlgmr.msrb.gmra.mxu2 %vm311_vm8, %v332_v25  ;;  %3134 = vmatmul.msk.f32.vlgmr.msra.gmra.mxu1 %vm110_vm0, %v544_v21  ;;  %3411 = vpow2.f32 %v322_v37 }
 0x34f   :  { %v3410_v26 = vpop.eup %3409 }
 0x350   :  { %v506_v27 = vmul.f32 %v3410_v26, %v3402_v7  ;;  %v3412_v43 = vpop.eup %3411 }
 0x351   :  { %v327_v44 = vsel %vm311_vm8, %v3412_v43, 0.0 }
 0x352   :  { %3130 = vmatmul.msk.f32.vlgmr.msra.gmra.mxu0 %vm311_vm8, %v506_v27  ;;  %3135 = vmatmul.msk.f32.gmra.mxu1 %vm110_vm0, %v545_v28 }
 0x3b6   :  { %v3961_v29 = vpop.f32.mrf.mxu1 }
 0x3bf   :  { %v3963_v30 = vpop.f32.mrf.mxu1 }
 0x3c7   :  { %v569_v31 = vpop.f32.mrf.mxu1 }
 0x3c8   :  { %v570_v32 = vadd.f32 %v569_v31, %v3930_v33 }
 0x3ca   :  { %v575_v35 = vsel %vm311_vm8, %v570_v32, -inf }
 0x3cb   :  { %576 = vmax.xlane.f32.xlu1 %v575_v35  ;;  %v3365_v35 = vld [vmem:[%s4816_s14] ss:$0 sm:$0xff] }
 0x3cd   :  { %v446_v19 = vpop.f32.mrf.mxu2 }
 0x3ce   :  { %v447_v21 = vadd.f32 %v446_v19, %v3961_v29  ;;  %v3366_v19 = vld [vmem:[%s4817_s15] ss:$0 sm:$0xff] }
 0x3cf   :  { %v572_v39 = vpop.f32.mrf.mxu1  ;;  %v533_v24 = vpop.f32.mrf.mxu0 }
 0x3d0   :  { %v573_v40 = vadd.f32 %v572_v39, %v3937_v38  ;;  %v539_v25 = vadd.f32 %v533_v24, %v447_v21  ;;  %v774_v24 = vld [vmem:[%s4821_s19 + $0x30] sm:$0xff] }
 0x3d2   :  { %v578_v42 = vsel %vm311_vm8, %v573_v40, -inf }
 0x3d3   :  { %490 = vmax.xlane.f32.xlu1 %v489_v41  ;;  %579 = vmax.xlane.f32.xlu0 %v578_v42 }
 0x3db   :  { %328 = vadd.xlane.f32.xlu0 %v327_v44 }
 0x43e   :  { %v577_v45 = vpop.xlane.xlu1 %576 }
 0x43f   :  { %v581_v46 = vsub.f32 %v570_v32, %v577_v45 }
 0x441   :  { %v583_v47 = vmul.f32 1.442695, %v581_v46 }
 0x443   :  { %3413 = vpow2.f32 %v583_v47 }
 0x446   :  { %v491_v48 = vpop.xlane.xlu1 %490  ;;  %v580_v49 = vpop.xlane.xlu0 %579 }
 0x447   :  { %v493_v50 = vsub.f32 %v484_v23, %v491_v48  ;;  %v582_v51 = vsub.f32 %v573_v40, %v580_v49 }
 0x449   :  { %v3414_v52 = vpop.eup %3413  ;;  %v496_v53 = vmul.f32 1.442695, %v493_v50  ;;  %v585_v54 = vmul.f32 1.442695, %v582_v51  ;;  %v728_v50 = vld [vmem:[%s4819_s17 + $0x18] sm:$0xff]  ;;  %v727_v51 = vld [vmem:[%s4819_s17 + $0x10] sm:$0xff] }
 0x44a   :  { %v587_v55 = vsel %vm311_vm8, %v3414_v52, 0.0  ;;  %751 = vmatpush.msrb.mxu0 %v728_v50  ;;  %v3369_v50 = vld [vmem:[%s4822_s20] ss:$0 sm:$0xff] }
 0x44b   :  { %3415 = vpow2.f32 %v496_v53  ;;  %588 = vadd.xlane.f32.xlu1 %v587_v55  ;;  %v725_v53 = vld [vmem:[%s4819_s17] sm:$0xff] }
 0x44c   :  { %3417 = vpow2.f32 %v585_v54  ;;  %752 = vmatpush.msrb.mxu0 %v727_v51 }
 0x44e   :  { %v329_v56 = vpop.xlane.xlu0 %328 }
 0x44f   :  { %3419 = vrcp.f32 %v329_v56 }
 0x451   :  { %v3416_v57 = vpop.eup %3415 }
 0x452   :  { %v3418_v58 = vpop.eup %3417  ;;  %v501_v59 = vsel %vm311_vm8, %v3416_v57, 0.0 }
 0x453   :  { %502 = vadd.xlane.f32.xlu1 %v501_v59  ;;  %v590_v60 = vsel %vm311_vm8, %v3418_v58, 0.0  ;;  %v781_v59 = vld [vmem:[%s4821_s19 + $0x68] sm:$0xff] }
 0x454   :  { %591 = vadd.xlane.f32.xlu0 %v590_v60 }
 0x455   :  { %v3420_v61 = vpop.eup %3419 }
 0x456   :  { %v333_v62 = vmul.f32 %v3420_v61, %v3412_v43 }
 0x458   :  { %3125 = vmatmul.msk.f32.gmra.mxu2 %vm311_vm8, %v333_v62  ;;  %v780_v62 = vld [vmem:[%s4821_s19 + $0x60] sm:$0xff] }
 0x4be   :  { %v589_v3 = vpop.xlane.xlu1 %588 }
 0x4bf   :  { %3421 = vrcp.f32 %v589_v3 }
 0x4c5   :  { %v3422_v4 = vpop.eup %3421 }
 0x4c6   :  { %v595_v5 = vmul.f32 %v3422_v4, %v3414_v52  ;;  %v503_v7 = vpop.xlane.xlu1 %502  ;;  %v726_v52 = vld [vmem:[%s4819_s17 + $0x8] sm:$0xff]  ;;  %v779_v4 = vld [vmem:[%s4821_s19 + $0x58] sm:$0xff] }
 0x4c7   :  { %3423 = vrcp.f32 %v503_v7  ;;  %v592_v11 = vpop.xlane.xlu0 %591  ;;  %753 = vmatpush.msrb.mxu0 %v726_v52  ;;  %v778_v7 = vld [vmem:[%s4821_s19 + $0x50] sm:$0xff] }
 0x4c8   :  { %3425 = vrcp.f32 %v592_v11  ;;  %3136 = vmatmul.msk.f32.vlgmr.msra.gmra.mxu2 %vm311_vm8, %v595_v5 }
 0x4c9   :  { %754 = vmatpush.msrb.mxu0 %v725_v53 }
 0x4cd   :  { %v3424_v12 = vpop.eup %3423 }
 0x4ce   :  { %v3426_v13 = vpop.eup %3425  ;;  %v507_v14 = vmul.f32 %v3424_v12, %v3416_v57  ;;  %v783_v57 = vld [vmem:[%s4821_s19 + $0x78] sm:$0xff]  ;;  %v777_v12 = vld [vmem:[%s4821_s19 + $0x48] sm:$0xff] }
 0x4cf   :  { %v596_v15 = vmul.f32 %v3426_v13, %v3418_v58  ;;  %v782_v58 = vld [vmem:[%s4821_s19 + $0x70] sm:$0xff]  ;;  %788 = vmatpush.msrb.mxu1 %v783_v57 }
 0x4d0   :  { %3131 = vmatmul.msk.f32.gmra.mxu0 %vm311_vm8, %v507_v14  ;;  %v776_v14 = vld [vmem:[%s4821_s19 + $0x40] sm:$0xff] }
 0x4d1   :  { %3137 = vmatmul.msk.f32.gmra.mxu2 %vm311_vm8, %v596_v15  ;;  %789 = vmatpush.msrb.mxu1 %v782_v58 }
 0x4d3   :  { %790 = vmatpush.msrb.mxu1 %v781_v59 }
 0x4d5   :  { %791 = vmatpush.msrb.mxu1 %v780_v62 }
 0x4d7   :  { %792 = vmatpush.msrb.mxu1 %v779_v4 }
 0x4d9   :  { %793 = vmatpush.msrb.mxu1 %v778_v7 }
 0x4db   :  { %v449_v20 = vpop.f32.mrf.mxu2  ;;  %794 = vmatpush.msrb.mxu1 %v777_v12  ;;  %v3154_v12 = vld [vmem:[%s4854_s27 + $0x38] sm:$0xff] }
 0x4dc   :  { %v450_v6 = vadd.f32 %v449_v20, %v3963_v30  ;;  %932 = vmatpush.msrb.mxu3 %v3154_v12 }
 0x4dd   :  { %795 = vmatpush.msrb.mxu1 %v776_v14  ;;  %v3146_v14 = vld [vmem:[%s4853_s10 + $0x30] sm:$0xff] }
 0x4df   :  { %796 = vmatpush.msrb.mxu1 %v775_v18  ;;  %v3145_v18 = vld [vmem:[%s4853_s10 + $0x28] sm:$0xff] }
 0x4e1   :  { %797 = vmatpush.msrb.mxu1 %v774_v24  ;;  %v3151_v24 = vld [vmem:[%s4854_s27 + $0x20] sm:$0xff] }
 0x54b   :  { %v622_v26 = vpop.f32.mrf.mxu2 }
 0x54c   :  { %v628_v27 = vadd.f32 %v622_v26, %v539_v25 }
 0x54d   :  { %v536_v28 = vpop.f32.mrf.mxu0 }
 0x54e   :  { %3138 = vmatmul.msk.f32.vlgmr.msra.gmra.mxu3 %vm110_vm0, %v628_v27  ;;  %v540_v31 = vadd.f32 %v536_v28, %v450_v6  ;;  %v3367_v27 = vld [vmem:[%s4818_s16] ss:$0 sm:$0xff]  ;;  %v773_v28 = vld [vmem:[%s4821_s19 + $0x28] sm:$0xff] }
 0x54f   :  { %798 = vmatpush.msrb.mxu1 %v773_v28 }
 0x554   :  { %v625_v32 = vpop.f32.mrf.mxu2 }
 0x555   :  { %v629_v34 = vadd.f32 %v625_v32, %v540_v31  ;;  %v772_v32 = vld [vmem:[%s4821_s19 + $0x20] sm:$0xff] }
 0x556   :  { %799 = vmatpush.msrb.mxu1 %v772_v32 }
 0x557   :  { %3139 = vmatmul.msk.f32.gmra.mxu3 %vm110_vm0, %v629_v34 }
 0x5d1   :  { %v661_v36 = vpop.f32.mrf.mxu3 }
 0x5d2   :  { %v662_v29 = vadd.f32 %v3365_v35, %v661_v36  ;;  %v771_v36 = vld [vmem:[%s4821_s19 + $0x18] sm:$0xff] }
 0x5d3   :  { %800 = vmatpush.msrb.mxu1 %v771_v36 }
 0x5d4   :  { %v667_v37 = vadd.f32 %v662_v29, %v3786_v0 }
 0x5d6   :  { %v671_v23 = vsel %vm110_vm0, %v667_v37, 0.0 }
 0x5d7   :  { %672 = vadd.xlane.f32.xlu2 %v671_v23 }
 0x5da   :  { %v664_v39 = vpop.f32.mrf.mxu3 }
 0x5db   :  { %v665_v40 = vadd.f32 %v3365_v35, %v664_v39 }
 0x5dd   :  { %v668_v30 = vadd.f32 %v665_v40, %v3791_v1 }
 0x5df   :  { %v674_v41 = vsel %vm110_vm0, %v668_v30, 0.0 }
 0x5e0   :  { %675 = vadd.xlane.f32.xlu0 %v674_v41  ;;  %v769_v41 = vld [vmem:[%s4821_s19 + $0x8] sm:$0xff] }
 0x64a   :  { %v673_v42 = vpop.xlane.xlu2 %672 }
 0x64b   :  { %v677_v43 = vmul.f32 %v673_v42, %v3797_v10  ;;  %v768_v42 = vld [vmem:[%s4821_s19] sm:$0xff] }
 0x64d   :  { %v679_v44 = vsub.f32 %v667_v37, %v677_v43  ;;  %v3368_v43 = vld [vmem:[%s4820_s18] ss:$0 sm:$0xff] }
 0x64f   :  { %v681_v45 = vmul.f32 %v679_v44, %v679_v44 }
 0x651   :  { %v683_v46 = vsel %vm110_vm0, %v681_v45, 0.0 }
 0x652   :  { %684 = vadd.xlane.f32.xlu1 %v683_v46 }
 0x653   :  { %v676_v47 = vpop.xlane.xlu0 %675 }
 0x654   :  { %v678_v0 = vmul.f32 %v676_v47, %v3797_v10 }
 0x656   :  { %v4005_v48 = vsub.f32 %v668_v30, %v678_v0  ;;  %v770_v30 = vld [vmem:[%s4821_s19 + $0x10] sm:$0xff] }
 0x657   :  { %801 = vmatpush.msrb.mxu1 %v770_v30 }
 0x658   :  { %v682_v49 = vmul.f32 %v4005_v48, %v4005_v48 }
 0x659   :  { %802 = vmatpush.msrb.mxu1 %v769_v41 }
 0x65a   :  { %v686_v1 = vsel %vm110_vm0, %v682_v49, 0.0 }
 0x65b   :  { %687 = vadd.xlane.f32.xlu2 %v686_v1  ;;  %803 = vmatpush.msrb.mxu1 %v768_v42 }
 0x6c5   :  { %v685_v54 = vpop.xlane.xlu1 %684 }
 0x6c6   :  { %v689_v55 = vmul.f32 %v685_v54, %v3797_v10 }
 0x6c8   :  { %v691_v56 = vadd.f32 1e-05, %v689_v55 }
 0x6ca   :  { %3427 = vrsqrt.f32 %v691_v56  ;;  %vm699_vm10 = vweird.f32 %v691_v56 }
 0x6ce   :  { %v688_v60 = vpop.xlane.xlu2 %687 }
 0x6cf   :  { %v690_v61 = vmul.f32 %v688_v60, %v3797_v10 }
 0x6d0   :  { %v3428_v63 = vpop.eup %3427 }
 0x6d1   :  { %v694_v2 = vmul.f32 %v3428_v63, %v691_v56  ;;  %v692_v3 = vadd.f32 1e-05, %v690_v61  ;;  %vm700_vm9 = vweird.f32 %v3428_v63 }
 0x6d2   :  { %vm701_vm11 = vmor %vm699_vm10, %vm700_vm9 }
 0x6d3   :  { %v695_v5 = vmul.f32 %v3428_v63, %v694_v2  ;;  %3429 = vrsqrt.f32 %v692_v3  ;;  %vm709_vm13 = vweird.f32 %v692_v3 }
 0x6d5   :  { %v696_v11 = vmul.f32 0.5, %v695_v5 }
 0x6d7   :  { %v697_v13 = vsub.f32 1.5, %v696_v11  ;;  %v3147_v11 = vld [vmem:[%s4853_s10 + $0x38] sm:$0xff] }
 0x6d8   :  { %899 = vmatpush.msrb.mxu2 %v3147_v11 }
 0x6d9   :  { %v3430_v15 = vpop.eup %3429  ;;  %v698_v16 = vmul.f32 %v3428_v63, %v697_v13  ;;  %v3161_v13 = vld [vmem:[%s4813_s11 + $0x38] sm:$0xff] }
 0x6da   :  { %v704_v20 = vmul.f32 %v3430_v15, %v692_v3  ;;  %vm710_vm12 = vweird.f32 %v3430_v15  ;;  %965 = vmatpush.msra.mxu0 %v3161_v13  ;;  %900 = vmatpush.msrb.mxu2 %v3146_v14 }
 0x6db   :  { %v702_v21 = vsel %vm701_vm11, %v3428_v63, %v698_v16  ;;  %vm711_vm14 = vmor %vm709_vm13, %vm710_vm12  ;;  %v3160_v16 = vld [vmem:[%s4813_s11 + $0x30] sm:$0xff] }
 0x6dc   :  { %v713_v25 = vmul.f32 %v702_v21, %v679_v44  ;;  %v705_v26 = vmul.f32 %v3430_v15, %v704_v20  ;;  %966 = vmatpush.msra.mxu0 %v3160_v16  ;;  %v3159_v20 = vld [vmem:[%s4813_s11 + $0x28] sm:$0xff]  ;;  %901 = vmatpush.msrb.mxu2 %v3145_v18  ;;  %v3144_v21 = vld [vmem:[%s4853_s10 + $0x20] sm:$0xff]  ;;  %s3346_s10 = sld [smem:[#allocation3 + $0x1]] }
 0x6de   :  { %v718_v6 = vmul.f32 %v3366_v19, %v713_v25  ;;  %v706_v31 = vmul.f32 0.5, %v705_v26  ;;  %967 = vmatpush.msra.mxu0 %v3159_v20  ;;  %v3158_v25 = vld [vmem:[%s4813_s11 + $0x20] sm:$0xff]  ;;  %902 = vmatpush.msrb.mxu2 %v3144_v21 }
 0x6e0   :  { %v707_v34 = vsub.f32 1.5, %v706_v31  ;;  %v723_v35 = vadd.f32 %v3367_v27, %v718_v6  ;;  %968 = vmatpush.msra.mxu0 %v3158_v25 }
 0x6e2   :  { %v708_v29 = vmul.f32 %v3430_v15, %v707_v34  ;;  %3140 = vmatmul.msk.f32.vlgmr.msrb.gmra.mxu0 %vm110_vm0, %v723_v35  ;;  %s3347_s7 = sshll.u32 %s3346_s10, 1 }
 0x6e4   :  { %v712_v37 = vsel %vm711_vm14, %v3430_v15, %v708_v29  ;;  %v3153_v15 = vld [vmem:[%s4854_s27 + $0x30] sm:$0xff] }
 0x6e5   :  { %v714_v23 = vmul.f32 %v712_v37, %v4005_v48  ;;  %933 = vmatpush.msrb.mxu3 %v3153_v15 }
 0x6e7   :  { %v719_v39 = vmul.f32 %v3366_v19, %v714_v23  ;;  %v3152_v19 = vld [vmem:[%s4854_s27 + $0x28] sm:$0xff] }
 0x6e8   :  { %934 = vmatpush.msrb.mxu3 %v3152_v19 }
 0x6e9   :  { %v724_v40 = vadd.f32 %v3367_v27, %v719_v39 }
 0x6ea   :  { %935 = vmatpush.msrb.mxu3 %v3151_v24 }
 0x6eb   :  { %3141 = vmatmul.msk.f32.gmra.mxu0 %vm110_vm0, %v724_v40 }
 0x75f   :  { %v756_v44 = vpop.f32.mrf.mxu0 }
 0x760   :  { %v757_v45 = vadd.f32 %v3368_v43, %v756_v44  ;;  %v3371_v44 = vld [vmem:[%s4856_s1 + $0x1] ss:$0 sm:$0xff] }
 0x762   :  { %vm762_vm15 = vcmp.ge.f32.partialorder %v757_v45, 0.0  ;;  %v764_v46 = vmul.f32 0.01, %v757_v45 }
 0x764   :  { %v766_v47 = vsel %vm762_vm15, %v757_v45, %v764_v46 }
 0x765   :  { %804 = vmatmul.f32.vlgmr.msrb.gmra.mxu1 %v766_v47 }
 0x768   :  { %v759_v0 = vpop.f32.mrf.mxu0 }
 0x769   :  { %v760_v48 = vadd.f32 %v3368_v43, %v759_v0 }
 0x76b   :  { %vm763_vm1 = vcmp.ge.f32.partialorder %v760_v48, 0.0  ;;  %v765_v49 = vmul.f32 0.01, %v760_v48 }
 0x76d   :  { %v767_v1 = vsel %vm763_vm1, %v760_v48, %v765_v49 }
 0x76e   :  { %807 = vmatmul.f32.gmra.mxu1 %v767_v1 }
 0x7e2   :  { %v805_v51 = vpop.f32.mrf.mxu1 }
 0x7e3   :  { %v806_v52 = vadd.f32 %v3369_v50, %v805_v51 }
 0x7e5   :  { %v4087_v53 = vadd.f32 %v806_v52, %v723_v35 }
 0x7e7   :  { %v817_v54 = vsel %vm110_vm0, %v4087_v53, 0.0 }
 0x7e8   :  { %818 = vadd.xlane.f32.xlu0 %v817_v54 }
 0x7eb   :  { %v808_v55 = vpop.f32.mrf.mxu1 }
 0x7ec   :  { %v809_v56 = vadd.f32 %v3369_v50, %v808_v55  ;;  %v3372_v55 = vld [vmem:[%s4814_s12 + $0x1] ss:$0 sm:$0xff] }
 0x7ee   :  { %v4091_v57 = vadd.f32 %v809_v56, %v724_v40  ;;  %v3370_v40 = vld [vmem:[%s4855_s2 + $0x1] ss:$0 sm:$0xff]  ;;  %s3103_s2 = scalar_lea.vmem [#allocation2], %s3347_s7 }
 0x7f0   :  { %v820_v58 = vsel %vm110_vm0, %v4091_v57, 0.0 }
 0x7f1   :  { %821 = vadd.xlane.f32.xlu1 %v820_v58 }
 0x85b   :  { %v819_v59 = vpop.xlane.xlu0 %818 }
 0x85c   :  { %v823_v60 = vmul.f32 %v819_v59, %v3797_v10 }
 0x85e   :  { %v825_v61 = vsub.f32 %v4087_v53, %v823_v60 }
 0x860   :  { %v827_v62 = vmul.f32 %v825_v61, %v825_v61 }
 0x862   :  { %v829_v63 = vsel %vm110_vm0, %v827_v62, 0.0 }
 0x863   :  { %830 = vadd.xlane.f32.xlu2 %v829_v63  ;;  %v3374_v63 = vld [vmem:[%s4857_s28 + $0x1] ss:$0 sm:$0xff] }
 0x864   :  { %v822_v2 = vpop.xlane.xlu1 %821 }
 0x865   :  { %v824_v3 = vmul.f32 %v822_v2, %v3797_v10  ;;  %v3373_v2 = vld [vmem:[%s4858_s29 + $0x1] ss:$0 sm:$0xff]  ;;  %s3642_s29 = smov 64  }
 0x867   :  { %v4100_v4 = vsub.f32 %v4091_v57, %v824_v3 }
 0x869   :  { %v828_v5 = vmul.f32 %v4100_v4, %v4100_v4 }
 0x86b   :  { %v832_v7 = vsel %vm110_vm0, %v828_v5, 0.0 }
 0x86c   :  { %833 = vadd.xlane.f32.xlu0 %v832_v7 }
 0x8d6   :  { %v831_v26 = vpop.xlane.xlu2 %830 }
 0x8d7   :  { %v835_v27 = vmul.f32 %v831_v26, %v3797_v10 }
 0x8d9   :  { %v837_v28 = vadd.f32 1e-05, %v835_v27 }
 0x8db   :  { %3431 = vrsqrt.f32 %v837_v28  ;;  %vm845_vm3 = vweird.f32 %v837_v28 }
 0x8df   :  { %v834_v6 = vpop.xlane.xlu0 %833 }
 0x8e0   :  { %v836_v31 = vmul.f32 %v834_v6, %v3797_v10 }
 0x8e1   :  { %v3432_v32 = vpop.eup %3431 }
 0x8e2   :  { %v840_v34 = vmul.f32 %v3432_v32, %v837_v28  ;;  %v838_v35 = vadd.f32 1e-05, %v836_v31  ;;  %vm846_vm2 = vweird.f32 %v3432_v32 }
 0x8e3   :  { %vm847_vm4 = vmor %vm845_vm3, %vm846_vm2 }
 0x8e4   :  { %v841_v36 = vmul.f32 %v3432_v32, %v840_v34  ;;  %3433 = vrsqrt.f32 %v838_v35  ;;  %vm855_vm6 = vweird.f32 %v838_v35 }
 0x8e6   :  { %v842_v29 = vmul.f32 0.5, %v841_v36 }
 0x8e8   :  { %v843_v37 = vsub.f32 1.5, %v842_v29 }
 0x8ea   :  { %v3434_v23 = vpop.eup %3433  ;;  %v844_v39 = vmul.f32 %v3432_v32, %v843_v37 }
 0x8eb   :  { %v850_v30 = vmul.f32 %v3434_v23, %v838_v35  ;;  %vm856_vm5 = vweird.f32 %v3434_v23 }
 0x8ec   :  { %v848_v41 = vsel %vm847_vm4, %v3432_v32, %v844_v39  ;;  %vm857_vm7 = vmor %vm855_vm6, %vm856_vm5 }
 0x8ed   :  { %v859_v42 = vmul.f32 %v848_v41, %v825_v61  ;;  %v851_v43 = vmul.f32 %v3434_v23, %v850_v30 }
 0x8ef   :  { %v864_v45 = vmul.f32 %v3370_v40, %v859_v42  ;;  %v852_v46 = vmul.f32 0.5, %v851_v43 }
 0x8f1   :  { %v853_v47 = vsub.f32 1.5, %v852_v46  ;;  %v869_v0 = vadd.f32 %v3371_v44, %v864_v45 }
 0x8f3   :  { %v854_v48 = vmul.f32 %v3434_v23, %v853_v47  ;;  %3149 = vmatmul.msk.f32.vlgmr.msrb.gmra.mxu2 %vm110_vm0, %v869_v0  ;;  %3156 = vmatmul.msk.f32.vlgmr.msrb.gmra.mxu3 %vm110_vm0, %v869_v0 }
 0x8f4   :  { %3163 = vmatmul.msk.f32.vlgmr.msra.gmra.mxu0 %vm110_vm0, %v869_v0 }
 0x8f5   :  { %v858_v49 = vsel %vm857_vm7, %v3434_v23, %v854_v48 }
 0x8f6   :  { %v860_v1 = vmul.f32 %v858_v49, %v4100_v4 }
 0x8f8   :  { %v865_v50 = vmul.f32 %v3370_v40, %v860_v1 }
 0x8fa   :  { %v870_v51 = vadd.f32 %v3371_v44, %v865_v50 }
 0x8fc   :  { %3150 = vmatmul.msk.f32.gmra.mxu2 %vm110_vm0, %v870_v51  ;;  %3157 = vmatmul.msk.f32.gmra.mxu3 %vm110_vm0, %v870_v51 }
 0x8fd   :  { %3164 = vmatmul.msk.f32.gmra.mxu0 %vm110_vm0, %v870_v51 }
 0x971   :  { %v970_v52 = vpop.f32.mrf.mxu0 }
 0x972   :  { %v971_v58 = vadd.f32 %v3372_v55, %v970_v52 }
 0x974   :  { %v1090_v4 = vmul.f32 %v3881_v9, %v971_v58  ;;  %v1035_v5 = vmul.f32 %v3876_v8, %v971_v58  ;;  %v1289_v12 = vmul.f32 %v3903_v22, %v971_v58  ;;  %v1203_v20 = vmul.f32 %v3893_v17, %v971_v58 }
 0x976   :  { %v937_v54 = vpop.f32.mrf.mxu3  ;;  %v904_v62 = vpop.f32.mrf.mxu2 }
 0x977   :  { %v4172_v13 = vadd.f32 %v3373_v2, %v904_v62  ;;  %v938_v14 = vadd.f32 %v3374_v63, %v937_v54 }
 0x979   :  { %v976_v16 = vmul.f32 %v3876_v8, %v4172_v13  ;;  %v1037_v18 = vmul.f32 %v3881_v9, %v4172_v13  ;;  %v1150_v26 = vmul.f32 %v3893_v17, %v4172_v13 }
 0x97a   :  { %v973_v56 = vpop.f32.mrf.mxu0 }
 0x97b   :  { %v974_v59 = vadd.f32 %v3372_v55, %v973_v56 }
 0x97d   :  { %v1091_v60 = vmul.f32 %v3881_v9, %v974_v59  ;;  %v1036_v61 = vmul.f32 %v3876_v8, %v974_v59  ;;  %v1290_v11 = vmul.f32 %v3903_v22, %v974_v59  ;;  %v1204_v15 = vmul.f32 %v3893_v17, %v974_v59 }
 0x97f   :  { %1112 = vmatpush.msrb.mxu0 %v1091_v60  ;;  %1141 = vmatpush.msra.mxu1 %v1036_v61  ;;  %v940_v3 = vpop.f32.mrf.mxu3  ;;  %v907_v19 = vpop.f32.mrf.mxu2 }
 0x980   :  { %v941_v7 = vadd.f32 %v3374_v63, %v940_v3  ;;  %v4188_v21 = vadd.f32 %v3373_v2, %v907_v19 }
 0x981   :  { %1113 = vmatpush.msrb.mxu0 %v1090_v4  ;;  %1142 = vmatpush.msra.mxu1 %v1035_v5 }
 0x982   :  { %3165 = vmatpush.xpose.msk.msra.mxu2 %vm110_vm0, %v941_v7  ;;  %3169 = vmatpush.xpose.msk.msra.mxu3 %vm110_vm0, %v941_v7  ;;  %v977_v24 = vmul.f32 %v3876_v8, %v4188_v21  ;;  %v1038_v25 = vmul.f32 %v3881_v9, %v4188_v21  ;;  %v1151_v27 = vmul.f32 %v3893_v17, %v4188_v21 }
 0x983   :  { %1311 = vmatpush.msrb.mxu1 %v1290_v11  ;;  %3183 = vmatpush.xpose.msk.msra.mxu0 %vm110_vm0, %v941_v7 }
 0x985   :  { %1312 = vmatpush.msrb.mxu1 %v1289_v12 }
 0x986   :  { %3166 = vmatpush.xpose.msk.msra.mxu2 %vm110_vm0, %v938_v14  ;;  %3170 = vmatpush.xpose.msk.msra.mxu3 %vm110_vm0, %v938_v14 }
 0x987   :  { %3184 = vmatpush.xpose.msk.msra.mxu0 %vm110_vm0, %v938_v14 }
 0x989   :  { %3167 = vmatmul.msk.f32.vlgmr.msra.gmra.mxu2 %vm110_vm0, %v976_v16  ;;  %3171 = vmatmul.msk.f32.vlgmr.msra.gmra.mxu3 %vm110_vm0, %v1037_v18  ;;  %v1237_v16 = vmul.f32 %v3903_v22, %v4188_v21 }
 0x98a   :  { %3177 = vmatpush.xpose.msk.msrb.mxu2 %vm110_vm0, %v941_v7  ;;  %1225 = vmatpush.msrb.mxu3 %v1204_v15 }
 0x98c   :  { %1226 = vmatpush.msrb.mxu3 %v1203_v20 }
 0x98e   :  { %3178 = vmatpush.xpose.msk.msrb.mxu2 %vm110_vm0, %v938_v14  ;;  %v1236_v14 = vmul.f32 %v3903_v22, %v4172_v13 }
 0x991   :  { %3168 = vmatmul.msk.f32.gmra.mxu2 %vm110_vm0, %v977_v24  ;;  %3172 = vmatmul.msk.f32.gmra.mxu3 %vm110_vm0, %v1038_v25 }
 0x999   :  { %3179 = vmatmul.msk.f32.vlgmr.msrb.gmra.mxu2 %vm110_vm0, %v1150_v26 }
 0x9a1   :  { %3180 = vmatmul.msk.f32.gmra.mxu2 %vm110_vm0, %v1151_v27 }
 0xa0c   :  { %v1007_v28 = vpop.f32.mrf.mxu2  ;;  %v1062_v6 = vpop.f32.mrf.mxu3 }
 0xa0d   :  { %v1063_v8 = vadd.f32 %v1062_v6, %v3930_v33  ;;  %v1008_v36 = vadd.f32 %v1007_v28, %v3930_v33 }
 0xa0f   :  { %v1068_v9 = vsel %vm311_vm8, %v1063_v8, -inf  ;;  %v1013_v17 = vsel %vm311_vm8, %v1008_v36, -inf }
 0xa10   :  { %1069 = vmax.xlane.f32.xlu1 %v1068_v9 }
 0xa14   :  { %v1010_v31 = vpop.f32.mrf.mxu2  ;;  %v1065_v32 = vpop.f32.mrf.mxu3 }
 0xa15   :  { %v1066_v34 = vadd.f32 %v1065_v32, %v3937_v38  ;;  %v1011_v47 = vadd.f32 %v1010_v31, %v3937_v38 }
 0xa17   :  { %v1071_v35 = vsel %vm311_vm8, %v1066_v34, -inf  ;;  %v1016_v51 = vsel %vm311_vm8, %v1011_v47, -inf }
 0xa18   :  { %1072 = vmax.xlane.f32.xlu2 %v1071_v35 }
 0xa1c   :  { %v1175_v29 = vpop.f32.mrf.mxu2 }
 0xa1d   :  { %v1176_v52 = vadd.f32 %v1175_v29, %v3930_v33 }
 0xa1f   :  { %v1181_v60 = vsel %vm311_vm8, %v1176_v52, -inf }
 0xa20   :  { %1014 = vmax.xlane.f32.xlu2 %v1013_v17 }
 0xa24   :  { %v1178_v37 = vpop.f32.mrf.mxu2 }
 0xa25   :  { %v1179_v23 = vadd.f32 %v1178_v37, %v3937_v38 }
 0xa27   :  { %v1184_v39 = vsel %vm311_vm8, %v1179_v23, -inf }
 0xa28   :  { %1185 = vmax.xlane.f32.xlu2 %v1184_v39 }
 0xa83   :  { %v1070_v40 = vpop.xlane.xlu1 %1069 }
 0xa84   :  { %v1074_v30 = vsub.f32 %v1063_v8, %v1070_v40 }
 0xa86   :  { %v1076_v41 = vmul.f32 1.442695, %v1074_v30 }
 0xa88   :  { %3435 = vpow2.f32 %v1076_v41 }
 0xa8b   :  { %v1073_v42 = vpop.xlane.xlu2 %1072 }
 0xa8c   :  { %v1075_v43 = vsub.f32 %v1066_v34, %v1073_v42 }
 0xa8e   :  { %v3436_v44 = vpop.eup %3435  ;;  %v1078_v45 = vmul.f32 1.442695, %v1075_v43 }
 0xa8f   :  { %v1080_v46 = vsel %vm311_vm8, %v3436_v44, 0.0 }
 0xa90   :  { %3437 = vpow2.f32 %v1078_v45  ;;  %1081 = vadd.xlane.f32.xlu0 %v1080_v46 }
 0xa93   :  { %v1015_v0 = vpop.xlane.xlu2 %1014 }
 0xa94   :  { %v1019_v48 = vsub.f32 %v1008_v36, %v1015_v0 }
 0xa96   :  { %v3438_v49 = vpop.eup %3437  ;;  %v1021_v1 = vmul.f32 1.442695, %v1019_v48 }
 0xa97   :  { %v1083_v50 = vsel %vm311_vm8, %v3438_v49, 0.0 }
 0xa98   :  { %3439 = vpow2.f32 %v1021_v1  ;;  %1084 = vadd.xlane.f32.xlu1 %v1083_v50  ;;  %1017 = vmax.xlane.f32.xlu0 %v1016_v51  ;;  %v3192_v1 = vld [vmem:[%s4815_s13 + $0x38] sm:$0xff]  ;;  %v3191_v50 = vld [vmem:[%s4815_s13 + $0x30] sm:$0xff] }
 0xa99   :  { %1350 = vmatpush.msra.mxu2 %v3192_v1  ;;  %v3212_v1 = vld [vmem:[%s4821_s19 + $0xb8] sm:$0xff] }
 0xa9b   :  { %v1186_v54 = vpop.xlane.xlu2 %1185  ;;  %1351 = vmatpush.msra.mxu2 %v3191_v50 }
 0xa9c   :  { %v1188_v55 = vsub.f32 %v1179_v23, %v1186_v54 }
 0xa9e   :  { %v3440_v56 = vpop.eup %3439  ;;  %v1191_v58 = vmul.f32 1.442695, %v1188_v55 }
 0xa9f   :  { %v1025_v59 = vsel %vm311_vm8, %v3440_v56, 0.0 }
 0xaa0   :  { %3441 = vpow2.f32 %v1191_v58  ;;  %1026 = vadd.xlane.f32.xlu2 %v1025_v59  ;;  %1182 = vmax.xlane.f32.xlu1 %v1181_v60  ;;  %v3190_v58 = vld [vmem:[%s4815_s13 + $0x28] sm:$0xff]  ;;  %v3189_v59 = vld [vmem:[%s4815_s13 + $0x20] sm:$0xff] }
 0xaa1   :  { %1352 = vmatpush.msra.mxu2 %v3190_v58 }
 0xaa3   :  { %1353 = vmatpush.msra.mxu2 %v3189_v59  ;;  %v3377_v59 = vld [vmem:[%s4818_s16 + $0x1] ss:$0 sm:$0xff] }
 0xaa6   :  { %v4218_v61 = vpop.eup %3441 }
 0xaa7   :  { %v1196_v62 = vsel %vm311_vm8, %v4218_v61, 0.0 }
 0xaa8   :  { %1197 = vadd.xlane.f32.xlu2 %v1196_v62 }
 0xb03   :  { %v1082_v63 = vpop.xlane.xlu0 %1081 }
 0xb04   :  { %3443 = vrcp.f32 %v1082_v63 }
 0xb0a   :  { %v3444_v2 = vpop.eup %3443 }
 0xb0b   :  { %v1088_v3 = vmul.f32 %v3444_v2, %v3436_v44  ;;  %v1085_v4 = vpop.xlane.xlu1 %1084  ;;  %v1018_v19 = vpop.xlane.xlu0 %1017 }
 0xb0c   :  { %3445 = vrcp.f32 %v1085_v4  ;;  %v1020_v24 = vsub.f32 %v1011_v47, %v1018_v19 }
 0xb0d   :  { %3173 = vmatmul.msk.f32.vlgmr.msrb.gmra.mxu0 %vm311_vm8, %v1088_v3 }
 0xb0e   :  { %v1023_v25 = vmul.f32 1.442695, %v1020_v24 }
 0xb12   :  { %v3446_v5 = vpop.eup %3445 }
 0xb13   :  { %v1027_v7 = vpop.xlane.xlu2 %1026  ;;  %v1089_v11 = vmul.f32 %v3446_v5, %v3438_v49  ;;  %v1183_v26 = vpop.xlane.xlu1 %1182 }
 0xb14   :  { %3447 = vrcp.f32 %v1027_v7  ;;  %v1187_v28 = vsub.f32 %v1176_v52, %v1183_v26 }
 0xb15   :  { %3174 = vmatmul.msk.f32.gmra.mxu0 %vm311_vm8, %v1089_v11  ;;  %3449 = vpow2.f32 %v1023_v25 }
 0xb16   :  { %v1189_v8 = vmul.f32 1.442695, %v1187_v28 }
 0xb18   :  { %3451 = vpow2.f32 %v1189_v8 }
 0xb1a   :  { %v3448_v12 = vpop.eup %3447 }
 0xb1b   :  { %v1033_v15 = vmul.f32 %v3448_v12, %v3440_v56  ;;  %v3450_v22 = vpop.eup %3449  ;;  %v1198_v44 = vpop.xlane.xlu2 %1197 }
 0xb1c   :  { %v1028_v32 = vsel %vm311_vm8, %v3450_v22, 0.0 }
 0xb1d   :  { %3175 = vmatmul.msk.f32.vlgmr.msra.gmra.mxu1 %vm311_vm8, %v1033_v15  ;;  %3185 = vmatmul.msk.f32.vlgmr.msra.gmra.mxu0 %vm110_vm0, %v1236_v14  ;;  %v3375_v15 = vld [vmem:[%s4816_s14 + $0x1] ss:$0 sm:$0xff] }
 0xb1e   :  { %v3452_v34 = vpop.eup %3451 }
 0xb25   :  { %3186 = vmatmul.msk.f32.gmra.mxu0 %vm110_vm0, %v1237_v16 }
 0xb8a   :  { %v4231_v18 = vpop.f32.mrf.mxu0 }
 0xb92   :  { %v4233_v20 = vpop.f32.mrf.mxu0 }
 0xb9a   :  { %v1261_v27 = vpop.f32.mrf.mxu0  ;;  %v1144_v60 = vpop.f32.mrf.mxu1 }
 0xb9b   :  { %v1262_v13 = vadd.f32 %v1261_v27, %v3930_v33  ;;  %v1193_v33 = vsel %vm311_vm8, %v3452_v34, 0.0  ;;  %v1145_v63 = vadd.f32 %v1144_v60, %v4231_v18  ;;  %v3210_v60 = vld [vmem:[%s4821_s19 + $0xa8] sm:$0xff] }
 0xb9d   :  { %v1267_v6 = vsel %vm311_vm8, %v1262_v13, -inf }
 0xb9e   :  { %1268 = vmax.xlane.f32.xlu0 %v1267_v6 }
 0xba2   :  { %v1264_v21 = vpop.f32.mrf.mxu0 }
 0xba3   :  { %v1265_v9 = vadd.f32 %v1264_v21, %v3937_v38 }
 0xba5   :  { %v1270_v31 = vsel %vm311_vm8, %v1265_v9, -inf }
 0xba6   :  { %1271 = vmax.xlane.f32.xlu1 %v1270_v31  ;;  %1029 = vadd.xlane.f32.xlu0 %v1028_v32  ;;  %v3201_v32 = vld [vmem:[%s4819_s17 + $0x38] sm:$0xff] }
 0xba7   :  { %1449 = vmatpush.msra.mxu3 %v3201_v32 }
 0xbae   :  { %1194 = vadd.xlane.f32.xlu1 %v1193_v33  ;;  %v3199_v33 = vld [vmem:[%s4819_s17 + $0x28] sm:$0xff] }
 0xc11   :  { %v1269_v35 = vpop.xlane.xlu0 %1268 }
 0xc12   :  { %v1273_v36 = vsub.f32 %v1262_v13, %v1269_v35  ;;  %v3198_v35 = vld [vmem:[%s4819_s17 + $0x20] sm:$0xff] }
 0xc14   :  { %v1275_v29 = vmul.f32 1.442695, %v1273_v36 }
 0xc16   :  { %3453 = vpow2.f32 %v1275_v29 }
 0xc19   :  { %v1272_v17 = vpop.xlane.xlu1 %1271  ;;  %v1030_v37 = vpop.xlane.xlu0 %1029 }
 0xc1a   :  { %v1274_v23 = vsub.f32 %v1265_v9, %v1272_v17  ;;  %3455 = vrcp.f32 %v1030_v37  ;;  %v3220_v37 = vld [vmem:[%s4821_s19 + $0xf8] sm:$0xff] }
 0xc1b   :  { %1488 = vmatpush.msrb.mxu0 %v3220_v37  ;;  %v3224_v37 = vld [vmem:[%s4823_s21 + $0x20] sm:$0xff] }
 0xc1c   :  { %v3454_v38 = vpop.eup %3453  ;;  %v1277_v39 = vmul.f32 1.442695, %v1274_v23  ;;  %v3219_v23 = vld [vmem:[%s4821_s19 + $0xf0] sm:$0xff] }
 0xc1d   :  { %v1279_v40 = vsel %vm311_vm8, %v3454_v38, 0.0  ;;  %1489 = vmatpush.msrb.mxu0 %v3219_v23 }
 0xc1e   :  { %3457 = vpow2.f32 %v1277_v39  ;;  %1280 = vadd.xlane.f32.xlu0 %v1279_v40 }
 0xc20   :  { %v3456_v30 = vpop.eup %3455 }
 0xc21   :  { %v1195_v41 = vpop.xlane.xlu1 %1194  ;;  %v1034_v42 = vmul.f32 %v3456_v30, %v3450_v22  ;;  %v3217_v30 = vld [vmem:[%s4821_s19 + $0xe0] sm:$0xff] }
 0xc22   :  { %3459 = vrcp.f32 %v1195_v41 }
 0xc23   :  { %3176 = vmatmul.msk.f32.gmra.mxu1 %vm311_vm8, %v1034_v42  ;;  %3461 = vrcp.f32 %v1198_v44 }
 0xc24   :  { %v3458_v43 = vpop.eup %3457 }
 0xc25   :  { %v1282_v45 = vsel %vm311_vm8, %v3458_v43, 0.0 }
 0xc26   :  { %1283 = vadd.xlane.f32.xlu1 %v1282_v45  ;;  %v3215_v45 = vld [vmem:[%s4821_s19 + $0xd0] sm:$0xff] }
 0xc28   :  { %v3460_v46 = vpop.eup %3459 }
 0xc29   :  { %v1201_v47 = vmul.f32 %v3460_v46, %v3452_v34  ;;  %v3462_v0 = vpop.eup %3461  ;;  %v3200_v34 = vld [vmem:[%s4819_s17 + $0x30] sm:$0xff] }
 0xc2a   :  { %v1202_v48 = vmul.f32 %v3462_v0, %v4218_v61  ;;  %1450 = vmatpush.msra.mxu3 %v3200_v34  ;;  %v3213_v0 = vld [vmem:[%s4821_s19 + $0xc0] sm:$0xff] }
 0xc2b   :  { %3181 = vmatmul.msk.f32.vlgmr.msrb.gmra.mxu3 %vm311_vm8, %v1201_v47 }
 0xc2c   :  { %1451 = vmatpush.msra.mxu3 %v3199_v33 }
 0xc2e   :  { %1452 = vmatpush.msra.mxu3 %v3198_v35 }
 0xc33   :  { %3182 = vmatmul.msk.f32.gmra.mxu3 %vm311_vm8, %v1202_v48 }
 0xc91   :  { %v1281_v49 = vpop.xlane.xlu0 %1280 }
 0xc92   :  { %3463 = vrcp.f32 %v1281_v49 }
 0xc98   :  { %v3464_v51 = vpop.eup %3463 }
 0xc99   :  { %v1287_v52 = vmul.f32 %v3464_v51, %v3454_v38  ;;  %v1284_v54 = vpop.xlane.xlu1 %1283  ;;  %v3218_v38 = vld [vmem:[%s4821_s19 + $0xe8] sm:$0xff] }
 0xc9a   :  { %3465 = vrcp.f32 %v1284_v54  ;;  %1490 = vmatpush.msrb.mxu0 %v3218_v38  ;;  %v3211_v54 = vld [vmem:[%s4821_s19 + $0xb0] sm:$0xff] }
 0xc9b   :  { %3187 = vmatmul.msk.f32.vlgmr.msrb.gmra.mxu1 %vm311_vm8, %v1287_v52  ;;  %v3376_v52 = vld [vmem:[%s4817_s15 + $0x1] ss:$0 sm:$0xff]  ;;  %s3643_s15 = smov 32  }
 0xc9c   :  { %1491 = vmatpush.msrb.mxu0 %v3217_v30 }
 0xca0   :  { %v3466_v55 = vpop.eup %3465  ;;  %v1147_v61 = vpop.f32.mrf.mxu1 }
 0xca1   :  { %v1288_v56 = vmul.f32 %v3466_v55, %v3458_v43  ;;  %v1148_v7 = vadd.f32 %v1147_v61, %v4233_v20  ;;  %v3216_v43 = vld [vmem:[%s4821_s19 + $0xd8] sm:$0xff] }
 0xca2   :  { %1492 = vmatpush.msrb.mxu0 %v3216_v43  ;;  %v4393_v43 = vld [vmem:[%s4825_s23 + $0x10] sm:$0xff] }
 0xca3   :  { %3188 = vmatmul.msk.f32.gmra.mxu1 %vm311_vm8, %v1288_v56 }
 0xca4   :  { %1493 = vmatpush.msrb.mxu0 %v3215_v45  ;;  %v1625_v45 = vld [vmem:[%s4824_s22 + $0x10] sm:$0xff] }
 0xcae   :  { %v1228_v62 = vpop.f32.mrf.mxu3 }
 0xcaf   :  { %v1234_v2 = vadd.f32 %v1228_v62, %v1145_v63  ;;  %v3209_v63 = vld [vmem:[%s4821_s19 + $0xa0] sm:$0xff] }
 0xcb6   :  { %v1231_v5 = vpop.f32.mrf.mxu3 }
 0xcb7   :  { %v1235_v11 = vadd.f32 %v1231_v5, %v1148_v7 }
 0xd18   :  { %v1314_v3 = vpop.f32.mrf.mxu1 }
 0xd19   :  { %v1320_v4 = vadd.f32 %v1314_v3, %v1234_v2 }
 0xd1b   :  { %3194 = vmatmul.msk.f32.vlgmr.msra.gmra.mxu2 %vm110_vm0, %v1320_v4  ;;  %v3208_v4 = vld [vmem:[%s4821_s19 + $0x98] sm:$0xff] }
 0xd20   :  { %v1317_v12 = vpop.f32.mrf.mxu1 }
 0xd21   :  { %v1321_v14 = vadd.f32 %v1317_v12, %v1235_v11 }
 0xd23   :  { %3195 = vmatmul.msk.f32.gmra.mxu2 %vm110_vm0, %v1321_v14 }
 0xd9e   :  { %v1355_v16 = vpop.f32.mrf.mxu2 }
 0xd9f   :  { %v1356_v19 = vadd.f32 %v3375_v15, %v1355_v16  ;;  %v3206_v16 = vld [vmem:[%s4821_s19 + $0x88] sm:$0xff] }
 0xda1   :  { %v1361_v18 = vadd.f32 %v1356_v19, %v4087_v53  ;;  %v3205_v19 = vld [vmem:[%s4821_s19 + $0x80] sm:$0xff] }
 0xda3   :  { %v1367_v24 = vsel %vm110_vm0, %v1361_v18, 0.0 }
 0xda4   :  { %1368 = vadd.xlane.f32.xlu2 %v1367_v24  ;;  %v3378_v24 = vld [vmem:[%s4820_s18 + $0x1] ss:$0 sm:$0xff]  ;;  %s4862_s18 = sld [smem:[#allocation20_spill]] }
 0xda6   :  { %v1358_v25 = vpop.f32.mrf.mxu2 }
 0xda7   :  { %v1359_v26 = vadd.f32 %v3375_v15, %v1358_v25  ;;  %v3207_v15 = vld [vmem:[%s4821_s19 + $0x90] sm:$0xff] }
 0xda9   :  { %v1362_v20 = vadd.f32 %v1359_v26, %v4091_v57 }
 0xdab   :  { %v1370_v27 = vsel %vm110_vm0, %v1362_v20, 0.0 }
 0xdac   :  { %1371 = vadd.xlane.f32.xlu0 %v1370_v27 }
 0xe17   :  { %v1369_v13 = vpop.xlane.xlu2 %1368 }
 0xe18   :  { %v1373_v28 = vmul.f32 %v1369_v13, %v3797_v10 }
 0xe1a   :  { %v1375_v6 = vsub.f32 %v1361_v18, %v1373_v28  ;;  %v1516_v18 = vld [vmem:[%s4823_s21 + $0x18] sm:$0xff] }
 0xe1b   :  { %1535 = vmatpush.msra.mxu1 %v1516_v18 }
 0xe1c   :  { %v1377_v8 = vmul.f32 %v1375_v6, %v1375_v6 }
 0xe1e   :  { %v1379_v22 = vsel %vm110_vm0, %v1377_v8, 0.0 }
 0xe1f   :  { %1380 = vadd.xlane.f32.xlu1 %v1379_v22  ;;  %v1372_v21 = vpop.xlane.xlu0 %1371  ;;  %v1515_v22 = vld [vmem:[%s4823_s21 + $0x10] sm:$0xff] }
 0xe20   :  { %v1374_v53 = vmul.f32 %v1372_v21, %v3797_v10  ;;  %1536 = vmatpush.msra.mxu1 %v1515_v22  ;;  %v1514_v21 = vld [vmem:[%s4823_s21 + $0x8] sm:$0xff]  ;;  %v4454_v22 = vld [vmem:[%s4824_s22 + $0x30] sm:$0xff] }
 0xe22   :  { %v4275_v9 = vsub.f32 %v1362_v20, %v1374_v53  ;;  %1537 = vmatpush.msra.mxu1 %v1514_v21  ;;  %v1513_v53 = vld [vmem:[%s4823_s21] sm:$0xff]  ;;  %v4459_v21 = vld [vmem:[%s4825_s23 + $0x38] sm:$0xff] }
 0xe24   :  { %v1378_v31 = vmul.f32 %v4275_v9, %v4275_v9  ;;  %1538 = vmatpush.msra.mxu1 %v1513_v53  ;;  %v4464_v53 = vld [vmem:[%s4825_s23 + $0x30] sm:$0xff] }
 0xe26   :  { %v1382_v57 = vsel %vm110_vm0, %v1378_v31, 0.0  ;;  %v3226_v31 = vld [vmem:[%s4823_s21 + $0x30] sm:$0xff] }
 0xe27   :  { %1383 = vadd.xlane.f32.xlu2 %v1382_v57  ;;  %v3379_v57 = vld [vmem:[%s4822_s20 + $0x1] ss:$0 sm:$0xff] }
 0xe92   :  { %v1381_v36 = vpop.xlane.xlu1 %1380 }
 0xe93   :  { %v1385_v29 = vmul.f32 %v1381_v36, %v3797_v10 }
 0xe95   :  { %v1387_v17 = vadd.f32 1e-05, %v1385_v29 }
 0xe97   :  { %3467 = vrsqrt.f32 %v1387_v17  ;;  %vm1395_vm10 = vweird.f32 %v1387_v17 }
 0xe9a   :  { %v1384_v39 = vpop.xlane.xlu2 %1383 }
 0xe9b   :  { %v1386_v40 = vmul.f32 %v1384_v39, %v3797_v10  ;;  %v3214_v10 = vld [vmem:[%s4821_s19 + $0xc8] sm:$0xff] }
 0xe9c   :  { %1494 = vmatpush.msrb.mxu0 %v3214_v10  ;;  %v1624_v10 = vld [vmem:[%s4824_s22 + $0x8] sm:$0xff] }
 0xe9d   :  { %v3468_v41 = vpop.eup %3467  ;;  %v1388_v42 = vadd.f32 1e-05, %v1386_v40 }
 0xe9e   :  { %v1390_v44 = vmul.f32 %v3468_v41, %v1387_v17  ;;  %vm1396_vm9 = vweird.f32 %v3468_v41  ;;  %1495 = vmatpush.msrb.mxu0 %v3213_v0  ;;  %v3225_v17 = vld [vmem:[%s4823_s21 + $0x28] sm:$0xff]  ;;  %v3641_v0 = vmov 0.0  }
 0xe9f   :  { %3469 = vrsqrt.f32 %v1388_v42  ;;  %vm1397_vm11 = vmor %vm1395_vm10, %vm1396_vm9  ;;  %vm1405_vm13 = vweird.f32 %v1388_v42 }
 0xea0   :  { %v1391_v46 = vmul.f32 %v3468_v41, %v1390_v44  ;;  %1496 = vmatpush.msrb.mxu0 %v3212_v1  ;;  %v1626_v44 = vld [vmem:[%s4824_s22 + $0x18] sm:$0xff] }
 0xea1   :  { %1649 = vmatpush.msrb.mxu1 %v1626_v44 }
 0xea2   :  { %v1392_v47 = vmul.f32 0.5, %v1391_v46  ;;  %1497 = vmatpush.msrb.mxu0 %v3211_v54  ;;  %v4405_v46 = vld [vmem:[%s4825_s23 + $0x8] sm:$0xff] }
 0xea3   :  { %1650 = vmatpush.msrb.mxu1 %v1625_v45 }
 0xea4   :  { %v1393_v48 = vsub.f32 1.5, %v1392_v47  ;;  %1498 = vmatpush.msrb.mxu0 %v3210_v60  ;;  %v4414_v47 = vld [vmem:[%s4825_s23] sm:$0xff] }
 0xea5   :  { %v3470_v49 = vpop.eup %3469  ;;  %1651 = vmatpush.msrb.mxu1 %v1624_v10 }
 0xea6   :  { %v1394_v50 = vmul.f32 %v3468_v41, %v1393_v48  ;;  %v1400_v51 = vmul.f32 %v3470_v49, %v1388_v42  ;;  %vm1406_vm12 = vweird.f32 %v3470_v49  ;;  %1499 = vmatpush.msrb.mxu0 %v3209_v63  ;;  %v4388_v42 = vld [vmem:[%s4825_s23 + $0x18] sm:$0xff] }
 0xea7   :  { %vm1407_vm14 = vmor %vm1405_vm13, %vm1406_vm12 }
 0xea8   :  { %v1398_v55 = vsel %vm1397_vm11, %v3468_v41, %v1394_v50  ;;  %v1401_v56 = vmul.f32 %v3470_v49, %v1400_v51  ;;  %1500 = vmatpush.msrb.mxu0 %v3208_v4 }
 0xea9   :  { %v1409_v58 = vmul.f32 %v1398_v55, %v1375_v6  ;;  %v1623_v55 = vld [vmem:[%s4824_s22] sm:$0xff] }
 0xeaa   :  { %v1402_v61 = vmul.f32 0.5, %v1401_v56  ;;  %1501 = vmatpush.msrb.mxu0 %v3207_v15  ;;  %1652 = vmatpush.msrb.mxu1 %v1623_v55 }
 0xeab   :  { %v1414_v62 = vmul.f32 %v3376_v52, %v1409_v58  ;;  %v4430_v58 = vld [vmem:[%s4826_s24] ss:$0 sm:$0xff] }
 0xeac   :  { %v1403_v2 = vsub.f32 1.5, %v1402_v61  ;;  %1502 = vmatpush.msrb.mxu0 %v3206_v16 }
 0xead   :  { %v1419_v3 = vadd.f32 %v3377_v59, %v1414_v62 }
 0xeae   :  { %v1404_v5 = vmul.f32 %v3470_v49, %v1403_v2  ;;  %1503 = vmatpush.msrb.mxu0 %v3205_v19 }
 0xeaf   :  { %3203 = vmatmul.msk.f32.vlgmr.msra.gmra.mxu3 %vm110_vm0, %v1419_v3 }
 0xeb0   :  { %v1408_v7 = vsel %vm1407_vm14, %v3470_v49, %v1404_v5 }
 0xeb1   :  { %v1410_v11 = vmul.f32 %v1408_v7, %v4275_v9  ;;  %v3227_v9 = vld [vmem:[%s4823_s21 + $0x38] sm:$0xff] }
 0xeb2   :  { %1575 = vmatpush.msrb.mxu2 %v3227_v9  ;;  %v4472_v9 = vld [vmem:[%s4824_s22 + $0x28] sm:$0xff] }
 0xeb3   :  { %v1415_v12 = vmul.f32 %v3376_v52, %v1410_v11  ;;  %v1592_v52 = vld [vmem:[%s4861_s4] sm:$0xff] }
 0xeb4   :  { %1576 = vmatpush.msrb.mxu2 %v3226_v31  ;;  %v4477_v31 = vld [vmem:[%s4825_s23 + $0x28] sm:$0xff] }
 0xeb5   :  { %v1420_v14 = vadd.f32 %v3377_v59, %v1415_v12 }
 0xeb6   :  { %1577 = vmatpush.msrb.mxu2 %v3225_v17 }
 0xeb7   :  { %3204 = vmatmul.msk.f32.gmra.mxu3 %vm110_vm0, %v1420_v14 }
 0xeb8   :  { %1578 = vmatpush.msrb.mxu2 %v3224_v37 }
 0xeba   :  { %1679 = vmatpush.msra.mxu2 %v4388_v42 }
 0xebc   :  { %1680 = vmatpush.msra.mxu2 %v4393_v43 }
 0xebe   :  { %1681 = vmatpush.msra.mxu2 %v4405_v46 }
 0xec0   :  { %1682 = vmatpush.msra.mxu2 %v4414_v47 }
 0xf32   :  { %v1454_v25 = vpop.f32.mrf.mxu3 }
 0xf33   :  { %v1455_v26 = vadd.f32 %v3378_v24, %v1454_v25 }
 0xf35   :  { %vm1460_vm15 = vcmp.ge.f32.partialorder %v1455_v26, 0.0  ;;  %v1462_v20 = vmul.f32 0.01, %v1455_v26 }
 0xf37   :  { %v1464_v27 = vsel %vm1460_vm15, %v1455_v26, %v1462_v20 }
 0xf38   :  { %1504 = vmatmul.f32.vlgmr.msrb.gmra.mxu0 %v1464_v27 }
 0xf3a   :  { %v1457_v13 = vpop.f32.mrf.mxu3 }
 0xf3b   :  { %v1458_v28 = vadd.f32 %v3378_v24, %v1457_v13 }
 0xf3d   :  { %vm1461_vm1 = vcmp.ge.f32.partialorder %v1458_v28, 0.0  ;;  %v1463_v6 = vmul.f32 0.01, %v1458_v28 }
 0xf3f   :  { %v1465_v8 = vsel %vm1461_vm1, %v1458_v28, %v1463_v6  ;;  %v1593_v6 = vld [vmem:[%s4861_s4 + $0x8] sm:$0xff]  ;;  %s3090_s4 = sshll.u32 %s4862_s18, 4  ;;  %s3091_s4 = int_to_ptr.hbm [resolvable:$true] %s3090_s4 }
 0xf40   :  { %1507 = vmatmul.f32.gmra.mxu0 %v1465_v8  ;;  %v4448_v8 = vld [vmem:[%s4824_s22 + $0x38] sm:$0xff] }
 0xf41   :  { %1923 = vmatpush.msra.mxu0 %v4448_v8 }
 0xf43   :  { %1924 = vmatpush.msra.mxu0 %v4454_v22 }
 0xf45   :  { %1925 = vmatpush.msra.mxu0 %v4472_v9 }
 0xfb5   :  { %v1505_v32 = vpop.f32.mrf.mxu0 }
 0xfb6   :  { %v1506_v34 = vadd.f32 %v3379_v57, %v1505_v32 }
 0xfb8   :  { %v1511_v33 = vadd.f32 %v1506_v34, %v1419_v3 }
 0xfba   :  { %3222 = vmatmul.msk.f32.vlgmr.msra.gmra.mxu1 %vm110_vm0, %v1511_v33  ;;  %v4506_v33 = vld [vmem:[%s4825_s23 + $0x20] sm:$0xff] }
 0xfbb   :  { %1949 = vmatpush.msra.mxu1 %v4459_v21 }
 0xfbd   :  { %v1508_v35 = vpop.f32.mrf.mxu0  ;;  %1950 = vmatpush.msra.mxu1 %v4464_v53 }
 0xfbe   :  { %v1509_v36 = vadd.f32 %v3379_v57, %v1508_v35  ;;  %v4486_v57 = vld [vmem:[%s4824_s22 + $0x20] sm:$0xff] }
 0xfbf   :  { %1926 = vmatpush.msra.mxu0 %v4486_v57  ;;  %1951 = vmatpush.msra.mxu1 %v4477_v31 }
 0xfc0   :  { %v1512_v29 = vadd.f32 %v1509_v36, %v1420_v14 }
 0xfc1   :  { %2120 = vmatpush.msrb.mxu0 %v4459_v21  ;;  %1952 = vmatpush.msra.mxu1 %v4506_v33 }
 0xfc2   :  { %3223 = vmatmul.msk.f32.gmra.mxu1 %vm110_vm0, %v1512_v29  ;;  %v3381_v29 = vld [vmem:[%s4826_s24 + $0x1] ss:$0 sm:$0xff] }
 0xfc3   :  { %2121 = vmatpush.msrb.mxu0 %v4464_v53 }
 0xfc5   :  { %2122 = vmatpush.msrb.mxu0 %v4477_v31 }
 0xfc7   :  { %2123 = vmatpush.msrb.mxu0 %v4506_v33 }
0x1037   :  { %v1540_v23 = vpop.f32.mrf.mxu1 }
0x1038   :  { %vm1546_vm2 = vcmp.ge.f32.partialorder %v1540_v23, 0.0  ;;  %v1548_v38 = vmul.f32 0.01, %v1540_v23 }
0x103a   :  { %v1550_v39 = vsel %vm1546_vm2, %v1540_v23, %v1548_v38 }
0x103b   :  { %3228 = vmatmul.msk.f32.vlgmr.msrb.gmra.mxu2 %vm110_vm0, %v1550_v39 }
0x103c   :  { %1777 = vmatpush.msrb.mxu2 %v4459_v21 }
0x103e   :  { %1778 = vmatpush.msrb.mxu2 %v4464_v53 }
0x103f   :  { %v1543_v40 = vpop.f32.mrf.mxu1 }
0x1040   :  { %vm1547_vm3 = vcmp.ge.f32.partialorder %v1543_v40, 0.0  ;;  %v1549_v30 = vmul.f32 0.01, %v1543_v40  ;;  %1779 = vmatpush.msrb.mxu2 %v4477_v31 }
0x1042   :  { %v1551_v41 = vsel %vm1547_vm3, %v1543_v40, %v1549_v30  ;;  %1780 = vmatpush.msrb.mxu2 %v4506_v33  ;;  %vm1827_vm3 = vcmask 254976  }
0x1043   :  { %3229 = vmatmul.msk.f32.gmra.mxu2 %vm110_vm0, %v1551_v41 }
0x104b   :  { %1683 = vmatmul.f32.vlgmr.msra.gmra.mxu2 %v3641_v0 }
0x104c   :  { %2016 = vmatpush.msra.mxu2 %v4388_v42 }
0x104e   :  { %2017 = vmatpush.msra.mxu2 %v4393_v43 }
0x1050   :  { %2018 = vmatpush.msra.mxu2 %v4405_v46 }
0x1052   :  { %2019 = vmatpush.msra.mxu2 %v4414_v47 }
0x1053   :  { %1781 = vmatmul.f32.vlgmr.msrb.gmra.mxu2 %v3641_v0 }
0x1054   :  { %2265 = vmatpush.msrb.mxu2 %v4448_v8 }
0x1056   :  { %2266 = vmatpush.msrb.mxu2 %v4454_v22 }
0x1058   :  { %2267 = vmatpush.msrb.mxu2 %v4472_v9 }
0x105a   :  { %2268 = vmatpush.msrb.mxu2 %v4486_v57 }
0x10be   :  { %v1580_v48 = vpop.f32.mrf.mxu2 }
0x10bf   :  { %v1588_v1 = vmul.f32 0.01, %v1580_v48  ;;  %vm1586_vm5 = vcmp.ge.f32.partialorder %v1580_v48, 0.0 }
0x10c1   :  { %v1590_v54 = vsel %vm1586_vm5, %v1580_v48, %v1588_v1 }
0x10c6   :  { %v1583_v49 = vpop.f32.mrf.mxu2 }
0x10c7   :  { %vm1587_vm4 = vcmp.ge.f32.partialorder %v1583_v49, 0.0  ;;  %v1589_v50 = vmul.f32 0.01, %v1583_v49 }
0x10c9   :  { %v1591_v51 = vsel %vm1587_vm4, %v1583_v49, %v1589_v50 }
0x10ca   :  { %1614 = vmatpush.msrb.mxu3 %v1591_v51 }
0x10cc   :  { %1615 = vmatpush.msrb.mxu3 %v1590_v54 }
0x10cd   :  { %3230 = vmatmul.msk.f32.vlgmr.msrb.gmra.mxu3 %vm311_vm8, %v1592_v52 }
0x10ce   :  { %v1684_v60 = vpop.f32.mrf.mxu2  ;;  %1752 = vmatpush.msra.mxu3 %v4448_v8 }
0x10d0   :  { %1753 = vmatpush.msra.mxu3 %v4454_v22 }
0x10d2   :  { %1754 = vmatpush.msra.mxu3 %v4472_v9 }
0x10d4   :  { %1755 = vmatpush.msra.mxu3 %v4486_v57 }
0x10d5   :  { %3231 = vmatmul.msk.f32.gmra.mxu3 %vm311_vm8, %v1593_v6 }
0x10d6   :  { %1845 = vmatpush.msrb.mxu3 %v4388_v42  ;;  %v1782_v37 = vpop.f32.mrf.mxu2 }
0x10d8   :  { %1846 = vmatpush.msrb.mxu3 %v4393_v43 }
0x10da   :  { %1847 = vmatpush.msrb.mxu3 %v4405_v46 }
0x10dc   :  { %1848 = vmatpush.msrb.mxu3 %v4414_v47 }
0x1150   :  { %v1617_v56 = vpop.f32.mrf.mxu3 }
0x1151   :  { %3232 = vmatmul.msk.f32.vlgmr.msrb.gmra.mxu1 %vm110_vm0, %v1617_v56 }
0x1152   :  { %2187 = vmatpush.msrb.mxu1 %v4388_v42 }
0x1154   :  { %2188 = vmatpush.msrb.mxu1 %v4393_v43 }
0x1156   :  { %2189 = vmatpush.msrb.mxu1 %v4405_v46 }
0x1158   :  { %2190 = vmatpush.msrb.mxu1 %v4414_v47  ;;  %v1620_v35 = vpop.f32.mrf.mxu3 }
0x1159   :  { %3233 = vmatmul.msk.f32.gmra.mxu1 %vm110_vm0, %v1620_v35 }
0x11ce   :  { %v1654_v59 = vpop.f32.mrf.mxu1 }
0x11cf   :  { %v4433_v61 = vadd.f32 %v4430_v58, %v1654_v59 }
0x11d1   :  { %v1687_v62 = vadd.f32 %v1684_v60, %v4433_v61 }
0x11d3   :  { %3471 = vtanh.f32 %v1687_v62  ;;  %v3234_v2 = vmul.f32 -1.442695, %v1687_v62 }
0x11d5   :  { %3473 = vpow2.f32 %v3234_v2 }
0x11d9   :  { %v3472_v63 = vpop.eup %3471 }
0x11da   :  { %1710 = vrot.lane.b32.xlu0 %v3472_v63, %s3642_s29 }
0x11db   :  { %v3474_v3 = vpop.eup %3473 }
0x11dc   :  { %v1691_v4 = vadd.f32 1.0, %v3474_v3 }
0x11de   :  { %3475 = vrcp.f32 %v1691_v4  ;;  %v1703_v15 = vand.u32 2147483648, %v1691_v4  ;;  %vm1697_vm7 = vweird.f32 %v1691_v4  ;;  %v1701_v16 = vand.u32 2147483647, %v1691_v4 }
0x11e0   :  { %v1704_v18 = vor.u32 1.1754944e-38, %v1703_v15  ;;  %vm1702_vm10 = vcmp.eq.f32.partialorder %v1701_v16, 8.507059e+37 }
0x11e4   :  { %v3476_v5 = vpop.eup %3475 }
0x11e5   :  { %v1693_v7 = vmul.f32 %v3476_v5, %v1691_v4  ;;  %vm1698_vm6 = vweird.f32 %v3476_v5 }
0x11e6   :  { %vm1699_vm9 = vmor %vm1697_vm7, %vm1698_vm6 }
0x11e7   :  { %v1694_v11 = vsub.f32 1.0, %v1693_v7 }
0x11e9   :  { %v1695_v12 = vmul.f32 %v3476_v5, %v1694_v11 }
0x11eb   :  { %v1696_v14 = vadd.f32 %v3476_v5, %v1695_v12 }
0x11ed   :  { %v1700_v19 = vsel %vm1699_vm9, %v3476_v5, %v1696_v14 }
0x11ee   :  { %v1705_v25 = vsel %vm1702_vm10, %v1704_v18, %v1700_v19 }
0x11ef   :  { %v1708_v20 = vmul.f32 0.0, %v1705_v25 }
0x124c   :  { %v1711_v24 = vpop.permute.xlu0 %1710 }
0x124d   :  { %v1713_v26 = vmul.f32 %v1711_v24, %v1705_v25 }
0x124f   :  { %1715 = vrot.lane.b32.xlu1 %v1713_v26, %s3643_s15 }
0x12c1   :  { %v1716_v27 = vpop.permute.xlu1 %1715 }
0x12c2   :  { %v4438_v13 = vadd.f32 %v1716_v27, %v1708_v20 }
0x12c4   :  { %3477 = vtanh.f32 %v4438_v13 }
0x12ca   :  { %v3478_v28 = vpop.eup %3477 }
0x12cb   :  { %1721 = vrot.lane.b32.xlu2 %v3478_v28, %s3642_s29  ;;  %v1878_v28 = vrot.slane %v4438_v13, 6 }
0x1325   :  { %v1722_v32 = vpop.permute.xlu2 %1721 }
0x1326   :  { %v1724_v34 = vmul.f32 %v1722_v32, %v1705_v25 }
0x1328   :  { %1736 = vrot.lane.b32.xlu0 %v1724_v34, %s3643_s15 }
0x139a   :  { %v1737_v36 = vpop.permute.xlu0 %1736 }
0x139b   :  { %3240 = vmatmul.msk.f32.vlgmr.msra.gmra.mxu3 %vm110_vm0, %v1737_v36 }
0x139c   :  { %2094 = vmatpush.msra.mxu3 %v4448_v8 }
0x139e   :  { %2095 = vmatpush.msra.mxu3 %v4454_v22 }
0x13a0   :  { %2096 = vmatpush.msra.mxu3 %v4472_v9 }
0x13a2   :  { %2097 = vmatpush.msra.mxu3 %v4486_v57 }
0x13a3   :  { %3246 = vmatmul.msk.f32.vlgmr.msrb.gmra.mxu3 %vm110_vm0, %v1737_v36 }
0x13a4   :  { %2291 = vmatpush.msrb.mxu3 %v4459_v21 }
0x13a6   :  { %2292 = vmatpush.msrb.mxu3 %v4464_v53 }
0x13a8   :  { %2293 = vmatpush.msrb.mxu3 %v4477_v31 }
0x13aa   :  { %2294 = vmatpush.msrb.mxu3 %v4506_v33 }
0x141e   :  { %v1757_v17 = vpop.f32.mrf.mxu3 }
0x141f   :  { %v1758_v23 = vadd.f32 %v3381_v29, %v1757_v17 }
0x1421   :  { %v1785_v38 = vadd.f32 %v1782_v37, %v1758_v23 }
0x1423   :  { %3479 = vtanh.f32 %v1785_v38  ;;  %v3245_v48 = vmul.f32 -1.442695, %v1785_v38 }
0x1426   :  { %v1850_v39 = vpop.f32.mrf.mxu3 }
0x1427   :  { %v1854_v40 = vrot.slane %v1850_v39, 6 }
0x1429   :  { %v3480_v30 = vpop.eup %3479  ;;  %v1856_v41 = vadd.f32 %v1854_v40, %v4433_v61 }
0x142a   :  { %1808 = vrot.lane.b32.xlu1 %v3480_v30, %s3642_s29 }
0x142b   :  { %3481 = vtanh.f32 %v1856_v41  ;;  %v3247_v45 = vmul.f32 -1.442695, %v1856_v41 }
0x142d   :  { %3483 = vpow2.f32 %v3247_v45 }
0x1431   :  { %v3482_v44 = vpop.eup %3481 }
0x1432   :  { %1882 = vrot.lane.b32.xlu2 %v3482_v44, %s3642_s29 }
0x1433   :  { %v3484_v10 = vpop.eup %3483 }
0x1434   :  { %v1860_v0 = vadd.f32 1.0, %v3484_v10 }
0x1436   :  { %3485 = vrcp.f32 %v1860_v0  ;;  %v1872_v59 = vand.u32 2147483648, %v1860_v0  ;;  %vm1866_vm11 = vweird.f32 %v1860_v0  ;;  %v1870_v60 = vand.u32 2147483647, %v1860_v0 }
0x1437   :  { %3487 = vpow2.f32 %v3245_v48 }
0x1438   :  { %v1873_v2 = vor.u32 1.1754944e-38, %v1872_v59  ;;  %vm1871_vm13 = vcmp.eq.f32.partialorder %v1870_v60, 8.507059e+37 }
0x143c   :  { %v3486_v49 = vpop.eup %3485 }
0x143d   :  { %v3488_v1 = vpop.eup %3487  ;;  %v1862_v50 = vmul.f32 %v3486_v49, %v1860_v0  ;;  %vm1867_vm8 = vweird.f32 %v3486_v49 }
0x143e   :  { %v1789_v51 = vadd.f32 1.0, %v3488_v1  ;;  %vm1868_vm12 = vmor %vm1866_vm11, %vm1867_vm8 }
0x143f   :  { %v1863_v52 = vsub.f32 1.0, %v1862_v50 }
0x1440   :  { %3489 = vrcp.f32 %v1789_v51  ;;  %v1801_v14 = vand.u32 2147483648, %v1789_v51  ;;  %vm1795_vm15 = vweird.f32 %v1789_v51  ;;  %v1799_v15 = vand.u32 2147483647, %v1789_v51 }
0x1441   :  { %v1864_v54 = vmul.f32 %v3486_v49, %v1863_v52 }
0x1442   :  { %v1802_v19 = vor.u32 1.1754944e-38, %v1801_v14  ;;  %vm1800_vm2 = vcmp.eq.f32.partialorder %v1799_v15, 8.507059e+37 }
0x1443   :  { %v1865_v55 = vadd.f32 %v3486_v49, %v1864_v54 }
0x1445   :  { %v1869_v62 = vsel %vm1868_vm12, %v3486_v49, %v1865_v55 }
0x1446   :  { %v3490_v56 = vpop.eup %3489  ;;  %v1874_v4 = vsel %vm1871_vm13, %v1873_v2, %v1869_v62 }
0x1447   :  { %v1791_v63 = vmul.f32 %v3490_v56, %v1789_v51  ;;  %vm1796_vm14 = vweird.f32 %v3490_v56  ;;  %v1880_v6 = vmul.f32 %v1878_v28, %v1874_v4 }
0x1448   :  { %vm1797_vm1 = vmor %vm1795_vm15, %vm1796_vm14 }
0x1449   :  { %v1792_v7 = vsub.f32 1.0, %v1791_v63 }
0x144b   :  { %v1793_v11 = vmul.f32 %v3490_v56, %v1792_v7 }
0x144d   :  { %v1794_v12 = vadd.f32 %v3490_v56, %v1793_v11 }
0x144f   :  { %v1798_v16 = vsel %vm1797_vm1, %v3490_v56, %v1794_v12 }
0x1450   :  { %v1803_v24 = vsel %vm1800_vm2, %v1802_v19, %v1798_v16 }
0x1451   :  { %v1806_v26 = vmul.f32 0.0, %v1803_v24 }
0x148c   :  { %v1883_v3 = vpop.permute.xlu2 %1882 }
0x148d   :  { %v1885_v5 = vmul.f32 %v1883_v3, %v1874_v4 }
0x148f   :  { %1887 = vrot.lane.b32.xlu0 %v1885_v5, %s3643_s15 }
0x149c   :  { %v1809_v18 = vpop.permute.xlu1 %1808 }
0x149d   :  { %v1811_v25 = vmul.f32 %v1809_v18, %v1803_v24 }
0x149f   :  { %1813 = vrot.lane.b32.xlu2 %v1811_v25, %s3643_s15 }
0x14f9   :  { %v1814_v20 = vpop.permute.xlu2 %1813 }
0x14fa   :  { %v4543_v27 = vadd.f32 %v1814_v20, %v1806_v26 }
0x14fc   :  { %3491 = vtanh.f32 %v4543_v27 }
0x1501   :  { %v1888_v32 = vpop.permute.xlu0 %1887 }
0x1502   :  { %v3492_v34 = vpop.eup %3491  ;;  %v4547_v35 = vadd.f32 %v1888_v32, %v1880_v6 }
0x1503   :  { %1819 = vrot.lane.b32.xlu0 %v3492_v34, %s3642_s29 }
0x1504   :  { %3493 = vtanh.f32 %v4547_v35 }
0x150a   :  { %v3494_v36 = vpop.eup %3493 }
0x150b   :  { %1893 = vrot.lane.b32.xlu1 %v3494_v36, %s3642_s29 }
0x1575   :  { %v1820_v29 = vpop.permute.xlu0 %1819 }
0x1576   :  { %v1822_v17 = vmul.f32 %v1820_v29, %v1803_v24  ;;  %v2049_v29 = vrot.slane %v4547_v35, 6 }
0x1578   :  { %1824 = vrot.lane.b32.xlu1 %v1822_v17, %s3643_s15 }
0x157d   :  { %v1894_v37 = vpop.permute.xlu1 %1893 }
0x157e   :  { %v1896_v23 = vmul.f32 %v1894_v37, %v1874_v4 }
0x1580   :  { %v1906_v38 = vrot.slane %v1896_v23, 2 }
0x1582   :  { %1907 = vrot.lane.b32.xlu2 %v1906_v38, %s3643_s15 }
0x15dc   :  { %v1908_v13 = vpop.permute.xlu2 %1907 }
0x15dd   :  { %3253 = vmatmul.msk.f32.vlgmr.msra.gmra.mxu0 %vm110_vm0, %v1908_v13  ;;  %3260 = vmatmul.msk.f32.vlgmr.msra.gmra.mxu2 %vm110_vm0, %v1908_v13 }
0x15de   :  { %2358 = vmatpush.msra.mxu0 %v4388_v42  ;;  %2458 = vmatpush.msra.mxu2 %v4459_v21  ;;  %v4570_v21 = vpop.f32.mrf.mxu1 }
0x15e0   :  { %2359 = vmatpush.msra.mxu0 %v4393_v43  ;;  %2459 = vmatpush.msra.mxu2 %v4464_v53 }
0x15e2   :  { %2360 = vmatpush.msra.mxu0 %v4405_v46  ;;  %2460 = vmatpush.msra.mxu2 %v4477_v31 }
0x15e4   :  { %2361 = vmatpush.msra.mxu0 %v4414_v47  ;;  %2461 = vmatpush.msra.mxu2 %v4506_v33  ;;  %v3382_v33 = vld [vmem:[%s4826_s24 + $0x1] ss:$0 sm:$0xff] }
0x15ea   :  { %v1825_v39 = vpop.permute.xlu1 %1824 }
0x15eb   :  { %1828 = vst.msk [vmem:[#allocation2] sm:$0x3] %vm1827_vm3, %v1825_v39  ;;  %3258 = vmatmul.msk.f32.vlgmr.msra.gmra.mxu1 %vm110_vm0, %v1825_v39 }
0x15ec   :  { %2432 = vmatpush.msra.mxu1 %v4448_v8 }
0x15ee   :  { %2433 = vmatpush.msra.mxu1 %v4454_v22 }
0x15f0   :  { %2434 = vmatpush.msra.mxu1 %v4472_v9 }
0x15f2   :  { %2435 = vmatpush.msra.mxu1 %v4486_v57 }
0x165a   :  { %v1928_v30 = vpop.f32.mrf.mxu0 }
0x165b   :  { %v1929_v41 = vadd.f32 %v3382_v33, %v1928_v30 }
0x1660   :  { %v2021_v53 = vpop.f32.mrf.mxu2 }
0x1661   :  { %v2025_v31 = vrot.slane %v2021_v53, 4 }
0x1663   :  { %v2027_v40 = vadd.f32 %v2025_v31, %v4433_v61 }
0x1665   :  { %3495 = vtanh.f32 %v2027_v40  ;;  %v3261_v50 = vmul.f32 -1.442695, %v2027_v40 }
0x1668   :  { %v1954_v44 = vpop.f32.mrf.mxu1 }
0x1669   :  { %v1957_v45 = vadd.f32 %v1954_v44, %v1929_v41 }
0x166b   :  { %v3496_v10 = vpop.eup %3495  ;;  %3497 = vtanh.f32 %v1957_v45  ;;  %v3259_v48 = vmul.f32 -1.442695, %v1957_v45 }
0x166c   :  { %2053 = vrot.lane.b32.xlu0 %v3496_v10, %s3642_s29 }
0x166d   :  { %3499 = vpow2.f32 %v3259_v48 }
0x1671   :  { %v3498_v0 = vpop.eup %3497 }
0x1672   :  { %1980 = vrot.lane.b32.xlu2 %v3498_v0, %s3642_s29 }
0x1673   :  { %v3500_v49 = vpop.eup %3499 }
0x1674   :  { %v1961_v1 = vadd.f32 1.0, %v3500_v49 }
0x1676   :  { %3501 = vrcp.f32 %v1961_v1  ;;  %v1973_v62 = vand.u32 2147483648, %v1961_v1  ;;  %vm1967_vm5 = vweird.f32 %v1961_v1  ;;  %v1971_v63 = vand.u32 2147483647, %v1961_v1 }
0x1677   :  { %3503 = vpow2.f32 %v3261_v50 }
0x1678   :  { %v1974_v4 = vor.u32 1.1754944e-38, %v1973_v62  ;;  %vm1972_vm7 = vcmp.eq.f32.partialorder %v1971_v63, 8.507059e+37 }
0x167c   :  { %v3502_v51 = vpop.eup %3501 }
0x167d   :  { %v1963_v52 = vmul.f32 %v3502_v51, %v1961_v1  ;;  %v3504_v54 = vpop.eup %3503  ;;  %vm1968_vm4 = vweird.f32 %v3502_v51 }
0x167e   :  { %v2031_v56 = vadd.f32 1.0, %v3504_v54  ;;  %vm1969_vm6 = vmor %vm1967_vm5, %vm1968_vm4 }
0x167f   :  { %v1964_v55 = vsub.f32 1.0, %v1963_v52 }
0x1680   :  { %3505 = vrcp.f32 %v2031_v56  ;;  %v2043_v19 = vand.u32 2147483648, %v2031_v56  ;;  %vm2037_vm10 = vweird.f32 %v2031_v56  ;;  %v2041_v18 = vand.u32 2147483647, %v2031_v56 }
0x1681   :  { %v1965_v59 = vmul.f32 %v3502_v51, %v1964_v55 }
0x1682   :  { %v2044_v25 = vor.u32 1.1754944e-38, %v2043_v19  ;;  %vm2042_vm11 = vcmp.eq.f32.partialorder %v2041_v18, 8.507059e+37 }
0x1683   :  { %v1966_v60 = vadd.f32 %v3502_v51, %v1965_v59 }
0x1685   :  { %v1970_v3 = vsel %vm1969_vm6, %v3502_v51, %v1966_v60 }
0x1686   :  { %v3506_v2 = vpop.eup %3505  ;;  %v1975_v11 = vsel %vm1972_vm7, %v1974_v4, %v1970_v3 }
0x1687   :  { %v2033_v5 = vmul.f32 %v3506_v2, %v2031_v56  ;;  %vm2038_vm9 = vweird.f32 %v3506_v2  ;;  %v1978_v6 = vmul.f32 %v1975_v11, %v4543_v27 }
0x1688   :  { %vm2039_vm8 = vmor %vm2037_vm10, %vm2038_vm9 }
0x1689   :  { %v2034_v14 = vsub.f32 1.0, %v2033_v5 }
0x168b   :  { %v2035_v15 = vmul.f32 %v3506_v2, %v2034_v14 }
0x168d   :  { %v2036_v16 = vadd.f32 %v3506_v2, %v2035_v15 }
0x168f   :  { %v2040_v24 = vsel %vm2039_vm8, %v3506_v2, %v2036_v16 }
0x1690   :  { %v2045_v26 = vsel %vm2042_vm11, %v2044_v25, %v2040_v24 }
0x1691   :  { %v2051_v17 = vmul.f32 %v2049_v29, %v2045_v26 }
0x16cc   :  { %v1981_v7 = vpop.permute.xlu2 %1980 }
0x16cd   :  { %v1983_v12 = vmul.f32 %v1981_v7, %v1975_v11 }
0x16cf   :  { %1985 = vrot.lane.b32.xlu0 %v1983_v12, %s3643_s15 }
0x16de   :  { %v2054_v20 = vpop.permute.xlu0 %2053 }
0x16df   :  { %v2056_v28 = vmul.f32 %v2054_v20, %v2045_v26 }
0x16e1   :  { %2058 = vrot.lane.b32.xlu1 %v2056_v28, %s3643_s15 }
0x1741   :  { %v1986_v32 = vpop.permute.xlu0 %1985 }
0x1742   :  { %v4581_v34 = vadd.f32 %v1986_v32, %v1978_v6 }
0x1744   :  { %3507 = vtanh.f32 %v4581_v34 }
0x174a   :  { %v3508_v36 = vpop.eup %3507 }
0x174b   :  { %1991 = vrot.lane.b32.xlu1 %v3508_v36, %s3642_s29 }
0x1753   :  { %v2059_v37 = vpop.permute.xlu1 %2058 }
0x1754   :  { %v4586_v23 = vadd.f32 %v2059_v37, %v2051_v17 }
0x1756   :  { %3509 = vtanh.f32 %v4586_v23  ;;  %v2220_v18 = vrot.slane %v4586_v23, 6 }
0x175c   :  { %v3510_v38 = vpop.eup %3509 }
0x175d   :  { %2064 = vrot.lane.b32.xlu2 %v3510_v38, %s3642_s29 }
0x17b7   :  { %v2065_v27 = vpop.permute.xlu2 %2064 }
0x17b8   :  { %v2067_v13 = vmul.f32 %v2065_v27, %v2045_v26 }
0x17ba   :  { %v2077_v39 = vrot.slane %v2067_v13, 4  ;;  %v4630_v13 = vadd.f32 %v4430_v58, %v4570_v21 }
0x17bc   :  { %2078 = vrot.lane.b32.xlu0 %v2077_v39, %s3643_s15 }
0x17bd   :  { %v1992_v53 = vpop.permute.xlu1 %1991 }
0x17be   :  { %v1994_v31 = vmul.f32 %v1992_v53, %v1975_v11 }
0x17c0   :  { %1996 = vrot.lane.b32.xlu2 %v1994_v31, %s3643_s15  ;;  %v3384_v31 = vld [vmem:[%s4826_s24 + $0x1] ss:$0 sm:$0xff] }
0x181a   :  { %v1997_v33 = vpop.permute.xlu2 %1996 }
0x181b   :  { %1999 = vst.msk [vmem:[#allocation2 + $0x2] sm:$0x3] %vm1827_vm3, %v1997_v33  ;;  %3272 = vmatmul.msk.f32.vlgmr.msrb.gmra.mxu0 %vm110_vm0, %v1997_v33 }
0x181c   :  { %2603 = vmatpush.msrb.mxu0 %v4448_v8 }
0x181e   :  { %2604 = vmatpush.msrb.mxu0 %v4454_v22 }
0x1820   :  { %2605 = vmatpush.msrb.mxu0 %v4472_v9  ;;  %v3383_v9 = vld [vmem:[%s4826_s24 + $0x1] ss:$0 sm:$0xff] }
0x1822   :  { %2606 = vmatpush.msrb.mxu0 %v4486_v57 }
0x182e   :  { %v2079_v35 = vpop.permute.xlu0 %2078 }
0x182f   :  { %3267 = vmatmul.msk.f32.vlgmr.msra.gmra.mxu3 %vm110_vm0, %v2079_v35  ;;  %3274 = vmatmul.msk.f32.vlgmr.msrb.gmra.mxu1 %vm110_vm0, %v2079_v35 }
0x1830   :  { %2525 = vmatpush.msra.mxu3 %v4388_v42 }
0x1832   :  { %2526 = vmatpush.msra.mxu3 %v4393_v43 }
0x1834   :  { %2527 = vmatpush.msra.mxu3 %v4405_v46 }
0x1836   :  { %2528 = vmatpush.msra.mxu3 %v4414_v47 }
0x1898   :  { %v2125_v41 = vpop.f32.mrf.mxu0 }
0x18ac   :  { %v2192_v8 = vpop.f32.mrf.mxu1 }
0x18ad   :  { %v2196_v40 = vrot.slane %v2192_v8, 2 }
0x18af   :  { %v2198_v22 = vadd.f32 %v2196_v40, %v4433_v61 }
0x18b1   :  { %3511 = vtanh.f32 %v2198_v22  ;;  %v3275_v46 = vmul.f32 -1.442695, %v2198_v22 }
0x18b2   :  { %v2099_v57 = vpop.f32.mrf.mxu3 }
0x18b3   :  { %v2100_v30 = vadd.f32 %v3383_v9, %v2099_v57 }
0x18b5   :  { %v2128_v44 = vadd.f32 %v2125_v41, %v2100_v30 }
0x18b7   :  { %v3512_v42 = vpop.eup %3511  ;;  %3513 = vtanh.f32 %v2128_v44  ;;  %v3273_v47 = vmul.f32 -1.442695, %v2128_v44 }
0x18b8   :  { %2224 = vrot.lane.b32.xlu1 %v3512_v42, %s3642_s29  ;;  %3515 = vpow2.f32 %v3275_v46 }
0x18b9   :  { %3517 = vpow2.f32 %v3273_v47 }
0x18bd   :  { %v3514_v43 = vpop.eup %3513 }
0x18be   :  { %2151 = vrot.lane.b32.xlu0 %v3514_v43, %s3642_s29  ;;  %v3516_v61 = vpop.eup %3515 }
0x18bf   :  { %v2202_v45 = vadd.f32 1.0, %v3516_v61  ;;  %v3518_v10 = vpop.eup %3517 }
0x18c0   :  { %v2132_v0 = vadd.f32 1.0, %v3518_v10 }
0x18c1   :  { %3519 = vrcp.f32 %v2202_v45  ;;  %v2214_v56 = vand.u32 2147483648, %v2202_v45  ;;  %vm2208_vm13 = vweird.f32 %v2202_v45  ;;  %v2212_v59 = vand.u32 2147483647, %v2202_v45 }
0x18c2   :  { %3521 = vrcp.f32 %v2132_v0  ;;  %v2144_v5 = vand.u32 2147483648, %v2132_v0  ;;  %vm2138_vm2 = vweird.f32 %v2132_v0  ;;  %v2142_v11 = vand.u32 2147483647, %v2132_v0 }
0x18c3   :  { %v2215_v63 = vor.u32 1.1754944e-38, %v2214_v56  ;;  %vm2213_vm15 = vcmp.eq.f32.partialorder %v2212_v59, 8.507059e+37 }
0x18c4   :  { %v2145_v14 = vor.u32 1.1754944e-38, %v2144_v5  ;;  %vm2143_vm5 = vcmp.eq.f32.partialorder %v2142_v11, 8.507059e+37 }
0x18c7   :  { %v3520_v48 = vpop.eup %3519 }
0x18c8   :  { %v2204_v49 = vmul.f32 %v3520_v48, %v2202_v45  ;;  %v3522_v1 = vpop.eup %3521  ;;  %vm2209_vm12 = vweird.f32 %v3520_v48 }
0x18c9   :  { %v2134_v51 = vmul.f32 %v3522_v1, %v2132_v0  ;;  %vm2210_vm14 = vmor %vm2208_vm13, %vm2209_vm12  ;;  %vm2139_vm1 = vweird.f32 %v3522_v1 }
0x18ca   :  { %v2205_v50 = vsub.f32 1.0, %v2204_v49  ;;  %vm2140_vm4 = vmor %vm2138_vm2, %vm2139_vm1 }
0x18cb   :  { %v2135_v54 = vsub.f32 1.0, %v2134_v51 }
0x18cc   :  { %v2206_v52 = vmul.f32 %v3520_v48, %v2205_v50 }
0x18cd   :  { %v2136_v60 = vmul.f32 %v3522_v1, %v2135_v54 }
0x18ce   :  { %v2207_v55 = vadd.f32 %v3520_v48, %v2206_v52 }
0x18cf   :  { %v2137_v2 = vadd.f32 %v3522_v1, %v2136_v60 }
0x18d0   :  { %v2211_v62 = vsel %vm2210_vm14, %v3520_v48, %v2207_v55 }
0x18d1   :  { %v2216_v3 = vsel %vm2213_vm15, %v2215_v63, %v2211_v62  ;;  %v2141_v12 = vsel %vm2140_vm4, %v3522_v1, %v2137_v2 }
0x18d2   :  { %v2146_v16 = vsel %vm2143_vm5, %v2145_v14, %v2141_v12  ;;  %v2222_v24 = vmul.f32 %v2220_v18, %v2216_v3 }
0x18d3   :  { %v2149_v28 = vmul.f32 %v2146_v16, %v4581_v34 }
0x192a   :  { %v2225_v4 = vpop.permute.xlu1 %2224 }
0x192b   :  { %v2227_v7 = vmul.f32 %v2225_v4, %v2216_v3 }
0x192d   :  { %2229 = vrot.lane.b32.xlu2 %v2227_v7, %s3643_s15 }
0x1930   :  { %v2152_v15 = vpop.permute.xlu0 %2151 }
0x1931   :  { %v2154_v19 = vmul.f32 %v2152_v15, %v2146_v16 }
0x1933   :  { %2156 = vrot.lane.b32.xlu1 %v2154_v19, %s3643_s15 }
0x1987   :  { %v2230_v25 = vpop.permute.xlu2 %2229 }
0x1988   :  { %v4613_v26 = vadd.f32 %v2230_v25, %v2222_v24 }
0x198a   :  { %3523 = vtanh.f32 %v4613_v26  ;;  %v2388_v5 = vrot.slane %v4613_v26, 6 }
0x1990   :  { %v3524_v20 = vpop.eup %3523 }
0x1991   :  { %2235 = vrot.lane.b32.xlu0 %v3524_v20, %s3642_s29 }
0x19a5   :  { %v2157_v6 = vpop.permute.xlu1 %2156 }
0x19a6   :  { %v4618_v32 = vadd.f32 %v2157_v6, %v2149_v28 }
0x19a8   :  { %3525 = vtanh.f32 %v4618_v32 }
0x19ae   :  { %v3526_v36 = vpop.eup %3525 }
0x19af   :  { %2162 = vrot.lane.b32.xlu2 %v3526_v36, %s3642_s29 }
0x1a03   :  { %v2236_v29 = vpop.permute.xlu0 %2235 }
0x1a04   :  { %v2238_v17 = vmul.f32 %v2236_v29, %v2216_v3 }
0x1a06   :  { %v2248_v37 = vrot.slane %v2238_v17, 6 }
0x1a08   :  { %2249 = vrot.lane.b32.xlu1 %v2248_v37, %s3643_s15  ;;  %v3385_v37 = vld [vmem:[%s4826_s24 + $0x1] ss:$0 sm:$0xff] }
0x1a09   :  { %v2163_v23 = vpop.permute.xlu2 %2162 }
0x1a0a   :  { %v2165_v38 = vmul.f32 %v2163_v23, %v2146_v16 }
0x1a0c   :  { %2167 = vrot.lane.b32.xlu0 %v2165_v38, %s3643_s15 }
0x1a7a   :  { %v2250_v27 = vpop.permute.xlu1 %2249 }
0x1a7b   :  { %3281 = vmatmul.msk.f32.vlgmr.msrb.gmra.mxu2 %vm110_vm0, %v2250_v27  ;;  %3288 = vmatmul.msk.f32.vlgmr.msra.gmra.mxu0 %vm110_vm0, %v2250_v27 }
0x1a7e   :  { %v2168_v34 = vpop.permute.xlu0 %2167 }
0x1a7f   :  { %2170 = vst.msk [vmem:[#allocation2 + $0x4] sm:$0x3] %vm1827_vm3, %v2168_v34  ;;  %3286 = vmatmul.msk.f32.vlgmr.msrb.gmra.mxu3 %vm110_vm0, %v2168_v34 }
0x1af8   :  { %v2363_v39 = vpop.f32.mrf.mxu0 }
0x1af9   :  { %v2366_v53 = vadd.f32 %v2363_v39, %v4630_v13 }
0x1afb   :  { %3527 = vtanh.f32 %v2366_v53  ;;  %v3289_v58 = vmul.f32 -1.442695, %v2366_v53 }
0x1afe   :  { %v2270_v33 = vpop.f32.mrf.mxu2 }
0x1aff   :  { %v2271_v8 = vadd.f32 %v3384_v31, %v2270_v33 }
0x1b01   :  { %v3528_v35 = vpop.eup %3527 }
0x1b02   :  { %v2296_v40 = vpop.f32.mrf.mxu3  ;;  %2392 = vrot.lane.b32.xlu2 %v3528_v35, %s3642_s29 }
0x1b03   :  { %v2299_v22 = vadd.f32 %v2296_v40, %v2271_v8 }
0x1b05   :  { %3529 = vtanh.f32 %v2299_v22  ;;  %v3287_v42 = vmul.f32 -1.442695, %v2299_v22 }
0x1b06   :  { %3531 = vpow2.f32 %v3289_v58 }
0x1b0b   :  { %v3530_v9 = vpop.eup %3529 }
0x1b0c   :  { %2322 = vrot.lane.b32.xlu1 %v3530_v9, %s3642_s29  ;;  %v3532_v21 = vpop.eup %3531 }
0x1b0d   :  { %v2370_v57 = vadd.f32 1.0, %v3532_v21 }
0x1b0f   :  { %3533 = vrcp.f32 %v2370_v57  ;;  %v2382_v47 = vand.u32 2147483648, %v2370_v57  ;;  %vm2376_vm7 = vweird.f32 %v2370_v57  ;;  %v2380_v61 = vand.u32 2147483647, %v2370_v57 }
0x1b10   :  { %3535 = vpow2.f32 %v3287_v42 }
0x1b11   :  { %v2383_v10 = vor.u32 1.1754944e-38, %v2382_v47  ;;  %vm2381_vm10 = vcmp.eq.f32.partialorder %v2380_v61, 8.507059e+37 }
0x1b15   :  { %v3534_v30 = vpop.eup %3533 }
0x1b16   :  { %v2372_v41 = vmul.f32 %v3534_v30, %v2370_v57  ;;  %vm2377_vm6 = vweird.f32 %v3534_v30  ;;  %v3536_v0 = vpop.eup %3535 }
0x1b17   :  { %vm2378_vm9 = vmor %vm2376_vm7, %vm2377_vm6  ;;  %v2303_v50 = vadd.f32 1.0, %v3536_v0 }
0x1b18   :  { %v2373_v44 = vsub.f32 1.0, %v2372_v41 }
0x1b19   :  { %3537 = vrcp.f32 %v2303_v50  ;;  %v2315_v59 = vand.u32 2147483648, %v2303_v50  ;;  %vm2309_vm11 = vweird.f32 %v2303_v50  ;;  %v2313_v60 = vand.u32 2147483647, %v2303_v50 }
0x1b1a   :  { %v2374_v43 = vmul.f32 %v3534_v30, %v2373_v44 }
0x1b1b   :  { %v2316_v63 = vor.u32 1.1754944e-38, %v2315_v59  ;;  %vm2314_vm13 = vcmp.eq.f32.partialorder %v2313_v60, 8.507059e+37 }
0x1b1c   :  { %v2375_v46 = vadd.f32 %v3534_v30, %v2374_v43 }
0x1b1e   :  { %v2379_v45 = vsel %vm2378_vm9, %v3534_v30, %v2375_v46 }
0x1b1f   :  { %v2384_v49 = vsel %vm2381_vm10, %v2383_v10, %v2379_v45  ;;  %v3538_v51 = vpop.eup %3537 }
0x1b20   :  { %v2305_v52 = vmul.f32 %v3538_v51, %v2303_v50  ;;  %vm2310_vm8 = vweird.f32 %v3538_v51  ;;  %v2390_v7 = vmul.f32 %v2388_v5, %v2384_v49 }
0x1b21   :  { %vm2311_vm12 = vmor %vm2309_vm11, %vm2310_vm8 }
0x1b22   :  { %v2306_v54 = vsub.f32 1.0, %v2305_v52 }
0x1b24   :  { %v2307_v55 = vmul.f32 %v3538_v51, %v2306_v54 }
0x1b26   :  { %v2308_v56 = vadd.f32 %v3538_v51, %v2307_v55 }
0x1b28   :  { %v2312_v62 = vsel %vm2311_vm12, %v3538_v51, %v2308_v56 }
0x1b29   :  { %v2317_v3 = vsel %vm2314_vm13, %v2316_v63, %v2312_v62 }
0x1b2a   :  { %v2320_v15 = vmul.f32 %v2317_v3, %v4618_v32 }
0x1b5c   :  { %v2393_v48 = vpop.permute.xlu2 %2392 }
0x1b5d   :  { %v2395_v1 = vmul.f32 %v2393_v48, %v2384_v49 }
0x1b5f   :  { %2397 = vrot.lane.b32.xlu0 %v2395_v1, %s3643_s15 }
0x1b7e   :  { %v2323_v2 = vpop.permute.xlu1 %2322 }
0x1b7f   :  { %v2325_v4 = vmul.f32 %v2323_v2, %v2317_v3 }
0x1b81   :  { %2327 = vrot.lane.b32.xlu2 %v2325_v4, %s3643_s15 }
0x1bd1   :  { %v2398_v11 = vpop.permute.xlu0 %2397 }
0x1bd2   :  { %v4641_v12 = vadd.f32 %v2398_v11, %v2390_v7 }
0x1bd4   :  { %3539 = vtanh.f32 %v4641_v12  ;;  %v2558_v56 = vrot.slane %v4641_v12, 6 }
0x1bda   :  { %v3540_v14 = vpop.eup %3539 }
0x1bdb   :  { %v2328_v16 = vpop.permute.xlu2 %2327  ;;  %2403 = vrot.lane.b32.xlu1 %v3540_v14, %s3642_s29  ;;  %v2683_v14 = vld [vmem:[%s4825_s23 + $0x18] sm:$0xff] }
0x1bdc   :  { %v4646_v19 = vadd.f32 %v2328_v16, %v2320_v15  ;;  %v2682_v15 = vld [vmem:[%s4825_s23 + $0x10] sm:$0xff]  ;;  %2696 = vmatpush.msrb.mxu2 %v2683_v14  ;;  %v4683_v16 = vld [vmem:[%s4825_s23 + $0x38] sm:$0xff] }
0x1bdd   :  { %2629 = vmatpush.msrb.mxu1 %v4683_v16  ;;  %2800 = vmatpush.msra.mxu0 %v4683_v16 }
0x1bde   :  { %3541 = vtanh.f32 %v4646_v19  ;;  %2697 = vmatpush.msrb.mxu2 %v2682_v15 }
0x1be4   :  { %v3542_v18 = vpop.eup %3541 }
0x1be5   :  { %2333 = vrot.lane.b32.xlu0 %v3542_v18, %s3642_s29  ;;  %v2680_v18 = vld [vmem:[%s4825_s23] sm:$0xff] }
0x1c4d   :  { %v2404_v24 = vpop.permute.xlu1 %2403 }
0x1c4e   :  { %v2406_v25 = vmul.f32 %v2404_v24, %v2384_v49 }
0x1c50   :  { %2416 = vrot.lane.b32.xlu2 %v2406_v25, %s3643_s15 }
0x1c57   :  { %v2334_v26 = vpop.permute.xlu0 %2333 }
0x1c58   :  { %v2336_v20 = vmul.f32 %v2334_v26, %v2317_v3  ;;  %v4698_v26 = vld [vmem:[%s4825_s23 + $0x30] sm:$0xff] }
0x1c59   :  { %2630 = vmatpush.msrb.mxu1 %v4698_v26  ;;  %2801 = vmatpush.msra.mxu0 %v4698_v26 }
0x1c5a   :  { %2338 = vrot.lane.b32.xlu1 %v2336_v20, %s3643_s15  ;;  %v4703_v20 = vld [vmem:[%s4825_s23 + $0x28] sm:$0xff] }
0x1c5b   :  { %2631 = vmatpush.msrb.mxu1 %v4703_v20  ;;  %2802 = vmatpush.msra.mxu0 %v4703_v20 }
0x1caa   :  { %v2417_v28 = vpop.permute.xlu2 %2416 }
0x1cab   :  { %3295 = vmatmul.msk.f32.vlgmr.msra.gmra.mxu1 %vm110_vm0, %v2417_v28  ;;  %3302 = vmatmul.msk.f32.vlgmr.msra.gmra.mxu3 %vm110_vm0, %v2417_v28  ;;  %v4710_v28 = vld [vmem:[%s4825_s23 + $0x20] sm:$0xff] }
0x1cac   :  { %2632 = vmatpush.msrb.mxu1 %v4710_v28  ;;  %2803 = vmatpush.msra.mxu0 %v4710_v28 }
0x1cae   :  { %2867 = vmatpush.msra.mxu1 %v2683_v14  ;;  %v3320_v14 = vld [vmem:[%s4824_s22 + $0x30] sm:$0xff] }
0x1cb0   :  { %2868 = vmatpush.msra.mxu1 %v2682_v15 }
0x1ccc   :  { %v2339_v6 = vpop.permute.xlu1 %2338 }
0x1ccd   :  { %2341 = vst.msk [vmem:[#allocation2 + $0x6] sm:$0x3] %vm1827_vm3, %v2339_v6  ;;  %3300 = vmatmul.msk.f32.vlgmr.msra.gmra.mxu2 %vm110_vm0, %v2339_v6 }
0x1d28   :  { %v2437_v23 = vpop.f32.mrf.mxu1 }
0x1d29   :  { %v2438_v38 = vadd.f32 %v3385_v37, %v2437_v23 }
0x1d2e   :  { %v2530_v32 = vpop.f32.mrf.mxu3 }
0x1d2f   :  { %v2534_v36 = vrot.slane %v2530_v32, 6 }
0x1d31   :  { %v2536_v29 = vadd.f32 %v2534_v36, %v4630_v13  ;;  %v3386_v36 = vld [vmem:[%s4826_s24 + $0x1] ss:$0 sm:$0xff] }
0x1d33   :  { %3543 = vtanh.f32 %v2536_v29  ;;  %v3303_v53 = vmul.f32 -1.442695, %v2536_v29 }
0x1d39   :  { %v3544_v17 = vpop.eup %3543 }
0x1d3a   :  { %2562 = vrot.lane.b32.xlu0 %v3544_v17, %s3642_s29 }
0x1d50   :  { %v2463_v27 = vpop.f32.mrf.mxu2 }
0x1d51   :  { %v2466_v34 = vadd.f32 %v2463_v27, %v2438_v38 }
0x1d53   :  { %3545 = vtanh.f32 %v2466_v34  ;;  %v3301_v31 = vmul.f32 -1.442695, %v2466_v34 }
0x1d54   :  { %3547 = vpow2.f32 %v3303_v53 }
0x1d55   :  { %3549 = vpow2.f32 %v3301_v31 }
0x1d59   :  { %v3546_v39 = vpop.eup %3545 }
0x1d5a   :  { %2489 = vrot.lane.b32.xlu2 %v3546_v39, %s3642_s29  ;;  %v3548_v33 = vpop.eup %3547 }
0x1d5b   :  { %v2540_v35 = vadd.f32 1.0, %v3548_v33  ;;  %v3550_v8 = vpop.eup %3549 }
0x1d5c   :  { %v2470_v40 = vadd.f32 1.0, %v3550_v8 }
0x1d5d   :  { %3551 = vrcp.f32 %v2540_v35  ;;  %v2552_v42 = vand.u32 2147483648, %v2540_v35  ;;  %vm2546_vm15 = vweird.f32 %v2540_v35  ;;  %v2550_v43 = vand.u32 2147483647, %v2540_v35 }
0x1d5e   :  { %3553 = vrcp.f32 %v2470_v40  ;;  %v2482_v49 = vand.u32 2147483648, %v2470_v40  ;;  %vm2476_vm5 = vweird.f32 %v2470_v40  ;;  %v2480_v1 = vand.u32 2147483647, %v2470_v40 }
0x1d5f   :  { %v2553_v61 = vor.u32 1.1754944e-38, %v2552_v42  ;;  %vm2551_vm2 = vcmp.eq.f32.partialorder %v2550_v43, 8.507059e+37 }
0x1d60   :  { %v2483_v51 = vor.u32 1.1754944e-38, %v2482_v49  ;;  %vm2481_vm7 = vcmp.eq.f32.partialorder %v2480_v1, 8.507059e+37 }
0x1d63   :  { %v3552_v22 = vpop.eup %3551 }
0x1d64   :  { %v2542_v9 = vmul.f32 %v3552_v22, %v2540_v35  ;;  %v3554_v21 = vpop.eup %3553  ;;  %vm2547_vm14 = vweird.f32 %v3552_v22 }
0x1d65   :  { %v2472_v30 = vmul.f32 %v3554_v21, %v2470_v40  ;;  %vm2548_vm1 = vmor %vm2546_vm15, %vm2547_vm14  ;;  %vm2477_vm4 = vweird.f32 %v3554_v21 }
0x1d66   :  { %v2543_v58 = vsub.f32 1.0, %v2542_v9  ;;  %vm2478_vm6 = vmor %vm2476_vm5, %vm2477_vm4 }
0x1d67   :  { %v2473_v44 = vsub.f32 1.0, %v2472_v30 }
0x1d68   :  { %v2544_v57 = vmul.f32 %v3552_v22, %v2543_v58 }
0x1d69   :  { %v2474_v47 = vmul.f32 %v3554_v21, %v2473_v44 }
0x1d6a   :  { %v2545_v41 = vadd.f32 %v3552_v22, %v2544_v57 }
0x1d6b   :  { %v2475_v48 = vadd.f32 %v3554_v21, %v2474_v47 }
0x1d6c   :  { %v2549_v46 = vsel %vm2548_vm1, %v3552_v22, %v2545_v41 }
0x1d6d   :  { %v2554_v10 = vsel %vm2551_vm2, %v2553_v61, %v2549_v46  ;;  %v2479_v50 = vsel %vm2478_vm6, %v3554_v21, %v2475_v48 }
0x1d6e   :  { %v2484_v54 = vsel %vm2481_vm7, %v2483_v51, %v2479_v50  ;;  %v2560_v59 = vmul.f32 %v2558_v56, %v2554_v10 }
0x1d6f   :  { %v2487_v63 = vmul.f32 %v2484_v54, %v4646_v19  ;;  %v2681_v19 = vld [vmem:[%s4825_s23 + $0x8] sm:$0xff] }
0x1d70   :  { %2698 = vmatpush.msrb.mxu2 %v2681_v19  ;;  %2869 = vmatpush.msra.mxu1 %v2681_v19 }
0x1d72   :  { %2699 = vmatpush.msrb.mxu2 %v2680_v18  ;;  %2870 = vmatpush.msra.mxu1 %v2680_v18 }
0x1dac   :  { %v2563_v45 = vpop.permute.xlu0 %2562 }
0x1dad   :  { %v2565_v0 = vmul.f32 %v2563_v45, %v2554_v10 }
0x1daf   :  { %2567 = vrot.lane.b32.xlu1 %v2565_v0, %s3643_s15 }
0x1db4   :  { %v2490_v52 = vpop.permute.xlu2 %2489 }
0x1db5   :  { %v2492_v55 = vmul.f32 %v2490_v52, %v2484_v54 }
0x1db7   :  { %2494 = vrot.lane.b32.xlu0 %v2492_v55, %s3643_s15 }
0x1e21   :  { %v2568_v60 = vpop.permute.xlu1 %2567 }
0x1e22   :  { %v4665_v62 = vadd.f32 %v2568_v60, %v2560_v59 }
0x1e24   :  { %3555 = vtanh.f32 %v4665_v62  ;;  %v2729_v59 = vrot.slane %v4665_v62, 6  ;;  %v3321_v62 = vld [vmem:[%s4824_s22 + $0x38] sm:$0xff] }
0x1e25   :  { %2774 = vmatpush.msrb.mxu3 %v3321_v62  ;;  %2945 = vmatpush.msra.mxu2 %v3321_v62 }
0x1e27   :  { %2775 = vmatpush.msrb.mxu3 %v3320_v14  ;;  %2946 = vmatpush.msra.mxu2 %v3320_v14 }
0x1e29   :  { %v2495_v2 = vpop.permute.xlu0 %2494 }
0x1e2a   :  { %v3556_v3 = vpop.eup %3555  ;;  %v4669_v4 = vadd.f32 %v2495_v2, %v2487_v63 }
0x1e2b   :  { %2573 = vrot.lane.b32.xlu2 %v3556_v3, %s3642_s29 }
0x1e2c   :  { %3557 = vtanh.f32 %v4669_v4 }
0x1e32   :  { %v3558_v5 = vpop.eup %3557 }
0x1e33   :  { %2500 = vrot.lane.b32.xlu1 %v3558_v5, %s3642_s29 }
0x1e85   :  { %v2574_v7 = vpop.permute.xlu2 %2573 }
0x1e86   :  { %v2576_v11 = vmul.f32 %v2574_v7, %v2554_v10 }
0x1e88   :  { %v2586_v12 = vrot.slane %v2576_v11, 2 }
0x1e8a   :  { %2587 = vrot.lane.b32.xlu0 %v2586_v12, %s3643_s15 }
0x1ea5   :  { %v2501_v24 = vpop.permute.xlu1 %2500 }
0x1ea6   :  { %v2503_v25 = vmul.f32 %v2501_v24, %v2484_v54 }
0x1ea8   :  { %2505 = vrot.lane.b32.xlu2 %v2503_v25, %s3643_s15  ;;  %v3319_v25 = vld [vmem:[%s4824_s22 + $0x28] sm:$0xff] }
0x1ea9   :  { %2776 = vmatpush.msrb.mxu3 %v3319_v25  ;;  %2947 = vmatpush.msra.mxu2 %v3319_v25 }
0x1efc   :  { %v2588_v6 = vpop.permute.xlu0 %2587 }
0x1efd   :  { %3309 = vmatmul.msk.f32.vlgmr.msrb.gmra.mxu0 %vm110_vm0, %v2588_v6  ;;  %3316 = vmatmul.msk.f32.vlgmr.msrb.gmra.mxu2 %vm110_vm0, %v2588_v6  ;;  %v3318_v6 = vld [vmem:[%s4824_s22 + $0x20] sm:$0xff] }
0x1efe   :  { %2777 = vmatpush.msrb.mxu3 %v3318_v6  ;;  %2948 = vmatpush.msra.mxu2 %v3318_v6 }
0x1f00   :  { %2971 = vmatpush.msra.mxu3 %v4683_v16 }
0x1f02   :  { %v2506_v32 = vpop.permute.xlu2 %2505  ;;  %2972 = vmatpush.msra.mxu3 %v4698_v26  ;;  %v3387_v26 = vld [vmem:[%s4826_s24 + $0x1] ss:$0 sm:$0xff] }
0x1f03   :  { %2508 = vst.msk [vmem:[#allocation2 + $0x8] sm:$0x3] %vm1827_vm3, %v2506_v32  ;;  %3314 = vmatmul.msk.f32.vlgmr.msrb.gmra.mxu1 %vm110_vm0, %v2506_v32 }
0x1f04   :  { %2973 = vmatpush.msra.mxu3 %v4703_v20 }
0x1f06   :  { %2974 = vmatpush.msra.mxu3 %v4710_v28 }
0x1f7a   :  { %v2608_v29 = vpop.f32.mrf.mxu0 }
0x1f7b   :  { %v2609_v17 = vadd.f32 %v3386_v36, %v2608_v29 }
0x1f80   :  { %v2634_v37 = vpop.f32.mrf.mxu1  ;;  %v2701_v23 = vpop.f32.mrf.mxu2 }
0x1f81   :  { %v2637_v38 = vadd.f32 %v2634_v37, %v2609_v17  ;;  %v2705_v27 = vrot.slane %v2701_v23, 4 }
0x1f83   :  { %3559 = vtanh.f32 %v2637_v38  ;;  %v2707_v34 = vadd.f32 %v2705_v27, %v4630_v13  ;;  %v3315_v31 = vmul.f32 -1.442695, %v2637_v38 }
0x1f85   :  { %3561 = vtanh.f32 %v2707_v34  ;;  %v3317_v33 = vmul.f32 -1.442695, %v2707_v34 }
0x1f86   :  { %3563 = vpow2.f32 %v3315_v31 }
0x1f87   :  { %3565 = vpow2.f32 %v3317_v33 }
0x1f89   :  { %v3560_v39 = vpop.eup %3559 }
0x1f8a   :  { %2660 = vrot.lane.b32.xlu0 %v3560_v39, %s3642_s29 }
0x1f8b   :  { %v3562_v53 = vpop.eup %3561 }
0x1f8c   :  { %2733 = vrot.lane.b32.xlu1 %v3562_v53, %s3642_s29  ;;  %v3564_v35 = vpop.eup %3563 }
0x1f8d   :  { %v3566_v8 = vpop.eup %3565  ;;  %v2641_v40 = vadd.f32 1.0, %v3564_v35 }
0x1f8e   :  { %v2711_v22 = vadd.f32 1.0, %v3566_v8 }
0x1f8f   :  { %3567 = vrcp.f32 %v2641_v40  ;;  %v2653_v46 = vand.u32 2147483648, %v2641_v40  ;;  %vm2647_vm10 = vweird.f32 %v2641_v40  ;;  %v2651_v47 = vand.u32 2147483647, %v2641_v40 }
0x1f90   :  { %3569 = vrcp.f32 %v2711_v22  ;;  %v2723_v10 = vand.u32 2147483648, %v2711_v22  ;;  %vm2717_vm12 = vweird.f32 %v2711_v22  ;;  %v2721_v48 = vand.u32 2147483647, %v2711_v22 }
0x1f91   :  { %v2654_v0 = vor.u32 1.1754944e-38, %v2653_v46  ;;  %vm2652_vm13 = vcmp.eq.f32.partialorder %v2651_v47, 8.507059e+37 }
0x1f92   :  { %v2724_v52 = vor.u32 1.1754944e-38, %v2723_v10  ;;  %vm2722_vm15 = vcmp.eq.f32.partialorder %v2721_v48, 8.507059e+37 }
0x1f95   :  { %v3568_v9 = vpop.eup %3567 }
0x1f96   :  { %v3570_v58 = vpop.eup %3569  ;;  %v2643_v21 = vmul.f32 %v3568_v9, %v2641_v40  ;;  %vm2648_vm9 = vweird.f32 %v3568_v9 }
0x1f97   :  { %v2713_v57 = vmul.f32 %v3570_v58, %v2711_v22  ;;  %vm2649_vm8 = vmor %vm2647_vm10, %vm2648_vm9  ;;  %vm2718_vm11 = vweird.f32 %v3570_v58 }
0x1f98   :  { %v2644_v30 = vsub.f32 1.0, %v2643_v21  ;;  %vm2719_vm14 = vmor %vm2717_vm12, %vm2718_vm11 }
0x1f99   :  { %v2714_v41 = vsub.f32 1.0, %v2713_v57 }
0x1f9a   :  { %v2645_v44 = vmul.f32 %v3568_v9, %v2644_v30 }
0x1f9b   :  { %v2715_v42 = vmul.f32 %v3570_v58, %v2714_v41 }
0x1f9c   :  { %v2646_v43 = vadd.f32 %v3568_v9, %v2645_v44 }
0x1f9d   :  { %v2716_v61 = vadd.f32 %v3570_v58, %v2715_v42 }
0x1f9e   :  { %v2650_v45 = vsel %vm2649_vm8, %v3568_v9, %v2646_v43 }
0x1f9f   :  { %v2655_v1 = vsel %vm2652_vm13, %v2654_v0, %v2650_v45  ;;  %v2720_v50 = vsel %vm2719_vm14, %v3570_v58, %v2716_v61 }
0x1fa0   :  { %v2725_v54 = vsel %vm2722_vm15, %v2724_v52, %v2720_v50  ;;  %v2658_v5 = vmul.f32 %v2655_v1, %v4669_v4 }
0x1fa1   :  { %v2731_v60 = vmul.f32 %v2729_v59, %v2725_v54 }
0x1ffc   :  { %v2661_v49 = vpop.permute.xlu0 %2660 }
0x1ffd   :  { %v2663_v51 = vmul.f32 %v2661_v49, %v2655_v1 }
0x1ffe   :  { %v2734_v55 = vpop.permute.xlu1 %2733 }
0x1fff   :  { %2665 = vrot.lane.b32.xlu1 %v2663_v51, %s3643_s15  ;;  %v2736_v56 = vmul.f32 %v2734_v55, %v2725_v54 }
0x2001   :  { %2738 = vrot.lane.b32.xlu2 %v2736_v56, %s3643_s15 }
0x205b   :  { %v2739_v63 = vpop.permute.xlu2 %2738 }
0x205c   :  { %v4729_v2 = vadd.f32 %v2739_v63, %v2731_v60 }
0x205e   :  { %3571 = vtanh.f32 %v4729_v2  ;;  %v2900_v52 = vrot.slane %v4729_v2, 6 }
0x2064   :  { %v3572_v3 = vpop.eup %3571 }
0x2065   :  { %2744 = vrot.lane.b32.xlu0 %v3572_v3, %s3642_s29 }
0x2071   :  { %v2666_v7 = vpop.permute.xlu1 %2665 }
0x2072   :  { %v4734_v11 = vadd.f32 %v2666_v7, %v2658_v5 }
0x2074   :  { %3573 = vtanh.f32 %v4734_v11 }
0x207a   :  { %v3574_v12 = vpop.eup %3573 }
0x207b   :  { %2671 = vrot.lane.b32.xlu2 %v3574_v12, %s3642_s29 }
0x20d5   :  { %v2672_v4 = vpop.permute.xlu2 %2671 }
0x20d6   :  { %v2674_v15 = vmul.f32 %v2672_v4, %v2655_v1 }
0x20d7   :  { %v2745_v19 = vpop.permute.xlu0 %2744 }
0x20d8   :  { %2676 = vrot.lane.b32.xlu0 %v2674_v15, %s3643_s15  ;;  %v2747_v18 = vmul.f32 %v2745_v19, %v2725_v54  ;;  %v3388_v15 = vld [vmem:[%s4826_s24 + $0x1] ss:$0 sm:$0xff] }
0x20da   :  { %v2757_v24 = vrot.slane %v2747_v18, 4 }
0x20dc   :  { %2758 = vrot.lane.b32.xlu1 %v2757_v24, %s3643_s15 }
0x214a   :  { %v2677_v32 = vpop.permute.xlu0 %2676 }
0x214b   :  { %2679 = vst.msk [vmem:[#allocation2 + $0xa] sm:$0x3] %vm1827_vm3, %v2677_v32  ;;  %3328 = vmatmul.msk.f32.vlgmr.msra.gmra.mxu0 %vm110_vm0, %v2677_v32 }
0x214e   :  { %v2759_v36 = vpop.permute.xlu1 %2758 }
0x214f   :  { %3323 = vmatmul.msk.f32.vlgmr.msrb.gmra.mxu3 %vm110_vm0, %v2759_v36  ;;  %3330 = vmatmul.msk.f32.vlgmr.msra.gmra.mxu1 %vm110_vm0, %v2759_v36 }
0x21c8   :  { %v2805_v37 = vpop.f32.mrf.mxu0 }
0x21cc   :  { %v2872_v29 = vpop.f32.mrf.mxu1 }
0x21cd   :  { %v2876_v17 = vrot.slane %v2872_v29, 2 }
0x21cf   :  { %v2878_v16 = vadd.f32 %v2876_v17, %v4630_v13 }
0x21d1   :  { %3575 = vtanh.f32 %v2878_v16  ;;  %v3331_v34 = vmul.f32 -1.442695, %v2878_v16 }
0x21d2   :  { %v2779_v20 = vpop.f32.mrf.mxu3 }
0x21d3   :  { %v2780_v28 = vadd.f32 %v3387_v26, %v2779_v20 }
0x21d5   :  { %v2808_v23 = vadd.f32 %v2805_v37, %v2780_v28 }
0x21d7   :  { %v3576_v38 = vpop.eup %3575  ;;  %3577 = vtanh.f32 %v2808_v23  ;;  %v3329_v33 = vmul.f32 -1.442695, %v2808_v23 }
0x21d8   :  { %2904 = vrot.lane.b32.xlu2 %v3576_v38, %s3642_s29  ;;  %3579 = vpow2.f32 %v3331_v34 }
0x21dd   :  { %v3578_v27 = vpop.eup %3577 }
0x21de   :  { %2831 = vrot.lane.b32.xlu1 %v3578_v27, %s3642_s29  ;;  %v3580_v39 = vpop.eup %3579 }
0x21df   :  { %v2882_v13 = vadd.f32 1.0, %v3580_v39 }
0x21e1   :  { %3581 = vrcp.f32 %v2882_v13  ;;  %v2894_v22 = vand.u32 2147483648, %v2882_v13  ;;  %vm2888_vm2 = vweird.f32 %v2882_v13  ;;  %v2892_v58 = vand.u32 2147483647, %v2882_v13 }
0x21e2   :  { %3583 = vpow2.f32 %v3329_v33 }
0x21e3   :  { %v2895_v30 = vor.u32 1.1754944e-38, %v2894_v22  ;;  %vm2893_vm5 = vcmp.eq.f32.partialorder %v2892_v58, 8.507059e+37  ;;  %v3025_v22 = vld [vmem:[%s4827_s25 + $0x18] sm:$0xff]  ;;  %v3023_v58 = vld [vmem:[%s4827_s25 + $0x8] sm:$0xff] }
0x21e4   :  { %3045 = vmatpush.msrb.mxu0 %v3025_v22  ;;  %3074 = vmatpush.msrb.mxu1 %v3025_v22 }
0x21e7   :  { %v3582_v53 = vpop.eup %3581 }
0x21e8   :  { %v2884_v31 = vmul.f32 %v3582_v53, %v2882_v13  ;;  %vm2889_vm1 = vweird.f32 %v3582_v53  ;;  %v3584_v9 = vpop.eup %3583 }
0x21e9   :  { %vm2890_vm4 = vmor %vm2888_vm2, %vm2889_vm1  ;;  %v2812_v57 = vadd.f32 1.0, %v3584_v9  ;;  %v3024_v9 = vld [vmem:[%s4827_s25 + $0x10] sm:$0xff] }
0x21ea   :  { %v2885_v35 = vsub.f32 1.0, %v2884_v31  ;;  %3046 = vmatpush.msrb.mxu0 %v3024_v9  ;;  %3075 = vmatpush.msrb.mxu1 %v3024_v9 }
0x21eb   :  { %3585 = vrcp.f32 %v2812_v57  ;;  %v2824_v10 = vand.u32 2147483648, %v2812_v57  ;;  %vm2818_vm7 = vweird.f32 %v2812_v57  ;;  %v2822_v0 = vand.u32 2147483647, %v2812_v57 }
0x21ec   :  { %v2886_v8 = vmul.f32 %v3582_v53, %v2885_v35  ;;  %3047 = vmatpush.msrb.mxu0 %v3023_v58  ;;  %3076 = vmatpush.msrb.mxu1 %v3023_v58 }
0x21ed   :  { %v2825_v49 = vor.u32 1.1754944e-38, %v2824_v10  ;;  %vm2823_vm10 = vcmp.eq.f32.partialorder %v2822_v0, 8.507059e+37 }
0x21ee   :  { %v2887_v40 = vadd.f32 %v3582_v53, %v2886_v8 }
0x21f0   :  { %v2891_v21 = vsel %vm2890_vm4, %v3582_v53, %v2887_v40 }
0x21f1   :  { %v2896_v44 = vsel %vm2893_vm5, %v2895_v30, %v2891_v21  ;;  %v3586_v43 = vpop.eup %3585  ;;  %v3022_v21 = vld [vmem:[%s4827_s25] sm:$0xff]  ;;  %s3644_s25 = smov [#allocation6]  }
0x21f2   :  { %v2814_v46 = vmul.f32 %v3586_v43, %v2812_v57  ;;  %vm2819_vm6 = vweird.f32 %v3586_v43  ;;  %v2902_v54 = vmul.f32 %v2900_v52, %v2896_v44  ;;  %3048 = vmatpush.msrb.mxu0 %v3022_v21  ;;  %3077 = vmatpush.msrb.mxu1 %v3022_v21  ;;  %s3088_s1 = sshll.u32 %s3644_s25, 4  ;;  %s3089_s1 = int_to_ptr.vmem [resolvable:$true] %s3088_s1 }
0x21f3   :  { %vm2820_vm9 = vmor %vm2818_vm7, %vm2819_vm6 }
0x21f4   :  { %v2815_v47 = vsub.f32 1.0, %v2814_v46 }
0x21f6   :  { %v2816_v61 = vmul.f32 %v3586_v43, %v2815_v47 }
0x21f8   :  { %v2817_v45 = vadd.f32 %v3586_v43, %v2816_v61 }
0x21fa   :  { %v2821_v48 = vsel %vm2820_vm9, %v3586_v43, %v2817_v45 }
0x21fb   :  { %v2826_v50 = vsel %vm2823_vm10, %v2825_v49, %v2821_v48 }
0x21fc   :  { %v2829_v59 = vmul.f32 %v2826_v50, %v4734_v11 }
0x2232   :  { %v2905_v41 = vpop.permute.xlu2 %2904 }
0x2233   :  { %v2907_v42 = vmul.f32 %v2905_v41, %v2896_v44 }
0x2235   :  { %2909 = vrot.lane.b32.xlu0 %v2907_v42, %s3643_s15 }
0x2250   :  { %v2832_v1 = vpop.permute.xlu1 %2831 }
0x2251   :  { %v2834_v51 = vmul.f32 %v2832_v1, %v2826_v50 }
0x2253   :  { %2836 = vrot.lane.b32.xlu2 %v2834_v51, %s3643_s15 }
0x22a7   :  { %v2910_v55 = vpop.permute.xlu0 %2909 }
0x22a8   :  { %v2912_v56 = vadd.f32 %v2910_v55, %v2902_v54 }
0x22aa   :  { %3587 = vtanh.f32 %v2912_v56 }
0x22ad   :  { %v2837_v60 = vpop.permute.xlu2 %2836 }
0x22ae   :  { %v2839_v63 = vadd.f32 %v2837_v60, %v2829_v59 }
0x22b0   :  { %v3588_v3 = vpop.eup %3587  ;;  %3589 = vtanh.f32 %v2839_v63 }
0x22b1   :  { %2915 = vrot.lane.b32.xlu1 %v3588_v3, %s3642_s29 }
0x22b6   :  { %v3590_v5 = vpop.eup %3589 }
0x22b7   :  { %2842 = vrot.lane.b32.xlu0 %v3590_v5, %s3642_s29 }
0x2323   :  { %v2916_v7 = vpop.permute.xlu1 %2915 }
0x2324   :  { %v2918_v12 = vmul.f32 %v2916_v7, %v2896_v44 }
0x2326   :  { %v2928_v62 = vrot.slane %v2918_v12, 6 }
0x2328   :  { %2929 = vrot.lane.b32.xlu2 %v2928_v62, %s3643_s15 }
0x2329   :  { %v2843_v2 = vpop.permute.xlu0 %2842 }
0x232a   :  { %v2845_v14 = vmul.f32 %v2843_v2, %v2826_v50 }
0x232c   :  { %2847 = vrot.lane.b32.xlu1 %v2845_v14, %s3643_s15 }
0x2382   :  { %v2930_v4 = vpop.permute.xlu2 %2929 }
0x2383   :  { %3337 = vmatmul.msk.f32.vlgmr.msra.gmra.mxu2 %vm110_vm0, %v2930_v4 }
0x239e   :  { %v2848_v11 = vpop.permute.xlu1 %2847 }
0x239f   :  { %2850 = vst.msk [vmem:[#allocation2 + $0xc] sm:$0x3] %vm1827_vm3, %v2848_v11  ;;  %3342 = vmatmul.msk.f32.vlgmr.msra.gmra.mxu3 %vm110_vm0, %v2848_v11 }
0x2406   :  { %v2950_v19 = vpop.f32.mrf.mxu2 }
0x2407   :  { %v2951_v18 = vadd.f32 %v3388_v15, %v2950_v19 }
0x2422   :  { %v2976_v24 = vpop.f32.mrf.mxu3 }
0x2423   :  { %v2979_v25 = vadd.f32 %v2976_v24, %v2951_v18 }
0x2425   :  { %3591 = vtanh.f32 %v2979_v25  ;;  %v3343_v32 = vmul.f32 -1.442695, %v2979_v25 }
0x2427   :  { %3593 = vpow2.f32 %v3343_v32 }
0x242b   :  { %v3592_v6 = vpop.eup %3591 }
0x242c   :  { %3002 = vrot.lane.b32.xlu0 %v3592_v6, %s3642_s29 }
0x242d   :  { %v3594_v36 = vpop.eup %3593 }
0x242e   :  { %v2983_v29 = vadd.f32 1.0, %v3594_v36 }
0x2430   :  { %3595 = vrcp.f32 %v2983_v29  ;;  %v2995_v37 = vand.u32 2147483648, %v2983_v29  ;;  %vm2989_vm11 = vweird.f32 %v2983_v29  ;;  %v2993_v23 = vand.u32 2147483647, %v2983_v29 }
0x2432   :  { %v2996_v27 = vor.u32 1.1754944e-38, %v2995_v37  ;;  %vm2994_vm13 = vcmp.eq.f32.partialorder %v2993_v23, 8.507059e+37 }
0x2436   :  { %v3596_v17 = vpop.eup %3595 }
0x2437   :  { %v2985_v16 = vmul.f32 %v3596_v17, %v2983_v29  ;;  %vm2990_vm8 = vweird.f32 %v3596_v17 }
0x2438   :  { %vm2991_vm12 = vmor %vm2989_vm11, %vm2990_vm8 }
0x2439   :  { %v2986_v26 = vsub.f32 1.0, %v2985_v16 }
0x243b   :  { %v2987_v20 = vmul.f32 %v3596_v17, %v2986_v26 }
0x243d   :  { %v2988_v28 = vadd.f32 %v3596_v17, %v2987_v20 }
0x243f   :  { %v2992_v38 = vsel %vm2991_vm12, %v3596_v17, %v2988_v28 }
0x2440   :  { %v2997_v39 = vsel %vm2994_vm13, %v2996_v27, %v2992_v38 }
0x2441   :  { %v3000_v53 = vmul.f32 %v2997_v39, %v2839_v63 }
0x249e   :  { %v3003_v34 = vpop.permute.xlu0 %3002 }
0x249f   :  { %v3005_v13 = vmul.f32 %v3003_v34, %v2997_v39 }
0x24a1   :  { %3007 = vrot.lane.b32.xlu2 %v3005_v13, %s3643_s15 }
0x24fb   :  { %v3008_v31 = vpop.permute.xlu2 %3007 }
0x24fc   :  { %v3010_v33 = vadd.f32 %v3008_v31, %v3000_v53 }
0x24fe   :  { %3597 = vtanh.f32 %v3010_v33 }
0x2504   :  { %v3598_v35 = vpop.eup %3597 }
0x2505   :  { %3013 = vrot.lane.b32.xlu1 %v3598_v35, %s3642_s29 }
0x2577   :  { %v3014_v8 = vpop.permute.xlu1 %3013 }
0x2578   :  { %v3016_v40 = vmul.f32 %v3014_v8, %v2997_v39 }
0x257a   :  { %3018 = vrot.lane.b32.xlu0 %v3016_v40, %s3643_s15  ;;  %s3026_s15 = sld [smem:[#allocation3]] }
0x2580   :  { %s3344_s27 = sshll.u32 %s3026_s15, 1 }
0x2581   :  { %s3028_s19 = scalar_lea.vmem [#allocation2], %s3344_s27 }
0x25ec   :  { %v3019_v57 = vpop.permute.xlu0 %3018 }
0x25ed   :  { %3021 = vst.msk [vmem:[#allocation2 + $0xe] sm:$0x3] %vm1827_vm3, %v3019_v57 }
0x25f4   :  { %v3029_v30 = vld [vmem:[%s3028_s19] sm:$0x1]  ;;  %v3348_v41 = vld [vmem:[%s3103_s2 + $0x1] sm:$0x1] }
0x25f5   :  { %3345 = vmatmul.msk.f32.vlgmr.msrb.gmra.mxu0 %vm110_vm0, %v3029_v30  ;;  %3349 = vmatmul.msk.f32.vlgmr.msrb.gmra.mxu1 %vm110_vm0, %v3348_v41 }
0x2672   :  { %v3050_v44 = vpop.f32.mrf.mxu0  ;;  %v3079_v42 = vpop.f32.mrf.mxu1 }
0x2673   :  { %3053 = vst [vmem:[#allocation6] sm:$0x1] %v3050_v44 }
0x2674   :  { %3082 = vst [vmem:[#allocation6 + $0x1] sm:$0x1] %v3079_v42 }
0x2675   :  { %3093 = dma.vmem_to_hbm [thread:$0]  %s3089_s1, 32, %s3091_s4, [#allocation4]  }
0x2676   :  { %3637 = dma.done.wait [#allocation4], 32  }
0x2677   :  { %3638 = vsyncadd [#allocation4], 4294967264 }
0x2678   :  { %3098 = vsyncpa [#allocation4], 1 }
0x2679   :  { %3099 = vsyncpa [#allocation5], 1 }

</bundles_post_ra>
